<compile_context>
chip_gen: v7x
topology: tpu7x:2x2x1
jax: 0.10.0
libtpu: 0.0.40
codegen_flags: <defaults>
</compile_context>

<pallas_src>
import jax
import jax.numpy as jnp
from jax import lax
from jax.experimental import pallas as pl
from jax.experimental.pallas import tpu as pltpu


def _bottleneck_kernel(x_ref, w1_ref, b1_ref, w2_ref, b2_ref, w3_ref, b3_ref,
                       out_ref, h1p_ref):
    NB, H, W, Cin = x_ref.shape
    width = w1_ref.shape[1]
    cout = w3_ref.shape[1]
    M = NB * H * W

    x = x_ref[...].astype(jnp.float32)            # [NB, H, W, Cin]
    xf = x.reshape(M, Cin)                        # identity path (Cin == cout)

    # ---- conv1 (1x1, BN1 scale folded into w1) + bias + relu -------------
    h1 = jnp.dot(xf.astype(jnp.bfloat16), w1_ref[...],
                 preferred_element_type=jnp.float32)
    h1 = jnp.maximum(h1 + b1_ref[...], 0.0)       # [M, width], f32

    # ---- conv2 (3x3, stride 1, pad 1) as ONE K = 9*width contraction -----
    # bf16 halo scratch: zero only the 1-pixel border (== the conv padding),
    # then write the interior.  Re-zeroing the border every step keeps this
    # correct even if a megacore splits the 'parallel' axis across cores.
    zrow = jnp.zeros((NB, 1, W + 2, width), dtype=h1p_ref.dtype)
    zcol = jnp.zeros((NB, H, 1, width), dtype=h1p_ref.dtype)
    h1p_ref[:, 0:1, :, :] = zrow
    h1p_ref[:, H + 1:H + 2, :, :] = zrow
    h1p_ref[:, 1:H + 1, 0:1, :] = zcol
    h1p_ref[:, 1:H + 1, W + 1:W + 2, :] = zcol
    h1p_ref[:, 1:H + 1, 1:W + 1, :] = (
        h1.astype(jnp.bfloat16).reshape(NB, H, W, width))

    # im2col in bf16: slice the 9 shifted taps directly from the scratch ref
    # (no full padded-value load) and concatenate along channels -> [M, 9*width].
    # Tap order (ky, kx, ci) matches w2 = HWIO.reshape(9*width, width).
    taps = [h1p_ref[:, ky:ky + H, kx:kx + W, :]
            for ky in range(3) for kx in range(3)]
    tap = jnp.concatenate(taps, axis=-1).reshape(M, 9 * width)
    # TODO(synk): on v5e (128-deep MXU) group the taps into three K=3*width
    # dots accumulated in f32 to cap the concat's VMEM footprint; K=9*width
    # targets v6e/v7x's 256-deep MXU.
    h2 = jnp.dot(tap, w2_ref[...], preferred_element_type=jnp.float32)
    h2 = jnp.maximum(h2 + b2_ref[...], 0.0)       # [M, width], f32

    # ---- conv3 (1x1, BN3 scale folded) + bias + residual + relu ----------
    h3 = jnp.dot(h2.astype(jnp.bfloat16), w3_ref[...],
                 preferred_element_type=jnp.float32)
    out = jnp.maximum(h3 + b3_ref[...] + xf, 0.0)
    out_ref[...] = out.reshape(NB, H, W, cout).astype(out_ref.dtype)


def _fold_bn(gamma, beta, mean, var, eps=1e-5):
    scale = gamma / jnp.sqrt(var + eps)
    bias = beta - mean * scale
    return scale, bias


def _prep_params(params):
    """Fold BN scales into the conv weights (bf16 for the MXU); keep f32 biases."""
    w1, w2_hwio, w3, (s1, b1), (s2, b2), (s3, b3) = params
    width = w2_hwio.shape[-1]
    w1f = (w1 * s1[None, :]).astype(jnp.bfloat16)                       # [Cin, width]
    w2f = (w2_hwio * s2[None, None, None, :]).reshape(
        9 * width, width).astype(jnp.bfloat16)                          # [9*width, width]
    w3f = (w3 * s3[None, :]).astype(jnp.bfloat16)                       # [width, cout]
    return (w1f, b1.reshape(1, -1).astype(jnp.float32),
            w2f, b2.reshape(1, -1).astype(jnp.float32),
            w3f, b3.reshape(1, -1).astype(jnp.float32))


def _vmem_budgets():
    """Generation-aware VMEM limits (v5e/v6e: 128 MiB phys, v7x: 64 MiB)."""
    try:
        cap = int(pltpu.get_tpu_info().vmem_capacity_bytes)
    except Exception:
        cap = 64 << 20          # conservative fallback (v7x per-TC)
    vmem_limit = min(int(cap * 0.75), 100 << 20)   # ~96 MiB v5e/v6e, ~48 MiB v7x
    block_budget = int(vmem_limit * 0.6)           # headroom for weights/spills
    return vmem_limit, block_budget


def _pick_batch_block(N, H, W, cin, width, cout, x_bytes, out_bytes, budget_bytes):
    # Honest per-image VMEM estimate:
    #   double-buffered x/out blocks, f32 xf / h1 / h2 / h3 temporaries,
    #   the bf16 h1 copy, the bf16 [M, 9*width] im2col tap, and the bf16 halo.
    per_image = (
        H * W * (2 * x_bytes * cin          # x block, double-buffered
                 + 2 * out_bytes * cout     # out block, double-buffered
                 + 4 * cin                  # xf (f32)
                 + 4 * width + 2 * width    # h1 f32 + bf16 copy
                 + 2 * 9 * width            # bf16 im2col tap
                 + 4 * width                # h2 f32
                 + 8 * cout)                # h3 + pre-store out f32
        + (H + 2) * (W + 2) * width * 2)    # bf16 halo scratch
    nb = max(1, min(N, budget_bytes // max(per_image, 1)))
    # Keep >= 2 grid steps so v7x's two TensorCores both get work from the
    # 'parallel' batch axis.  Weights have a constant block index, so the
    # extra step costs only ~0.35 us on single-TC v5e/v6e.
    if N >= 2:
        nb = min(nb, max(1, N // 2))
    while N % nb:
        nb -= 1
    return nb


def bottleneck_pallas(x_nhwc, params, *, batch_block=None):
    """Fused Bottleneck forward. x_nhwc: [N, H, W, Cin] (f32 or bf16) -> same shape/dtype."""
    N, H, W, Cin = x_nhwc.shape
    w1, b1, w2, b2, w3, b3 = _prep_params(params)
    width = w1.shape[1]
    cout = w3.shape[1]
    assert cout == Cin, "residual add requires inplanes == planes*expansion"

    out_dtype = x_nhwc.dtype
    x_bytes = jnp.dtype(x_nhwc.dtype).itemsize
    out_bytes = jnp.dtype(out_dtype).itemsize
    vmem_limit, block_budget = _vmem_budgets()

    if batch_block is None:
        batch_block = _pick_batch_block(N, H, W, Cin, width, cout,
                                        x_bytes, out_bytes, block_budget)
    NB = batch_block
    assert N % NB == 0
    # TODO(synk): for production spatial sizes (e.g. 56x56x256) add a second,
    # row-tiled 'parallel' grid axis with a 1-row halo so the per-step working
    # set is a few rows, keeping v7x's 64 MiB VMEM fed and both TCs busy.

    flops = 2 * N * H * W * (Cin * width + 9 * width * width + width * cout)
    param_bytes = sum(int(a.size) * jnp.dtype(a.dtype).itemsize
                      for a in (w1, b1, w2, b2, w3, b3))
    bytes_accessed = N * H * W * (Cin * x_bytes + cout * out_bytes) + param_bytes

    full = lambda a: pl.BlockSpec(a.shape, lambda i: (0,) * a.ndim)
    out = pl.pallas_call(
        _bottleneck_kernel,
        out_shape=jax.ShapeDtypeStruct((N, H, W, cout), out_dtype),
        grid=(N // NB,),
        in_specs=[
            pl.BlockSpec((NB, H, W, Cin), lambda i: (i, 0, 0, 0)),
            full(w1), full(b1), full(w2), full(b2), full(w3), full(b3),
        ],
        out_specs=pl.BlockSpec((NB, H, W, cout), lambda i: (i, 0, 0, 0)),
        scratch_shapes=[pltpu.VMEM((NB, H + 2, W + 2, width), jnp.bfloat16)],
        compiler_params=pltpu.CompilerParams(
            dimension_semantics=("parallel",),
            vmem_limit_bytes=vmem_limit),
        cost_estimate=pl.CostEstimate(
            flops=flops, transcendentals=0, bytes_accessed=bytes_accessed),
    )(x_nhwc, w1, b1, w2, b2, w3, b3)
    return out


def bottleneck_pallas_nchw(x_nchw, params, **kw):
    """PyTorch-layout convenience wrapper (prefer the NHWC entry point)."""
    x = jnp.transpose(x_nchw, (0, 2, 3, 1))
    return jnp.transpose(bottleneck_pallas(x, params, **kw), (0, 3, 1, 2))


def make_params(key, inplanes, planes, base_width=64):
    """Deterministic synthetic weights matching Bottleneck.__init__ shapes."""
    width = int(planes * (base_width / 64.0))
    cout = planes * 4                  # expansion = 4
    ks = jax.random.split(key, 15)

    def bn(k0, k1, k2, k3, c):
        gamma = jax.random.uniform(k0, (c,), jnp.float32, 0.5, 1.5)
        beta = 0.1 * jax.random.normal(k1, (c,), jnp.float32)
        mean = 0.1 * jax.random.normal(k2, (c,), jnp.float32)
        var = jax.random.uniform(k3, (c,), jnp.float32, 0.5, 1.5)
        return _fold_bn(gamma, beta, mean, var)

    # conv1: PyTorch weight [width, inplanes, 1, 1] -> kernel layout [inplanes, width]
    w1 = 0.1 * jax.random.normal(ks[0], (inplanes, width), jnp.float32)
    # conv2: PyTorch weight [width, width, 3, 3]    -> HWIO [3, 3, width, width]
    w2_hwio = 0.1 * jax.random.normal(ks[1], (3, 3, width, width), jnp.float32)
    # conv3: PyTorch weight [cout, width, 1, 1]     -> kernel layout [width, cout]
    w3 = 0.1 * jax.random.normal(ks[2], (width, cout), jnp.float32)

    bn1 = bn(ks[3], ks[4], ks[5], ks[6], width)
    bn2 = bn(ks[7], ks[8], ks[9], ks[10], width)
    bn3 = bn(ks[11], ks[12], ks[13], ks[14], cout)
    return (w1, w2_hwio, w3, bn1, bn2, bn3)


def reference_nhwc(x_nhwc, params):
    """Plain-JAX f32 reference of the Bottleneck forward (NHWC)."""
    w1, w2_hwio, w3, (s1, b1), (s2, b2), (s3, b3) = params
    dn = ("NHWC", "HWIO", "NHWC")
    relu = lambda t: jnp.maximum(t, 0.0)

    h = lax.conv_general_dilated(x_nhwc, w1[None, None], (1, 1), "SAME",
                                 dimension_numbers=dn)
    h = relu(h * s1 + b1)
    h = lax.conv_general_dilated(h, w2_hwio, (1, 1), "SAME",
                                 dimension_numbers=dn)
    h = relu(h * s2 + b2)
    h = lax.conv_general_dilated(h, w3[None, None], (1, 1), "SAME",
                                 dimension_numbers=dn)
    h = h * s3 + b3 + x_nhwc
    return relu(h)


if __name__ == "__main__":
    # Bottleneck(inplanes=16, planes=4): width=4, out channels=16, stride=1,
    # downsample=None (so the residual add is valid).
    N, planes, H, W = 2, 4, 16, 16
    inplanes = planes * 4

    key = jax.random.PRNGKey(0)
    kx, kp = jax.random.split(key)
    x_nchw = jax.random.normal(kx, (N, inplanes, H, W), jnp.float32)  # NCHW input
    params = make_params(kp, inplanes, planes)

    # The kernel API is NHWC (lane = channels); do the layout change once at the
    # network boundary to mirror PyTorch's NCHW convention.
    x_nhwc = jnp.transpose(x_nchw, (0, 2, 3, 1))

    out = bottleneck_pallas(x_nhwc, params)
    out = jax.block_until_ready(out)

    # correctness check against a plain-f32 JAX reference.  The kernel feeds the
    # MXU bf16 operands (f32 accumulation), so use a correspondingly looser
    # tolerance than a pure-f32 version would need.
    ref = reference_nhwc(x_nhwc, params)
    assert out.shape == ref.shape == (N, H, W, inplanes)
    max_err = float(jnp.max(jnp.abs(out - ref)))
    assert jnp.allclose(out, ref, atol=3e-2, rtol=3e-2), max_err

    print("KERNEL_OK")
</pallas_src>

<mosaic_0001>
module attributes {stable_mosaic.version = 11 : i64} {
  func.func @_bottleneck_kernel(%arg0: i32, %arg1: memref<1x16x16x16xf32, #tpu.memory_space<vmem>>, %arg2: memref<16x4xbf16, #tpu.memory_space<vmem>>, %arg3: memref<1x4xf32, #tpu.memory_space<vmem>>, %arg4: memref<36x4xbf16, #tpu.memory_space<vmem>>, %arg5: memref<1x4xf32, #tpu.memory_space<vmem>>, %arg6: memref<4x16xbf16, #tpu.memory_space<vmem>>, %arg7: memref<1x16xf32, #tpu.memory_space<vmem>>, %arg8: memref<1x16x16x16xf32, #tpu.memory_space<vmem>>, %arg9: memref<1x18x18x4xbf16, #tpu.memory_space<vmem>>) attributes {dimension_semantics = [#tpu.dimension_semantics<parallel>], iteration_bounds = array<i64: 2>, scalar_prefetch = 0 : i64, scratch_operands = 1 : i64, tpu.core_type = #tpu.core_type<tc>, window_params = [{transform_indices = @transform_0, window_bounds = array<i64: 1, 16, 16, 16>}, {pipeline_mode = #tpu.pipeline_mode<synchronous>, transform_indices = @transform_1, window_bounds = array<i64: 16, 4>}, {pipeline_mode = #tpu.pipeline_mode<synchronous>, transform_indices = @transform_2, window_bounds = array<i64: 1, 4>}, {pipeline_mode = #tpu.pipeline_mode<synchronous>, transform_indices = @transform_3, window_bounds = array<i64: 36, 4>}, {pipeline_mode = #tpu.pipeline_mode<synchronous>, transform_indices = @transform_4, window_bounds = array<i64: 1, 4>}, {pipeline_mode = #tpu.pipeline_mode<synchronous>, transform_indices = @transform_5, window_bounds = array<i64: 4, 16>}, {pipeline_mode = #tpu.pipeline_mode<synchronous>, transform_indices = @transform_6, window_bounds = array<i64: 1, 16>}, {transform_indices = @transform_7, window_bounds = array<i64: 1, 16, 16, 16>}]} {
    %c0 = arith.constant 0 : index
    %c0_0 = arith.constant 0 : index
    %c0_1 = arith.constant 0 : index
    %c0_2 = arith.constant 0 : index
    %0 = vector.load %arg1[%c0, %c0_0, %c0_1, %c0_2] : memref<1x16x16x16xf32, #tpu.memory_space<vmem>>, vector<1x16x16x16xf32>
    %1 = vector.shape_cast %0 : vector<1x16x16x16xf32> to vector<256x16xf32>
    %2 = arith.truncf %1 : vector<256x16xf32> to vector<256x16xbf16>
    %c0_3 = arith.constant 0 : index
    %c0_4 = arith.constant 0 : index
    %3 = vector.load %arg2[%c0_3, %c0_4] : memref<16x4xbf16, #tpu.memory_space<vmem>>, vector<16x4xbf16>
    %cst = arith.constant dense<0.000000e+00> : vector<256x4xf32>
    %4 = tpu.matmul %2, %3, %cst {dimension_numbers = #tpu.dot_dimension_numbers<[1], [0], [0], [1], [0, 0, 1, 1], [], []>} : vector<256x16xbf16>, vector<16x4xbf16>, vector<256x4xf32> -> vector<256x4xf32>
    %c0_5 = arith.constant 0 : index
    %c0_6 = arith.constant 0 : index
    %5 = vector.load %arg3[%c0_5, %c0_6] : memref<1x4xf32, #tpu.memory_space<vmem>>, vector<1x4xf32>
    %6 = vector.broadcast %5 : vector<1x4xf32> to vector<256x4xf32>
    %7 = arith.addf %4, %6 : vector<256x4xf32>
    %cst_7 = arith.constant 0.000000e+00 : f32
    %8 = vector.broadcast %cst_7 : f32 to vector<256x4xf32>
    %9 = arith.maximumf %7, %8 : vector<256x4xf32>
    %cst_8 = arith.constant 0.000000e+00 : bf16
    %10 = vector.broadcast %cst_8 : bf16 to vector<1x1x18x4xbf16>
    %cst_9 = arith.constant 0.000000e+00 : bf16
    %11 = vector.broadcast %cst_9 : bf16 to vector<1x16x1x4xbf16>
    %c0_10 = arith.constant 0 : index
    %c0_11 = arith.constant 0 : index
    %c0_12 = arith.constant 0 : index
    %c0_13 = arith.constant 0 : index
    %12 = vector.load %arg9[%c0_10, %c0_11, %c0_12, %c0_13] : memref<1x18x18x4xbf16, #tpu.memory_space<vmem>>, vector<1x1x18x4xbf16>
    tpu.vector_store %arg9[%c0_10, %c0_11, %c0_12, %c0_13], %10 {strides = array<i32>} : memref<1x18x18x4xbf16, #tpu.memory_space<vmem>>, vector<1x1x18x4xbf16>,
    %c0_14 = arith.constant 0 : index
    %c17 = arith.constant 17 : index
    %c0_15 = arith.constant 0 : index
    %c0_16 = arith.constant 0 : index
    %13 = vector.load %arg9[%c0_14, %c17, %c0_15, %c0_16] : memref<1x18x18x4xbf16, #tpu.memory_space<vmem>>, vector<1x1x18x4xbf16>
    tpu.vector_store %arg9[%c0_14, %c17, %c0_15, %c0_16], %10 {strides = array<i32>} : memref<1x18x18x4xbf16, #tpu.memory_space<vmem>>, vector<1x1x18x4xbf16>,
    %c0_17 = arith.constant 0 : index
    %c1 = arith.constant 1 : index
    %c0_18 = arith.constant 0 : index
    %c0_19 = arith.constant 0 : index
    %14 = vector.load %arg9[%c0_17, %c1, %c0_18, %c0_19] : memref<1x18x18x4xbf16, #tpu.memory_space<vmem>>, vector<1x16x1x4xbf16>
    tpu.vector_store %arg9[%c0_17, %c1, %c0_18, %c0_19], %11 {strides = array<i32>} : memref<1x18x18x4xbf16, #tpu.memory_space<vmem>>, vector<1x16x1x4xbf16>,
    %c0_20 = arith.constant 0 : index
    %c1_21 = arith.constant 1 : index
    %c17_22 = arith.constant 17 : index
    %c0_23 = arith.constant 0 : index
    %15 = vector.load %arg9[%c0_20, %c1_21, %c17_22, %c0_23] : memref<1x18x18x4xbf16, #tpu.memory_space<vmem>>, vector<1x16x1x4xbf16>
    tpu.vector_store %arg9[%c0_20, %c1_21, %c17_22, %c0_23], %11 {strides = array<i32>} : memref<1x18x18x4xbf16, #tpu.memory_space<vmem>>, vector<1x16x1x4xbf16>,
    %16 = arith.truncf %9 : vector<256x4xf32> to vector<256x4xbf16>
    %17 = vector.shape_cast %16 : vector<256x4xbf16> to vector<1x16x16x4xbf16>
    %c0_24 = arith.constant 0 : index
    %c1_25 = arith.constant 1 : index
    %c1_26 = arith.constant 1 : index
    %c0_27 = arith.constant 0 : index
    %18 = vector.load %arg9[%c0_24, %c1_25, %c1_26, %c0_27] : memref<1x18x18x4xbf16, #tpu.memory_space<vmem>>, vector<1x16x16x4xbf16>
    tpu.vector_store %arg9[%c0_24, %c1_25, %c1_26, %c0_27], %17 {strides = array<i32>} : memref<1x18x18x4xbf16, #tpu.memory_space<vmem>>, vector<1x16x16x4xbf16>,
    %c0_28 = arith.constant 0 : index
    %c0_29 = arith.constant 0 : index
    %c0_30 = arith.constant 0 : index
    %c0_31 = arith.constant 0 : index
    %19 = vector.load %arg9[%c0_28, %c0_29, %c0_30, %c0_31] : memref<1x18x18x4xbf16, #tpu.memory_space<vmem>>, vector<1x16x16x4xbf16>
    %c0_32 = arith.constant 0 : index
    %c0_33 = arith.constant 0 : index
    %c1_34 = arith.constant 1 : index
    %c0_35 = arith.constant 0 : index
    %20 = vector.load %arg9[%c0_32, %c0_33, %c1_34, %c0_35] : memref<1x18x18x4xbf16, #tpu.memory_space<vmem>>, vector<1x16x16x4xbf16>
    %c0_36 = arith.constant 0 : index
    %c0_37 = arith.constant 0 : index
    %c2 = arith.constant 2 : index
    %c0_38 = arith.constant 0 : index
    %21 = vector.load %arg9[%c0_36, %c0_37, %c2, %c0_38] : memref<1x18x18x4xbf16, #tpu.memory_space<vmem>>, vector<1x16x16x4xbf16>
    %c0_39 = arith.constant 0 : index
    %c1_40 = arith.constant 1 : index
    %c0_41 = arith.constant 0 : index
    %c0_42 = arith.constant 0 : index
    %22 = vector.load %arg9[%c0_39, %c1_40, %c0_41, %c0_42] : memref<1x18x18x4xbf16, #tpu.memory_space<vmem>>, vector<1x16x16x4xbf16>
    %c0_43 = arith.constant 0 : index
    %c1_44 = arith.constant 1 : index
    %c1_45 = arith.constant 1 : index
    %c0_46 = arith.constant 0 : index
    %23 = vector.load %arg9[%c0_43, %c1_44, %c1_45, %c0_46] : memref<1x18x18x4xbf16, #tpu.memory_space<vmem>>, vector<1x16x16x4xbf16>
    %c0_47 = arith.constant 0 : index
    %c1_48 = arith.constant 1 : index
    %c2_49 = arith.constant 2 : index
    %c0_50 = arith.constant 0 : index
    %24 = vector.load %arg9[%c0_47, %c1_48, %c2_49, %c0_50] : memref<1x18x18x4xbf16, #tpu.memory_space<vmem>>, vector<1x16x16x4xbf16>
    %c0_51 = arith.constant 0 : index
    %c2_52 = arith.constant 2 : index
    %c0_53 = arith.constant 0 : index
    %c0_54 = arith.constant 0 : index
    %25 = vector.load %arg9[%c0_51, %c2_52, %c0_53, %c0_54] : memref<1x18x18x4xbf16, #tpu.memory_space<vmem>>, vector<1x16x16x4xbf16>
    %c0_55 = arith.constant 0 : index
    %c2_56 = arith.constant 2 : index
    %c1_57 = arith.constant 1 : index
    %c0_58 = arith.constant 0 : index
    %26 = vector.load %arg9[%c0_55, %c2_56, %c1_57, %c0_58] : memref<1x18x18x4xbf16, #tpu.memory_space<vmem>>, vector<1x16x16x4xbf16>
    %c0_59 = arith.constant 0 : index
    %c2_60 = arith.constant 2 : index
    %c2_61 = arith.constant 2 : index
    %c0_62 = arith.constant 0 : index
    %27 = vector.load %arg9[%c0_59, %c2_60, %c2_61, %c0_62] : memref<1x18x18x4xbf16, #tpu.memory_space<vmem>>, vector<1x16x16x4xbf16>
    %28 = tpu.concatenate %19, %20, %21, %22, %23, %24, %25, %26, %27 in 3 : vector<1x16x16x4xbf16>, vector<1x16x16x4xbf16>, vector<1x16x16x4xbf16>, vector<1x16x16x4xbf16>, vector<1x16x16x4xbf16>, vector<1x16x16x4xbf16>, vector<1x16x16x4xbf16>, vector<1x16x16x4xbf16>, vector<1x16x16x4xbf16> -> vector<1x16x16x36xbf16>
    %29 = vector.shape_cast %28 : vector<1x16x16x36xbf16> to vector<256x36xbf16>
    %c0_63 = arith.constant 0 : index
    %c0_64 = arith.constant 0 : index
    %30 = vector.load %arg4[%c0_63, %c0_64] : memref<36x4xbf16, #tpu.memory_space<vmem>>, vector<36x4xbf16>
    %cst_65 = arith.constant dense<0.000000e+00> : vector<256x4xf32>
    %31 = tpu.matmul %29, %30, %cst_65 {dimension_numbers = #tpu.dot_dimension_numbers<[1], [0], [0], [1], [0, 0, 1, 1], [], []>} : vector<256x36xbf16>, vector<36x4xbf16>, vector<256x4xf32> -> vector<256x4xf32>
    %c0_66 = arith.constant 0 : index
    %c0_67 = arith.constant 0 : index
    %32 = vector.load %arg5[%c0_66, %c0_67] : memref<1x4xf32, #tpu.memory_space<vmem>>, vector<1x4xf32>
    %33 = vector.broadcast %32 : vector<1x4xf32> to vector<256x4xf32>
    %34 = arith.addf %31, %33 : vector<256x4xf32>
    %cst_68 = arith.constant 0.000000e+00 : f32
    %35 = vector.broadcast %cst_68 : f32 to vector<256x4xf32>
    %36 = arith.maximumf %34, %35 : vector<256x4xf32>
    %37 = arith.truncf %36 : vector<256x4xf32> to vector<256x4xbf16>
    %c0_69 = arith.constant 0 : index
    %c0_70 = arith.constant 0 : index
    %38 = vector.load %arg6[%c0_69, %c0_70] : memref<4x16xbf16, #tpu.memory_space<vmem>>, vector<4x16xbf16>
    %cst_71 = arith.constant dense<0.000000e+00> : vector<256x16xf32>
    %39 = tpu.matmul %37, %38, %cst_71 {dimension_numbers = #tpu.dot_dimension_numbers<[1], [0], [0], [1], [0, 0, 1, 1], [], []>} : vector<256x4xbf16>, vector<4x16xbf16>, vector<256x16xf32> -> vector<256x16xf32>
    %c0_72 = arith.constant 0 : index
    %c0_73 = arith.constant 0 : index
    %40 = vector.load %arg7[%c0_72, %c0_73] : memref<1x16xf32, #tpu.memory_space<vmem>>, vector<1x16xf32>
    %41 = vector.broadcast %40 : vector<1x16xf32> to vector<256x16xf32>
    %42 = arith.addf %39, %41 : vector<256x16xf32>
    %43 = arith.addf %42, %1 : vector<256x16xf32>
    %cst_74 = arith.constant 0.000000e+00 : f32
    %44 = vector.broadcast %cst_74 : f32 to vector<256x16xf32>
    %45 = arith.maximumf %43, %44 : vector<256x16xf32>
    %46 = vector.shape_cast %45 : vector<256x16xf32> to vector<1x16x16x16xf32>
    %c0_75 = arith.constant 0 : index
    %c0_76 = arith.constant 0 : index
    %c0_77 = arith.constant 0 : index
    %c0_78 = arith.constant 0 : index
    %47 = vector.load %arg8[%c0_75, %c0_76, %c0_77, %c0_78] : memref<1x16x16x16xf32, #tpu.memory_space<vmem>>, vector<1x16x16x16xf32>
    tpu.vector_store %arg8[%c0_75, %c0_76, %c0_77, %c0_78], %46 {strides = array<i32>} : memref<1x16x16x16xf32, #tpu.memory_space<vmem>>, vector<1x16x16x16xf32>,
    return
  }
  func.func @transform_0(%arg0: i32) -> (i32, i32, i32, i32) {
    %c0_i32 = arith.constant 0 : i32
    %c0_i32_0 = arith.constant 0 : i32
    %c0_i32_1 = arith.constant 0 : i32
    %c0_i32_2 = arith.constant 0 : i32
    return %arg0, %c0_i32, %c0_i32_0, %c0_i32_1 : i32, i32, i32, i32
  }
  func.func @transform_1(%arg0: i32) -> (i32, i32) {
    %c0_i32 = arith.constant 0 : i32
    %c0_i32_0 = arith.constant 0 : i32
    %c0_i32_1 = arith.constant 0 : i32
    return %c0_i32, %c0_i32_0 : i32, i32
  }
  func.func @transform_2(%arg0: i32) -> (i32, i32) {
    %c0_i32 = arith.constant 0 : i32
    %c0_i32_0 = arith.constant 0 : i32
    %c0_i32_1 = arith.constant 0 : i32
    return %c0_i32, %c0_i32_0 : i32, i32
  }
  func.func @transform_3(%arg0: i32) -> (i32, i32) {
    %c0_i32 = arith.constant 0 : i32
    %c0_i32_0 = arith.constant 0 : i32
    %c0_i32_1 = arith.constant 0 : i32
    return %c0_i32, %c0_i32_0 : i32, i32
  }
  func.func @transform_4(%arg0: i32) -> (i32, i32) {
    %c0_i32 = arith.constant 0 : i32
    %c0_i32_0 = arith.constant 0 : i32
    %c0_i32_1 = arith.constant 0 : i32
    return %c0_i32, %c0_i32_0 : i32, i32
  }
  func.func @transform_5(%arg0: i32) -> (i32, i32) {
    %c0_i32 = arith.constant 0 : i32
    %c0_i32_0 = arith.constant 0 : i32
    %c0_i32_1 = arith.constant 0 : i32
    return %c0_i32, %c0_i32_0 : i32, i32
  }
  func.func @transform_6(%arg0: i32) -> (i32, i32) {
    %c0_i32 = arith.constant 0 : i32
    %c0_i32_0 = arith.constant 0 : i32
    %c0_i32_1 = arith.constant 0 : i32
    return %c0_i32, %c0_i32_0 : i32, i32
  }
  func.func @transform_7(%arg0: i32) -> (i32, i32, i32, i32) {
    %c0_i32 = arith.constant 0 : i32
    %c0_i32_0 = arith.constant 0 : i32
    %c0_i32_1 = arith.constant 0 : i32
    %c0_i32_2 = arith.constant 0 : i32
    return %arg0, %c0_i32, %c0_i32_0, %c0_i32_1 : i32, i32, i32, i32
  }
}

</mosaic_0001>

<bundles_post_ra>
// kernel: tpu_custom_call.1
= control target key start
LH: loop header
LB: loop body
LE: loop exit
PB: predicated region body
PF: predicated region fallthrough
CT: control target
= control target key end

     0   :  { %12 = vsyncpa [#allocation4], 0  ;;  %s6655_s0 = inlined_call_operand.hbm [shape: f32[2,16,16,16], index: 0, kind: input, shape index: {}]   ;;  %s6656_s1 = inlined_call_operand.vmem [shape: bf16[16,4], index: 1, kind: input, shape index: {}]   ;;  %s6657_s2 = inlined_call_operand.vmem [shape: f32[1,4], index: 2, kind: input, shape index: {}]   ;;  %s6658_s3 = inlined_call_operand.vmem [shape: bf16[36,4], index: 3, kind: input, shape index: {}]   ;;  %s6659_s4 = inlined_call_operand.vmem [shape: f32[1,4], index: 4, kind: input, shape index: {}]   ;;  %s6660_s5 = inlined_call_operand.vmem [shape: bf16[4,16], index: 5, kind: input, shape index: {}]   ;;  %s6661_s6 = inlined_call_operand.vmem [shape: f32[1,16], index: 6, kind: input, shape index: {}]   ;;  %s6662_s7 = inlined_call_operand.hbm [shape: f32[2,16,16,16], index: 7, kind: output, shape index: {}]  }
   0x1   :  { %14 = vsyncpa [#allocation4 + $0x1], 0 }
   0x2   :  { %15 = vsyncpa [#allocation5], 0 }
   0x3   :  { %17 = vsyncpa [#allocation5 + $0x1], 0  ;;  %s4717_s24 = smov 0   ;;  %s4719_s25 = smov 0  }
   0x4   :  { %s4721_s26 = smov 0   ;;  %s4723_s27 = smov 0  }
   0x5 LB: > { %s4738_s28 = sadd.s32 4294967295, %s4661_s27   ;;  %s3884_s29 = sadd.s32 4294967294, %s4661_s27   ;;  %s4661_s27 = sphi %s4723_s27, %s6757_s27   ;;  %s4657_s26 = sphi %s4721_s26, %s6756_s26   ;;  %s4653_s25 = sphi %s4719_s25, %s6755_s25   ;;  %s4649_s24 = sphi %s4717_s24, %s6754_s24  }
   0x6   : > { %s4742_s30 = sadd.s32 1, %s4661_s27   ;;  %s30_s8 = sadd.s32 1, %s4657_s26 }
   0x7   : > { %s27_s9 = ssub.s32 %s4661_s27, %s4742_s30  ;;  %p37_p0 = scmp.ne.s32.totalorder %s4657_s26, %s4653_s25 }
   0x8   : > { %p28_p1 = scmp.eq.s32.totalorder %s27_s9, 0  ;;  %p38_p2 = scmp.eq.s32.totalorder %s4661_s27, 0 }
   0x9   : > { %p43_p3 = scmp.ne.s32.totalorder %s4653_s25, %s4649_s24  ;;  %p44_p4 = scmp.eq.s32.totalorder %s4738_s28, 0 }
   0xa   : > { %s4754_s10 = scalar_select %p28_p1, %s4657_s26, %s30_s8  }
   0xb   : > { %p4756_p5 = por %p38_p2, %p37_p0  ;;  %p4760_p6 = por %p44_p4, %p43_p3 }
   0xc   : > { %p193_p7 = scmp.eq.s32.totalorder %s4738_s28, 1  ;;  %p199_p8 = scmp.eq.s32.totalorder %s3884_s29, 1 }
   0xd   : > { %p4338_p10 = scmp.lt.s32.totalorder %s4661_s27, 2  ;;  %s237_s15 = sand.u32 1, %s4657_s26  }
   0xe   : > { %p4767_p11 = por %p193_p7, %p37_p0  ;;  %p4771_p12 = por %p199_p8, %p43_p3 }
   0xf   : > { %s4129_s16 = sshll.u32 %s4661_s27, 12  ;;  %s3887_s17 = sshll.u32 %s237_s15, 8 }
  0x10   : > { %s6677_s13 = scalar_select %p4767_p11, 1, 0 }
  0x11   : > { %s6678_s14 = scalar_select %p4771_p12, 1, 0 }
  0x12   : > { %s4780_s20 = scalar_lea.hbm %s6655_s0, %s4129_s16  ;;  %s241_s21 = scalar_lea.vmem [#allocation3], %s3887_s17 }
  0x13   : > { %s248_s22 = sshll.u32 %s241_s21, 4  ;;  %p4784_p13 = pnand %p4338_p10, %p4756_p5  ;;  %s4788_s22 = int_to_ptr.vmem [resolvable:$true] %s248_s22 }
  0x14   : > { %s4790_s29 = scalar_lea.sflag [#allocation4], %s237_s15  ;;  %s4565_s8 = scalar_lea.hbm %s4780_s20, 4096 }
  0x15   : > { %p4566_p0 = scmp.ne.s32.totalorder %s4780_s20, %s4565_s8  ;;  %p4567_p1 = pneg %p4784_p13 }
  0x16   : > { %s4570_s16 = scalar_lea.hbm %s6655_s0, 8192  ;;  %p4571_p4 = scmp.lt.u32.totalorder %s4780_s20, %s6655_s0 }
  0x17   : > { %p4568_p2 = pnand %p4567_p1, %p4566_p0  ;;  %p4572_p5 = scmp.lt.u32.totalorder %s4570_s16, %s4565_s8 }
  0x18   : > { %p4574_p8 = scmp.lt.u32.totalorder %s4565_s8, %s4780_s20 }
  0x19   : > { %p4569_p3 = pneg %p4568_p2  ;;  %p4573_p7 = por %p4572_p5, %p4571_p4 }
  0x1b   : > { %p4575_p10 = por %p4574_p8, %p4573_p7 }
  0x1d   : > { %p4576_p9 = pnand %p4575_p10, %p4569_p3 }
  0x1f   : > { %4579 = shalt.err (!%p4576_p9)
}
  0x20   : > { %s4580_s15 = scalar_lea.vmem %s4788_s22, 4096  ;;  %s4663_s19 = smov [#allocation3]  }
  0x21   : > { %p4581_p0 = scmp.ne.s32.totalorder %s4788_s22, %s4580_s15  ;;  %s4585_s21 = sshll.u32 %s4663_s19, 4  ;;  %s4586_s21 = int_to_ptr.vmem [resolvable:$false] %s4585_s21 }
  0x22   : > { %s4587_s9 = scalar_lea.vmem %s4586_s21, 8192  ;;  %p4588_p11 = scmp.lt.s32.totalorder %s4788_s22, %s4586_s21 }
  0x23   : > { %p4583_p2 = pnand %p4581_p0, %p4567_p1  ;;  %p4589_p4 = scmp.lt.s32.totalorder %s4587_s9, %s4580_s15 }
  0x25   : > { %p4584_p12 = pneg %p4583_p2  ;;  %p4590_p5 = por %p4589_p4, %p4588_p11 }
  0x27   : > { %p4591_p7 = pnand %p4590_p5, %p4584_p12 }
  0x29   : > { %4594 = shalt.err (!%p4591_p7)
}
  0x2a   : > { %s4664_s8 = smov 128   ;;  %s4665_s11 = smov 8  }
  0x2b   : > { %4333 = dma.hbm_to_vmem [thread:$0]  (!%p4784_p13), %s4780_s20, 4096, %s4788_s22, %s4790_s29, %s4664_s8, %s4664_s8, %s4665_s11  }
  0x2c   : > { %p3890_p9 = scmp.ge.s32.totalorder %s4661_s27, 1  ;;  %p256_p1 = scmp.lt.s32.totalorder %s4661_s27, 3 }
  0x2e   : > { %p257_p3 = pnand %p3890_p9, %p256_p1 }
  0x30   : > { %260 = sbr.rel (%p257_p3) target bundleno = 1131 (0x46b), region = 48 }
  0x37   : > { %s4821_s16 = sand.u32 1, %s4653_s25  }
  0x38   : > { %s3891_s17 = sshll.u32 %s4821_s16, 8  ;;  %s263_s18 = scalar_lea.sflag [#allocation4], %s4821_s16 }
  0x39   : > { %s4827_s15 = scalar_lea.vmem [#allocation3], %s3891_s17 }
  0x3a   : > { %4640 = dma.done.wait (%p4760_p6), %s263_s18, 4096  }
  0x3b   : > { %4642 = vsyncadd (%p4760_p6), %s263_s18, 4294963200  ;;  %v4384_v0 = vld [vmem:[%s6656_s1] sm:$0xff]   ;;  %v298_v1 = vld [vmem:[%s4827_s15] sm:$0xff]  ;;  %vm361_vm0 = vcmask 130048   ;;  %vm606_vm1 = vcmask 24576   ;;  %v6682_v56 = vmov 0 }
  0x3c   : > { %v299_v2 = vld [vmem:[%s4827_s15 + $0x8] sm:$0xff]  ;;  %v314_v3 = vld [vmem:[%s4827_s15 + $0x80] sm:$0xff]  ;;  %4216 = vmatprep.subr.bf16.mxu0 %v4384_v0  ;;  %4322 = vmatprep.subr.bf16.mxu1 %v4384_v0  ;;  %v300_v6 = vld [vmem:[%s4827_s15 + $0x10] sm:$0xff]  ;;  %vm614_vm2 = vsmask.f32 256  ;;  %vm603_vm6 = vcmask 27648  }
  0x3d   : > { %v330_v4 = vpack.c.bf16 %v299_v2, %v298_v1  ;;  %v315_v5 = vld [vmem:[%s4827_s15 + $0x88] sm:$0xff]  ;;  %v301_v7 = vld [vmem:[%s4827_s15 + $0x18] sm:$0xff]  ;;  %4217 = vmatpush3.bf16.msra.mxu0 %v4384_v0  ;;  %4323 = vmatpush3.bf16.msra.mxu1 %v4384_v0  ;;  %v316_v10 = vld [vmem:[%s4827_s15 + $0x90] sm:$0xff]  ;;  %vm664_vm4 = vsmask.f32 7938  ;;  %v4666_v0 = vmov 0  }
  0x3e   : > { %v338_v8 = vpack.c.bf16 %v315_v5, %v314_v3  ;;  %v331_v9 = vpack.c.bf16 %v301_v7, %v300_v6  ;;  %v317_v11 = vld [vmem:[%s4827_s15 + $0x98] sm:$0xff]  ;;  %v302_v12 = vld [vmem:[%s4827_s15 + $0x20] sm:$0xff]  ;;  %v303_v14 = vld [vmem:[%s4827_s15 + $0x28] sm:$0xff]  ;;  %604 = vst.msk [vmem:[#allocation2] sm:$0xf] %vm603_vm6, %v4666_v0  ;;  %vm1840_vm7 = vcmask 1046528  }
  0x3f   : > { %4218 = vmatprep.mubr.msk.bf16.mxu0 %vm361_vm0, %v330_v4  ;;  %v339_v13 = vpack.c.bf16 %v317_v11, %v316_v10  ;;  %v332_v15 = vpack.c.bf16 %v303_v14, %v302_v12  ;;  %v318_v16 = vld [vmem:[%s4827_s15 + $0xa0] sm:$0xff]  ;;  %v319_v17 = vld [vmem:[%s4827_s15 + $0xa8] sm:$0xff]  ;;  %v304_v18 = vld [vmem:[%s4827_s15 + $0x30] sm:$0xff]  ;;  %605 = vst.msk [vmem:[#allocation2 + $0x4] sm:$0xf] %vm603_vm6, %v4666_v0  ;;  %s4667_s12 = smov 8  }
  0x40   : > { %4234 = vmatprep.mubr.msk.bf16.mxu1 %vm361_vm0, %v338_v8  ;;  %4219 = vmatmul.mubr.msk.bf16.vlgmr.msra.gmra.mrb[0].mxu0 %vm361_vm0, %v331_v9  ;;  %v305_v19 = vld [vmem:[%s4827_s15 + $0x38] sm:$0xff]  ;;  %v340_v20 = vpack.c.bf16 %v319_v17, %v318_v16  ;;  %v320_v21 = vld [vmem:[%s4827_s15 + $0xb0] sm:$0xff]  ;;  %v306_v23 = vld [vmem:[%s4827_s15 + $0x40] sm:$0xff]  ;;  %607 = vst.msk [vmem:[#allocation2 + $0x8] sm:$0x1] %vm606_vm1, %v4666_v0  ;;  %s4668_s23 = smov 4  }
  0x41   : > { %4235 = vmatmul.mubr.msk.bf16.vlgmr.msra.gmra.mrb[0].mxu1 %vm361_vm0, %v339_v13  ;;  %4222 = vmatprep.mubr.msk.bf16.mxu0 %vm361_vm0, %v332_v15  ;;  %v321_v22 = vld [vmem:[%s4827_s15 + $0xb8] sm:$0xff]  ;;  %v307_v24 = vld [vmem:[%s4827_s15 + $0x48] sm:$0xff]  ;;  %v322_v25 = vld [vmem:[%s4827_s15 + $0xc0] sm:$0xff]  ;;  %v333_v27 = vpack.c.bf16 %v305_v19, %v304_v18  ;;  %609 = vst.msk [vmem:[#allocation2 + $0xcc] sm:$0xf] %vm603_vm6, %v4666_v0  ;;  %s4669_s21 = smov 24  }
  0x42   : > { %4238 = vmatprep.mubr.msk.bf16.mxu1 %vm361_vm0, %v340_v20  ;;  %v323_v26 = vld [vmem:[%s4827_s15 + $0xc8] sm:$0xff]  ;;  %v341_v28 = vpack.c.bf16 %v321_v22, %v320_v21  ;;  %v334_v29 = vpack.c.bf16 %v307_v24, %v306_v23  ;;  %v308_v31 = vld [vmem:[%s4827_s15 + $0x50] sm:$0xff]  ;;  %v309_v32 = vld [vmem:[%s4827_s15 + $0x58] sm:$0xff]  ;;  %610 = vst.msk [vmem:[#allocation2 + $0xd0] sm:$0xf] %vm603_vm6, %v4666_v0  ;;  %s4670_s9 = smov 12  }
  0x43   : > { %v342_v30 = vpack.c.bf16 %v323_v26, %v322_v25  ;;  %v324_v33 = vld [vmem:[%s4827_s15 + $0xd0] sm:$0xff]  ;;  %v325_v34 = vld [vmem:[%s4827_s15 + $0xd8] sm:$0xff]  ;;  %v310_v35 = vld [vmem:[%s4827_s15 + $0x60] sm:$0xff]  ;;  %v335_v39 = vpack.c.bf16 %v309_v32, %v308_v31  ;;  %611 = vst.msk [vmem:[#allocation2 + $0xd4] sm:$0x1] %vm606_vm1, %v4666_v0  ;;  %s4671_s8 = smov 20  }
  0x44   : > { %v311_v36 = vld [vmem:[%s4827_s15 + $0x68] sm:$0xff]  ;;  %v326_v37 = vld [vmem:[%s4827_s15 + $0xe0] sm:$0xff]  ;;  %v343_v40 = vpack.c.bf16 %v325_v34, %v324_v33  ;;  %v312_v43 = vld [vmem:[%s4827_s15 + $0x70] sm:$0xff]  ;;  %vm1567_vm8 = vsmask.f32 7424  ;;  %s4672_s11 = smov 32  }
  0x45   : > { %v327_v38 = vld [vmem:[%s4827_s15 + $0xe8] sm:$0xff]  ;;  %v336_v41 = vpack.c.bf16 %v311_v36, %v310_v35  ;;  %v313_v44 = vld [vmem:[%s4827_s15 + $0x78] sm:$0xff]  ;;  %v328_v45 = vld [vmem:[%s4827_s15 + $0xf0] sm:$0xff]  ;;  %vm810_vm9 = vsmask.f32 4368  ;;  %s4673_s18 = smov 16  }
  0x46   : > { %v344_v42 = vpack.c.bf16 %v327_v38, %v326_v37  ;;  %v329_v46 = vld [vmem:[%s4827_s15 + $0xf8] sm:$0xff]  ;;  %v337_v47 = vpack.c.bf16 %v313_v44, %v312_v43  ;;  %vm4886_vm3 = vmand %vm606_vm1, %vm614_vm2  ;;  %v619_v50 = vld [vmem:[#allocation2 + $0x18] sm:$0x1]  ;;  %s4674_s20 = smov 28   ;;  %vm2945_vm12 = vcmask 31744   ;;  %vm2978_vm13 = vcmask 64512  }
  0x47   : > { %v345_v48 = vpack.c.bf16 %v329_v46, %v328_v45  ;;  %v620_v51 = vsel %vm4886_vm3, 0, %v619_v50  ;;  %v616_v52 = vld [vmem:[#allocation2 + $0xc] sm:$0x1]  ;;  %v643_v53 = vld [vmem:[#allocation2 + $0x78] sm:$0x1]  ;;  %vm4896_vm5 = vmand %vm606_vm1, %vm664_vm4  ;;  %vm3011_vm14 = vcmask 97280  }
  0x48   : > { %4223 = vmatmul.mubr.msk.bf16.gmra.mrb[4].mxu0 %vm361_vm0, %v333_v27  ;;  %621 = vst [vmem:[#allocation2 + $0x18] sm:$0x1] %v620_v51  ;;  %v617_v54 = vsel %vm4886_vm3, 0, %v616_v52  ;;  %v640_v55 = vld [vmem:[#allocation2 + $0x6c] sm:$0x1]  ;;  %v6683_v56 = vsel %vm4896_vm5, 4294967295, %v6682_v56  ;;  %vm4981_vm10 = vmand %vm603_vm6, %vm664_vm4 }
  0x49   : > { %4239 = vmatmul.mubr.msk.bf16.gmra.mrb[4].mxu1 %vm361_vm0, %v341_v28  ;;  %4226 = vmatprep.mubr.msk.bf16.mxu0 %vm361_vm0, %v334_v29  ;;  %6684 = vst [vmem:[#allocation9_spill] sm:$0xff] %v6683_v56  ;;  %v644_v57 = vsel %vm4886_vm3, 0, %v643_v53  ;;  %618 = vst [vmem:[#allocation2 + $0xc] sm:$0x1] %v617_v54  ;;  %v641_v58 = vsel %vm4886_vm3, 0, %v640_v55  ;;  %vm3076_vm15 = vcmask 162816  }
  0x4a   : > { %4242 = vmatprep.mubr.msk.bf16.mxu1 %vm361_vm0, %v342_v30  ;;  %v669_v59 = vld [vmem:[#allocation2 + $0x20] sm:$0x1]  ;;  %645 = vst [vmem:[#allocation2 + $0x78] sm:$0x1] %v644_v57  ;;  %642 = vst [vmem:[#allocation2 + $0x6c] sm:$0x1] %v641_v58 }
  0x4b   : > { %v670_v60 = vsel %vm4896_vm5, 0, %v669_v59  ;;  %v693_v61 = vld [vmem:[#allocation2 + $0x80] sm:$0x1]  ;;  %v666_v63 = vld [vmem:[#allocation2 + $0x14] sm:$0x1]  ;;  %vm5014_vm11 = vmor %vm614_vm2, %vm810_vm9  ;;  %vm3109_vm1 = vcmask 195584  }
  0x4c   : > { %671 = vst [vmem:[#allocation2 + $0x20] sm:$0x1] %v670_v60  ;;  %v694_v62 = vsel %vm4896_vm5, 0, %v693_v61  ;;  %v667_v1 = vsel %vm4896_vm5, 0, %v666_v63  ;;  %v690_v2 = vld [vmem:[#allocation2 + $0x74] sm:$0x1] }
  0x4d   : > { %695 = vst [vmem:[#allocation2 + $0x80] sm:$0x1] %v694_v62  ;;  %668 = vst [vmem:[#allocation2 + $0x14] sm:$0x1] %v667_v1  ;;  %v691_v3 = vsel %vm4896_vm5, 0, %v690_v2  ;;  %vm3142_vm2 = vcmask 228352  }
  0x4e   : > { %692 = vst [vmem:[#allocation2 + $0x74] sm:$0x1] %v691_v3  ;;  %v1247_v4 = vld [vmem:[#allocation2 + $0x4] sm:$0xf]  ;;  %v1246_v5 = vld [vmem:[#allocation2] sm:$0xf] }
  0x4f   : > { %v4918_v6 = vcombine.low %v1246_v5, %v1247_v4  ;;  %v4385_v7 = vld [vmem:[#allocation2 + $0x8] ss:$0 sps:$4 sm:$0x11]   ;;  %v1294_v8 = vld [vmem:[#allocation2] sm:$0xe]  ;;  %vm3235_vm4 = vcmask 293888  }
  0x50   : > { %4227 = vmatmul.mubr.msk.bf16.gmra.mrb[8].mxu0 %vm361_vm0, %v335_v39  ;;  %v3975_v10 = vcombine.low %v1294_v8, %v1247_v4  ;;  %v1842_v11 = vrot.slane %v4385_v7, 1  ;;  %v1576_v14 = vshll.u32 %v4385_v7, 16  ;;  %v625_v20 = vld [vmem:[#allocation2 + $0x30] sm:$0x1]  ;;  %v622_v21 = vld [vmem:[#allocation2 + $0x24] sm:$0x1] }
  0x51   : > { %4243 = vmatmul.mubr.msk.bf16.gmra.mrb[8].mxu1 %vm361_vm0, %v343_v40  ;;  %4230 = vmatprep.mubr.msk.bf16.mxu0 %vm361_vm0, %v336_v41  ;;  %6685 = vst [vmem:[#allocation10_spill] sm:$0xff] %v4918_v6  ;;  %v1571_v9 = vshll.u32 %v4918_v6, 16  ;;  %v1569_v12 = vshrl.u32 %v4918_v6, 16  ;;  %v675_v22 = vld [vmem:[#allocation2 + $0x38] sm:$0x1]  ;;  %v626_v23 = vsel %vm4886_vm3, 0, %v625_v20 }
  0x52   : > { %4246 = vmatprep.mubr.msk.bf16.mxu1 %vm361_vm0, %v344_v42  ;;  %v1841_v15 = vrot.slane %v3975_v10, 1  ;;  %v1578_v17 = vrot.slane %v1576_v14, 1  ;;  %v623_v24 = vsel %vm4886_vm3, 0, %v622_v21  ;;  %v676_v25 = vsel %vm4896_vm5, 0, %v675_v22  ;;  %v672_v26 = vld [vmem:[#allocation2 + $0x2c] sm:$0x1] }
  0x53   : > { %v1573_v13 = vrot.slane %v1571_v9, 1  ;;  %627 = vst [vmem:[#allocation2 + $0x30] sm:$0x1] %v626_v23  ;;  %624 = vst [vmem:[#allocation2 + $0x24] sm:$0x1] %v623_v24  ;;  %v673_v27 = vsel %vm4896_vm5, 0, %v672_v26 }
  0x54   : > { %v1843_v18 = vsel %vm1840_vm7, %v1841_v15, %v1842_v11  ;;  %677 = vst [vmem:[#allocation2 + $0x38] sm:$0x1] %v676_v25  ;;  %674 = vst [vmem:[#allocation2 + $0x2c] sm:$0x1] %v673_v27  ;;  %v649_v28 = vld [vmem:[#allocation2 + $0x90] sm:$0x1] }
  0x55   : > { %v1574_v16 = vor.u32 %v1573_v13, %v1569_v12  ;;  %1889 = vrot.lane.b32.xlu1 %v1843_v18, %s4667_s12  ;;  %v650_v29 = vsel %vm4886_vm3, 0, %v649_v28  ;;  %v646_v30 = vld [vmem:[#allocation2 + $0x84] sm:$0x1]  ;;  %v699_v32 = vld [vmem:[#allocation2 + $0x98] sm:$0x1]  ;;  %p6751_p11 = scmp.ne.s32.totalorder %s6677_s13, 0 }
  0x56   : > { %651 = vst [vmem:[#allocation2 + $0x90] sm:$0x1] %v650_v29  ;;  %v647_v31 = vsel %vm4886_vm3, 0, %v646_v30  ;;  %v700_v33 = vsel %vm4896_vm5, 0, %v699_v32  ;;  %v696_v34 = vld [vmem:[#allocation2 + $0x8c] sm:$0x1] }
  0x57   : > { %v1579_v19 = vsel %vm1567_vm8, %v1574_v16, %v1578_v17  ;;  %648 = vst [vmem:[#allocation2 + $0x84] sm:$0x1] %v647_v31  ;;  %701 = vst [vmem:[#allocation2 + $0x98] sm:$0x1] %v700_v33  ;;  %v697_v35 = vsel %vm4896_vm5, 0, %v696_v34 }
  0x58   : > { %4231 = vmatmul.mubr.msk.bf16.gmra.mrb[12].mxu0 %vm361_vm0, %v337_v47  ;;  %1760 = vrot.lane.b32.xlu0 %v1579_v19, %s4668_s23  ;;  %698 = vst [vmem:[#allocation2 + $0x8c] sm:$0x1] %v697_v35  ;;  %v631_v36 = vld [vmem:[#allocation2 + $0x48] sm:$0x1]  ;;  %v628_v38 = vld [vmem:[#allocation2 + $0x3c] sm:$0x1] }
  0x59   : > { %4247 = vmatmul.mubr.msk.bf16.gmra.mrb[12].mxu1 %vm361_vm0, %v345_v48  ;;  %v632_v37 = vsel %vm4886_vm3, 0, %v631_v36  ;;  %v681_v39 = vld [vmem:[#allocation2 + $0x50] sm:$0x1]  ;;  %v678_v40 = vld [vmem:[#allocation2 + $0x44] sm:$0x1]  ;;  %v629_v41 = vsel %vm4886_vm3, 0, %v628_v38 }
  0x5a   : > { %633 = vst [vmem:[#allocation2 + $0x48] sm:$0x1] %v632_v37  ;;  %v682_v42 = vsel %vm4896_vm5, 0, %v681_v39  ;;  %v679_v43 = vsel %vm4896_vm5, 0, %v678_v40  ;;  %630 = vst [vmem:[#allocation2 + $0x3c] sm:$0x1] %v629_v41 }
  0x5b   : > { %683 = vst [vmem:[#allocation2 + $0x50] sm:$0x1] %v682_v42  ;;  %680 = vst [vmem:[#allocation2 + $0x44] sm:$0x1] %v679_v43  ;;  %v655_v44 = vld [vmem:[#allocation2 + $0xa8] sm:$0x1] }
  0x5c   : > { %v656_v45 = vsel %vm4886_vm3, 0, %v655_v44  ;;  %v652_v46 = vld [vmem:[#allocation2 + $0x9c] sm:$0x1]  ;;  %v705_v47 = vld [vmem:[#allocation2 + $0xb0] sm:$0x1] }
  0x5d   : > { %657 = vst [vmem:[#allocation2 + $0xa8] sm:$0x1] %v656_v45  ;;  %v702_v48 = vld [vmem:[#allocation2 + $0xa4] sm:$0x1]  ;;  %v653_v50 = vsel %vm4886_vm3, 0, %v652_v46  ;;  %v706_v51 = vsel %vm4896_vm5, 0, %v705_v47 }
  0x5e   : > { %v703_v52 = vsel %vm4896_vm5, 0, %v702_v48  ;;  %654 = vst [vmem:[#allocation2 + $0x9c] sm:$0x1] %v653_v50  ;;  %707 = vst [vmem:[#allocation2 + $0xb0] sm:$0x1] %v706_v51 }
  0x5f   : > { %704 = vst [vmem:[#allocation2 + $0xa4] sm:$0x1] %v703_v52  ;;  %v4961_v53 = vld [vmem:[%s6657_s2] ss:$0 sm:$0xff]  ;;  %v1141_v24 = vld [vmem:[#allocation2 + $0x18] sm:$0xf] }
  0x60   : > { %v1134_v33 = vld [vmem:[#allocation2 + $0xc] sm:$0xf]  ;;  %v1197_v38 = vld [vmem:[#allocation2 + $0x78] sm:$0xf] }
  0x61   : > { %v1190_v48 = vld [vmem:[#allocation2 + $0x6c] sm:$0xf] }
 0x113   : > { %v4220_v54 = vpop.f32.mrb[0].mxu0 }
 0x114   : > { %v4236_v55 = vpop.f32.mrb[0].mxu1  ;;  %v453_v57 = vadd.f32 %v4220_v54, %v4961_v53  ;;  %v444_v59 = vpop.f32.mrb[1].mxu0 }
 0x115   : > { %v517_v58 = vadd.f32 %v4236_v55, %v4961_v53  ;;  %v508_v60 = vpop.f32.mrb[1].mxu1  ;;  %v445_v61 = vadd.f32 %v4961_v53, %v444_v59  ;;  %v4221_v63 = vpop.f32.mrb[2].mxu0 }
 0x116   : > { %v509_v62 = vadd.f32 %v4961_v53, %v508_v60  ;;  %v4237_v0 = vpop.f32.mrb[2].mxu1  ;;  %v573_v1 = vmax.f32 %v453_v57, 0.0  ;;  %v456_v3 = vadd.f32 %v4221_v63, %v4961_v53  ;;  %v447_v5 = vpop.f32.mrb[3].mxu0 }
 0x117   : > { %v589_v2 = vmax.f32 %v517_v58, 0.0  ;;  %v520_v4 = vadd.f32 %v4237_v0, %v4961_v53  ;;  %v511_v7 = vpop.f32.mrb[3].mxu1  ;;  %v571_v8 = vmax.f32 %v445_v61, 0.0  ;;  %v448_v10 = vadd.f32 %v4961_v53, %v447_v5  ;;  %v1201_v5 = vld [vmem:[#allocation2 + $0x80] sm:$0x1] }
 0x118   : > { %v587_v9 = vmax.f32 %v509_v62, 0.0  ;;  %v512_v11 = vadd.f32 %v4961_v53, %v511_v7  ;;  %v4132_v12 = vpack.c.bf16 %v573_v1, %v573_v1  ;;  %v574_v14 = vmax.f32 %v456_v3, 0.0  ;;  %v1145_v1 = vld [vmem:[#allocation2 + $0x20] sm:$0x1] }
 0x119   : > { %v4148_v13 = vpack.c.bf16 %v589_v2, %v589_v2  ;;  %v4130_v15 = vpack.c.bf16 %v571_v8, %v571_v8  ;;  %v590_v17 = vmax.f32 %v520_v4, 0.0  ;;  %v572_v18 = vmax.f32 %v448_v10, 0.0 }
 0x11a   : > { %v4146_v16 = vpack.c.bf16 %v587_v9, %v587_v9  ;;  %v830_v19 = vshrl.u32 %v4132_v12, 16  ;;  %v588_v22 = vmax.f32 %v512_v11, 0.0  ;;  %v833_v23 = vshll.u32 %v4132_v12, 16  ;;  %v1138_v12 = vld [vmem:[#allocation2 + $0x14] sm:$0x1] }
 0x11b   : > { %v966_v20 = vshrl.u32 %v4148_v13, 16  ;;  %v969_v21 = vshll.u32 %v4148_v13, 16  ;;  %v813_v25 = vshrl.u32 %v4130_v15, 16  ;;  %v4224_v28 = vpop.f32.mrb[4].mxu0  ;;  %v816_v32 = vshll.u32 %v4130_v15, 16 }
 0x11c   : > { %v949_v26 = vshrl.u32 %v4146_v16, 16  ;;  %v952_v27 = vshll.u32 %v4146_v16, 16  ;;  %v4971_v29 = vpop.f32.mrb[4].mxu1  ;;  %v4973_v30 = vrot.slane %v830_v19, 7  ;;  %v4133_v34 = vpack.c.bf16 %v574_v14, %v574_v14  ;;  %v460_v35 = vpop.f32.mrb[5].mxu0 }
 0x11d   : > { %v4975_v31 = vrot.slane %v966_v20, 7  ;;  %v4977_v36 = vpop.f32.mrb[5].mxu1  ;;  %v4985_v39 = vrot.slane %v813_v25, 7  ;;  %v4149_v41 = vpack.c.bf16 %v590_v17, %v590_v17  ;;  %v4131_v42 = vpack.c.bf16 %v572_v18, %v572_v18  ;;  %v4989_v43 = vpop.f32.mrb[6].mxu0 }
 0x11e   : > { %v4987_v40 = vrot.slane %v949_v26, 7  ;;  %v4991_v44 = vpop.f32.mrb[6].mxu1  ;;  %v835_v45 = vor.u32 %v833_v23, %v4973_v30  ;;  %v836_v46 = vrot.slane %v4973_v30, 4  ;;  %v4147_v50 = vpack.c.bf16 %v588_v22, %v588_v22  ;;  %v4996_v51 = vpop.f32.mrb[7].mxu0 }
 0x11f   : > { %v971_v47 = vor.u32 %v969_v21, %v4975_v31  ;;  %v4998_v52 = vpop.f32.mrb[7].mxu1  ;;  %v972_v54 = vrot.slane %v4975_v31, 4  ;;  %v818_v55 = vor.u32 %v816_v32, %v4985_v39  ;;  %v819_v57 = vrot.slane %v4985_v39, 4 }
 0x120   : > { %v954_v58 = vor.u32 %v952_v27, %v4987_v40  ;;  %v1142_v59 = vsel %vm4981_vm10, %v835_v45, %v1141_v24  ;;  %v838_v61 = vshrl.u32 %v4133_v34, 16  ;;  %v841_v62 = vshll.u32 %v4133_v34, 16 }
 0x121   : > { %v1198_v60 = vsel %vm4981_vm10, %v971_v47, %v1197_v38  ;;  %1143 = vst [vmem:[#allocation2 + $0x18] sm:$0xf] %v1142_v59  ;;  %v1135_v63 = vsel %vm4981_vm10, %v818_v55, %v1134_v33  ;;  %v974_v2 = vshrl.u32 %v4149_v41, 16  ;;  %v977_v3 = vshll.u32 %v4149_v41, 16 }
 0x122   : > { %1199 = vst [vmem:[#allocation2 + $0x78] sm:$0xf] %v1198_v60  ;;  %v1191_v0 = vsel %vm4981_vm10, %v954_v58, %v1190_v48  ;;  %1136 = vst [vmem:[#allocation2 + $0xc] sm:$0xf] %v1135_v63  ;;  %v840_v4 = vrot.slane %v838_v61, 7  ;;  %v821_v7 = vshrl.u32 %v4131_v42, 16  ;;  %v469_v14 = vadd.f32 %v4224_v28, %v4961_v53 }
 0x123   : > { %1192 = vst [vmem:[#allocation2 + $0x6c] sm:$0xf] %v1191_v0  ;;  %v824_v8 = vshll.u32 %v4131_v42, 16  ;;  %v957_v9 = vshrl.u32 %v4147_v50, 16  ;;  %v976_v11 = vrot.slane %v974_v2, 7  ;;  %v960_v13 = vshll.u32 %v4147_v50, 16 }
 0x124   : > { %v461_v15 = vadd.f32 %v4961_v53, %v460_v35  ;;  %v5020_v16 = vpop.f32.mrb[8].mxu0  ;;  %v5022_v17 = vpop.f32.mrb[8].mxu1  ;;  %v843_v18 = vor.u32 %v841_v62, %v840_v4  ;;  %v845_v19 = vrot.slane %v840_v4, 4  ;;  %v823_v20 = vrot.slane %v821_v7, 7  ;;  %v1194_v35 = vld [vmem:[#allocation2 + $0x74] sm:$0x1] }
 0x125   : > { %v959_v21 = vrot.slane %v957_v9, 7  ;;  %v5024_v22 = vpop.f32.mrb[9].mxu0  ;;  %v5026_v23 = vpop.f32.mrb[9].mxu1  ;;  %v955_v24 = vrot.slane %v4987_v40, 4  ;;  %v979_v25 = vor.u32 %v977_v3, %v976_v11  ;;  %v981_v26 = vrot.slane %v976_v11, 4 }
 0x126   : > { %v577_v27 = vmax.f32 %v469_v14, 0.0  ;;  %v5029_v28 = vpop.f32.mrb[10].mxu0  ;;  %v5031_v30 = vpop.f32.mrb[10].mxu1  ;;  %v844_v31 = vsel %vm5014_vm11, %v836_v46, %v843_v18  ;;  %v1146_v32 = vsel %vm4886_vm3, %v845_v19, %v1145_v1  ;;  %v826_v33 = vor.u32 %v824_v8, %v823_v20 }
 0x127   : > { %v828_v34 = vrot.slane %v823_v20, 4  ;;  %v5037_v38 = vpop.f32.mrb[11].mxu0  ;;  %v5039_v39 = vpop.f32.mrb[11].mxu1  ;;  %1144 = vst.msk [vmem:[#allocation2 + $0x1c] sm:$0xf] %vm603_vm6, %v844_v31  ;;  %v980_v40 = vsel %vm5014_vm11, %v972_v54, %v979_v25  ;;  %v1202_v41 = vsel %vm4886_vm3, %v981_v26, %v1201_v5  ;;  %v962_v42 = vor.u32 %v960_v13, %v959_v21 }
 0x128   : > { %6690 = vst [vmem:[#allocation11_spill] sm:$0xff] %v5039_v39  ;;  %1147 = vst [vmem:[#allocation2 + $0x20] sm:$0x1] %v1146_v32  ;;  %v964_v45 = vrot.slane %v959_v21, 4  ;;  %v827_v46 = vsel %vm5014_vm11, %v819_v57, %v826_v33  ;;  %v575_v48 = vmax.f32 %v461_v15, 0.0  ;;  %v4136_v55 = vpack.c.bf16 %v577_v27, %v577_v27 }
 0x129   : > { %1200 = vst.msk [vmem:[#allocation2 + $0x7c] sm:$0xf] %vm603_vm6, %v980_v40  ;;  %1203 = vst [vmem:[#allocation2 + $0x80] sm:$0x1] %v1202_v41  ;;  %v1139_v47 = vsel %vm4886_vm3, %v828_v34, %v1138_v12  ;;  %v963_v50 = vsel %vm5014_vm11, %v955_v24, %v962_v42  ;;  %v1375_v58 = vld [vmem:[#allocation2 + $0x18] sm:$0xf]  ;;  %v472_v63 = vadd.f32 %v4989_v43, %v4961_v53 }
 0x12a   : > { %1137 = vst.msk [vmem:[#allocation2 + $0x10] sm:$0xf] %vm603_vm6, %v827_v46  ;;  %1140 = vst [vmem:[#allocation2 + $0x14] sm:$0x1] %v1139_v47  ;;  %v1195_v54 = vsel %vm4886_vm3, %v964_v45, %v1194_v35  ;;  %v1312_v59 = vld [vmem:[#allocation2 + $0x18] sm:$0xf]  ;;  %v4134_v57 = vpack.c.bf16 %v575_v48, %v575_v48  ;;  %v464_v4 = vadd.f32 %v4961_v53, %v4996_v51 }
 0x12b   : > { %1193 = vst.msk [vmem:[#allocation2 + $0x70] sm:$0xf] %vm603_vm6, %v963_v50  ;;  %1196 = vst [vmem:[#allocation2 + $0x74] sm:$0x1] %v1195_v54  ;;  %v1391_v60 = vld [vmem:[#allocation2 + $0x78] sm:$0xf]  ;;  %v5076_v43 = vadd.f32 %v4971_v29, %v4961_v53  ;;  %v5082_v51 = vadd.f32 %v4961_v53, %v4977_v36  ;;  %v5086_v18 = vadd.f32 %v4991_v44, %v4961_v53 }
 0x12c   : > { %v1328_v61 = vld [vmem:[#allocation2 + $0x78] sm:$0xf]  ;;  %v864_v62 = vshrl.u32 %v4136_v55, 16  ;;  %v1389_v14 = vld [vmem:[#allocation2 + $0x6c] sm:$0xf]  ;;  %v847_v15 = vshrl.u32 %v4134_v57, 16  ;;  %v5105_v33 = vadd.f32 %v4961_v53, %v4998_v52 }
 0x12d   : > { %v1359_v2 = vld [vmem:[#allocation2 + $0x18] sm:$0xe]  ;;  %v1310_v29 = vld [vmem:[#allocation2 + $0xc] sm:$0xf]  ;;  %v867_v21 = vshll.u32 %v4136_v55, 16  ;;  %v850_v24 = vshll.u32 %v4134_v57, 16 }
 0x12e   : > { %v5059_v0 = vld [vmem:[#allocation2 + $0x1c] sm:$0xf]  ;;  %v5061_v3 = vld [vmem:[#allocation2 + $0x78] sm:$0xe]  ;;  %v578_v36 = vmax.f32 %v472_v63, 0.0  ;;  %v576_v32 = vmax.f32 %v464_v4, 0.0 }
 0x12f   : > { %v1313_v1 = vld [vmem:[#allocation2 + $0x1c] sm:$0xf]  ;;  %v5065_v5 = vld [vmem:[#allocation2 + $0x18] sm:$0xe]  ;;  %v5068_v7 = vcombine.low %v1375_v58, %v5059_v0  ;;  %v1155_v31 = vld [vmem:[#allocation2 + $0x30] sm:$0xf] }
 0x130   : > { %v5070_v8 = vcombine.low %v1312_v59, %v1313_v1  ;;  %v5072_v9 = vld [vmem:[#allocation2 + $0x7c] sm:$0xf]  ;;  %v1367_v12 = vld [vmem:[#allocation2 + $0x78] sm:$0xe]  ;;  %v4024_v19 = vcombine.low %v1359_v2, %v1313_v1  ;;  %v4071_v25 = vcombine.low %v5065_v5, %v5059_v0  ;;  %v5110_v41 = vld [vmem:[#allocation2 + $0xc] sm:$0xe]  ;;  %v4135_v1 = vpack.c.bf16 %v576_v32, %v576_v32 }
 0x131   : > { %v1329_v11 = vld [vmem:[#allocation2 + $0x7c] sm:$0xf]  ;;  %2513 = vrot.lane.b32.xlu0 %v5068_v7, %s4669_s21  ;;  %v5092_v20 = vld [vmem:[#allocation2 + $0x10] sm:$0xf]  ;;  %v5097_v44 = vcombine.low %v1391_v60, %v5072_v9  ;;  %v5112_v42 = vrot.slane %v864_v62, 7  ;;  %v5120_v48 = vrot.slane %v847_v15, 7  ;;  %v4137_v60 = vpack.c.bf16 %v578_v36, %v578_v36 }
 0x132   : > { %v5078_v13 = vcombine.low %v1328_v61, %v1329_v11  ;;  %2003 = vrot.lane.b32.xlu1 %v5070_v8, %s4670_s9  ;;  %v5099_v26 = vld [vmem:[#allocation2 + $0x70] sm:$0xf]  ;;  %v5101_v27 = vld [vmem:[#allocation2 + $0x20] ss:$0 sps:$4 sm:$0x11]   ;;  %v4032_v40 = vcombine.low %v1367_v12, %v1329_v11  ;;  %v5116_v47 = vcombine.low %v1310_v29, %v5092_v20  ;;  %v2356_v55 = vrot.slane %v4024_v19, 1 }
 0x133   : > { %v1148_v45 = vld [vmem:[#allocation2 + $0x24] sm:$0xf]  ;;  %v5122_v50 = vld [vmem:[#allocation2 + $0x80] ss:$0 sps:$4 sm:$0x11]   ;;  %v5129_v54 = vcombine.low %v1389_v14, %v5099_v26  ;;  %v869_v58 = vor.u32 %v867_v21, %v5112_v42  ;;  %v2357_v62 = vrot.slane %v5101_v27, 1  ;;  %v852_v0 = vor.u32 %v850_v24, %v5120_v48 }
 0x134   : > { %v1326_v59 = vld [vmem:[#allocation2 + $0x6c] sm:$0xf]  ;;  %v5132_v57 = vld [vmem:[#allocation2 + $0x70] sm:$0xf]  ;;  %v870_v63 = vrot.slane %v5112_v42, 4  ;;  %v853_v11 = vrot.slane %v5120_v48, 4 }
 0x135   : > { %2529 = vrot.lane.b32.xlu0 %v5097_v44, %s4669_s21  ;;  %v5134_v61 = vld [vmem:[#allocation2 + $0x20] ss:$0 sps:$4 sm:$0x11]   ;;  %v1251_v2 = vld [vmem:[#allocation2 + $0x1c] sm:$0xf]  ;;  %v1156_v5 = vsel %vm4981_vm10, %v869_v58, %v1155_v31  ;;  %v872_v12 = vshrl.u32 %v4137_v60, 16  ;;  %v1149_v19 = vsel %vm4981_vm10, %v852_v0, %v1148_v45  ;;  %v2358_v0 = vsel %vm1840_vm7, %v2356_v55, %v2357_v62 }
 0x136   : > { %2019 = vrot.lane.b32.xlu1 %v5078_v13, %s4670_s9  ;;  %v5139_v4 = vld [vmem:[#allocation2 + $0x10] sm:$0xf]  ;;  %v875_v14 = vshll.u32 %v4137_v60, 16  ;;  %v5144_v15 = vld [vmem:[#allocation2 + $0x20] ss:$0 sps:$4 sm:$0x11]  }
 0x137   : > { %1157 = vst [vmem:[#allocation2 + $0x30] sm:$0xf] %v1156_v5  ;;  %v1159_v29 = vld [vmem:[#allocation2 + $0x38] sm:$0x1]  ;;  %v855_v21 = vshrl.u32 %v4135_v1, 16  ;;  %v858_v24 = vshll.u32 %v4135_v1, 16 }
 0x138   : > { %v2380_v36 = vrot.slane %v4032_v40, 1  ;;  %v5148_v32 = vpop.f32.mrb[12].mxu0  ;;  %1150 = vst [vmem:[#allocation2 + $0x24] sm:$0xf] %v1149_v19  ;;  %v874_v31 = vrot.slane %v872_v12, 7  ;;  %v2381_v48 = vrot.slane %v5122_v50, 1  ;;  %v5158_v40 = vcombine.low %v1326_v59, %v5132_v57 }
 0x139   : > { %6691 = vst [vmem:[#allocation12_spill] sm:$0xff] %v5148_v32  ;;  %2001 = vrot.lane.b32.xlu0 %v5116_v47, %s4670_s9  ;;  %v1152_v42 = vld [vmem:[#allocation2 + $0x2c] sm:$0x1]  ;;  %v2865_v58 = vrot.slane %v4071_v25, 1  ;;  %v2866_v45 = vrot.slane %v5134_v61, 1  ;;  %v857_v1 = vrot.slane %v855_v21, 7 }
 0x13a   : > { %2527 = vrot.lane.b32.xlu1 %v5129_v54, %s4669_s21  ;;  %v1296_v60 = vld [vmem:[#allocation2 + $0x18] sm:$0xe]  ;;  %v1295_v46 = vld [vmem:[#allocation2 + $0xc] sm:$0xe]  ;;  %v877_v34 = vor.u32 %v875_v14, %v874_v31  ;;  %v879_v19 = vrot.slane %v874_v31, 4  ;;  %v1848_v35 = vrot.slane %v5144_v15, 1 }
 0x13b   : > { %v3977_v5 = vcombine.low %v1296_v60, %v1251_v2  ;;  %v5160_v52 = vld [vmem:[#allocation2 + $0x14] ss:$0 sps:$4 sm:$0x11]   ;;  %v1250_v12 = vld [vmem:[#allocation2 + $0x18] sm:$0xf]  ;;  %v3976_v25 = vcombine.low %v1295_v46, %v5139_v4  ;;  %v860_v6 = vor.u32 %v858_v24, %v857_v1  ;;  %v862_v56 = vrot.slane %v857_v1, 4 }
 0x13c   : > { %v5164_v32 = vcombine.low %v1250_v12, %v1251_v2  ;;  %v5166_v62 = vld [vmem:[#allocation2 + $0x80] ss:$0 sps:$4 sm:$0x11]   ;;  %v878_v59 = vsel %vm5014_vm11, %v870_v63, %v877_v34  ;;  %v1160_v14 = vsel %vm4886_vm3, %v879_v19, %v1159_v29  ;;  %v1845_v21 = vrot.slane %v5160_v52, 1  ;;  %v5176_v2 = vld [vmem:[#allocation2 + $0x70] sm:$0xf] }
 0x13d   : > { %v1847_v55 = vrot.slane %v3977_v5, 1  ;;  %2017 = vrot.lane.b32.xlu0 %v5158_v40, %s4670_s9  ;;  %v1844_v46 = vrot.slane %v3976_v25, 1  ;;  %v5178_v24 = vpop.f32.mrb[13].mxu0  ;;  %1158 = vst.msk [vmem:[#allocation2 + $0x34] sm:$0xf] %vm603_vm6, %v878_v59  ;;  %v861_v31 = vsel %vm5014_vm11, %v853_v11, %v860_v6  ;;  %v1153_v60 = vsel %vm4886_vm3, %v862_v56, %v1152_v42 }
 0x13e   : > { %6692 = vst [vmem:[#allocation13_spill] sm:$0xff] %v5164_v32  ;;  %2403 = vrot.lane.b32.xlu1 %v2358_v0, %s4671_s8  ;;  %6693 = vst [vmem:[#allocation14_spill] sm:$0xff] %v5178_v24  ;;  %v2382_v34 = vsel %vm1840_vm7, %v2380_v36, %v2381_v48  ;;  %v593_v63 = vmax.f32 %v5076_v43, 0.0  ;;  %v1303_v29 = vld [vmem:[#allocation2 + $0x6c] sm:$0xe]  ;;  %v5187_v0 = vpop.f32.mrb[14].mxu0  ;;  %v2867_v1 = vsel %vm1840_vm7, %v2865_v58, %v2866_v45 }
 0x13f   : > { %1161 = vst [vmem:[#allocation2 + $0x38] sm:$0x1] %v1160_v14  ;;  %6694 = vst [vmem:[#allocation15_spill] sm:$0xff] %v5187_v0  ;;  %v1849_v5 = vsel %vm1840_vm7, %v1847_v55, %v1848_v35  ;;  %v6695_v6 = vcombine.low %v5061_v3, %v5072_v9  ;;  %v2890_v56 = vrot.slane %v5166_v62, 1  ;;  %v5198_v36 = vpop.f32.mrb[15].mxu0  ;;  %v3984_v48 = vcombine.low %v1303_v29, %v5176_v2 }
 0x140   : > { %1151 = vst.msk [vmem:[#allocation2 + $0x28] sm:$0xf] %vm603_vm6, %v861_v31  ;;  %1154 = vst [vmem:[#allocation2 + $0x2c] sm:$0x1] %v1153_v60  ;;  %v4152_v43 = vpack.c.bf16 %v593_v63, %v593_v63  ;;  %v591_v19 = vmax.f32 %v5082_v51, 0.0  ;;  %v594_v12 = vmax.f32 %v5086_v18, 0.0  ;;  %v1846_v3 = vsel %vm1840_vm7, %v1844_v46, %v1845_v21 }
 0x141   : > { %v2889_v11 = vrot.slane %v6695_v6, 1  ;;  %v5196_v42 = vld [vmem:[#allocation2 + $0x74] ss:$0 sps:$4 sm:$0x11]   ;;  %6696 = vst [vmem:[#allocation16_spill] sm:$0xff] %v5198_v36  ;;  %2913 = vrot.lane.b32.xlu0 %v2867_v1, %s4672_s11  ;;  %v592_v45 = vmax.f32 %v5105_v33, 0.0 }
 0x142   : > { %v5203_v58 = vld [vmem:[#allocation2 + $0x7c] sm:$0xf]  ;;  %2419 = vrot.lane.b32.xlu1 %v2382_v34, %s4671_s8  ;;  %v1869_v35 = vrot.slane %v5196_v42, 1  ;;  %v1304_v25 = vld [vmem:[#allocation2 + $0x78] sm:$0xe]  ;;  %v1000_v55 = vshrl.u32 %v4152_v43, 16  ;;  %v4150_v18 = vpack.c.bf16 %v591_v19, %v591_v19  ;;  %v4153_v31 = vpack.c.bf16 %v594_v12, %v594_v12 }
 0x143   : > { %v2891_v9 = vsel %vm1840_vm7, %v2889_v11, %v2890_v56  ;;  %v1003_v51 = vshll.u32 %v4152_v43, 16  ;;  %v1868_v59 = vrot.slane %v3984_v48, 1  ;;  %v1211_v14 = vld [vmem:[#allocation2 + $0x90] sm:$0xf]  ;;  %v4151_v60 = vpack.c.bf16 %v592_v45, %v592_v45  ;;  %v1204_v33 = vld [vmem:[#allocation2 + $0x84] sm:$0xf] }
 0x144   : > { %v5211_v34 = vld [vmem:[#allocation2 + $0x80] ss:$0 sps:$4 sm:$0x11]   ;;  %v3985_v63 = vcombine.low %v1304_v25, %v5203_v58  ;;  %v2094_v46 = vshrl.u32 %v5070_v8, 16  ;;  %v1002_v21 = vrot.slane %v1000_v55, 7  ;;  %v983_v1 = vshrl.u32 %v4150_v18, 16 }
 0x145   : > { %v1870_v29 = vsel %vm1840_vm7, %v1868_v59, %v1869_v35  ;;  %v986_v6 = vshll.u32 %v4150_v18, 16  ;;  %1893 = vrot.lane.b32.xlu0 %v1849_v5, %s4667_s12  ;;  %v1008_v11 = vshrl.u32 %v4153_v31, 16  ;;  %v1011_v56 = vshll.u32 %v4153_v31, 16  ;;  %v1215_v25 = vld [vmem:[#allocation2 + $0x98] sm:$0x1] }
 0x146   : > { %1891 = vrot.lane.b32.xlu1 %v1846_v3, %s4667_s12  ;;  %v991_v43 = vshrl.u32 %v4151_v60, 16  ;;  %v994_v48 = vshll.u32 %v4151_v60, 16  ;;  %v1005_v19 = vor.u32 %v1003_v51, %v1002_v21  ;;  %v1006_v12 = vrot.slane %v1002_v21, 4  ;;  %v1208_v36 = vld [vmem:[#allocation2 + $0x8c] sm:$0x1] }
 0x147   : > { %v985_v45 = vrot.slane %v983_v1, 7  ;;  %v1871_v0 = vrot.slane %v3985_v63, 1  ;;  %v1430_v55 = vld [vmem:[#allocation2 + $0x6c] sm:$0xe]  ;;  %v1010_v24 = vrot.slane %v1008_v11, 7  ;;  %v1872_v59 = vrot.slane %v5211_v34, 1 }
 0x148   : > { %v993_v35 = vrot.slane %v991_v43, 7  ;;  %v6697_v5 = vshll.u32 %v5070_v8, 16  ;;  %v1212_v3 = vsel %vm4981_vm10, %v1005_v19, %v1211_v14  ;;  %v2101_v51 = vshll.u32 %v5101_v27, 16  ;;  %v5224_v60 = vld [vmem:[#allocation2 + $0x14] ss:$0 sps:$4 sm:$0x11]  }
 0x149   : > { %v988_v31 = vor.u32 %v986_v6, %v985_v45  ;;  %v989_v39 = vrot.slane %v985_v45, 4  ;;  %1213 = vst [vmem:[#allocation2 + $0x90] sm:$0xf] %v1212_v3  ;;  %2929 = vrot.lane.b32.xlu0 %v2891_v9, %s4672_s11  ;;  %v1013_v63 = vor.u32 %v1011_v56, %v1010_v24  ;;  %v1015_v21 = vrot.slane %v1010_v24, 4  ;;  %v1266_v6 = vld [vmem:[#allocation2 + $0x78] sm:$0xf] }
 0x14a   : > { %v2098_v18 = vrot.slane %v6697_v5, 1  ;;  %1907 = vrot.lane.b32.xlu1 %v1870_v29, %s4667_s12  ;;  %v996_v1 = vor.u32 %v994_v48, %v993_v35  ;;  %v998_v11 = vrot.slane %v993_v35, 4  ;;  %v4078_v8 = vcombine.low %v1430_v55, %v5099_v26  ;;  %v5231_v27 = vpop.f32.mrb[12].mxu1  ;;  %v1366_v45 = vld [vmem:[#allocation2 + $0x6c] sm:$0xe] }
 0x14b   : > { %v1205_v14 = vsel %vm4981_vm10, %v988_v31, %v1204_v33  ;;  %v2103_v19 = vrot.slane %v2101_v51, 1  ;;  %v1014_v9 = vsel %vm5014_vm11, %v1006_v12, %v1013_v63  ;;  %v1216_v24 = vsel %vm4886_vm3, %v1015_v21, %v1215_v25  ;;  %v5251_v25 = vpop.f32.mrb[13].mxu1 }
 0x14c   : > { %v2099_v43 = vor.u32 %v2098_v18, %v2094_v46  ;;  %1206 = vst [vmem:[#allocation2 + $0x84] sm:$0xf] %v1205_v14  ;;  %v997_v29 = vsel %vm5014_vm11, %v989_v39, %v996_v1  ;;  %v1209_v26 = vsel %vm4886_vm3, %v998_v11, %v1208_v36  ;;  %1214 = vst.msk [vmem:[#allocation2 + $0x94] sm:$0xf] %vm603_vm6, %v1014_v9  ;;  %v2354_v12 = vrot.slane %v5224_v60, 1  ;;  %v5268_v31 = vpop.f32.mrb[14].mxu1 }
 0x14d   : > { %1217 = vst [vmem:[#allocation2 + $0x98] sm:$0x1] %v1216_v24  ;;  %1207 = vst.msk [vmem:[#allocation2 + $0x88] sm:$0xf] %vm603_vm6, %v997_v29  ;;  %v1873_v46 = vsel %vm1840_vm7, %v1871_v0, %v1872_v59  ;;  %v6698_v56 = vcombine.low %v5110_v41, %v5092_v20  ;;  %v5254_v36 = vcombine.low %v1266_v6, %v5203_v58  ;;  %v1595_v0 = vshll.u32 %v5164_v32, 16  ;;  %v5273_v1 = vpop.f32.mrb[15].mxu1 }
 0x14e   : > { %1210 = vst [vmem:[#allocation2 + $0x8c] sm:$0x1] %v1209_v26  ;;  %v2104_v33 = vsel %vm1567_vm8, %v2099_v43, %v2103_v19  ;;  %v5249_v39 = vld [vmem:[#allocation2 + $0x74] ss:$0 sps:$4 sm:$0x11]   ;;  %1909 = vrot.lane.b32.xlu0 %v1873_v46, %s4667_s12  ;;  %v1600_v55 = vshll.u32 %v5144_v15, 16  ;;  %v4031_v5 = vcombine.low %v1366_v45, %v5132_v57 }
 0x14f   : > { %v2353_v48 = vrot.slane %v6698_v56, 1  ;;  %6699 = vst [vmem:[#allocation17_spill] sm:$0xff] %v5254_v36  ;;  %2275 = vrot.lane.b32.xlu1 %v2104_v33, %s4673_s18  ;;  %v2596_v20 = vshll.u32 %v5068_v7, 16  ;;  %v6700_v41 = vshll.u32 %v5078_v13, 16  ;;  %v1593_v58 = vshrl.u32 %v5164_v32, 16 }
 0x150   : > { %v5263_v59 = vld [vmem:[#allocation2 + $0x74] ss:$0 sps:$4 sm:$0x11]   ;;  %v1597_v18 = vrot.slane %v1595_v0, 1  ;;  %v2197_v3 = vshll.u32 %v5122_v50, 16  ;;  %v2886_v63 = vrot.slane %v4078_v8, 1 }
 0x151   : > { %v2194_v35 = vrot.slane %v6700_v41, 1  ;;  %v2355_v51 = vsel %vm1840_vm7, %v2353_v48, %v2354_v12  ;;  %v2887_v15 = vrot.slane %v5249_v39, 1  ;;  %v2190_v21 = vshrl.u32 %v5078_v13, 16  ;;  %v1248_v43 = vld [vmem:[#allocation2 + $0xc] sm:$0xf] }
 0x152   : > { %2401 = vrot.lane.b32.xlu0 %v2355_v51, %s4671_s8  ;;  %v1598_v11 = vor.u32 %v1597_v18, %v1593_v58  ;;  %v1602_v57 = vrot.slane %v1600_v55, 1  ;;  %v1691_v14 = vshll.u32 %v5254_v36, 16  ;;  %v2692_v6 = vshll.u32 %v5097_v44, 16  ;;  %v1264_v24 = vld [vmem:[#allocation2 + $0x6c] sm:$0xf] }
 0x153   : > { %v2195_v50 = vor.u32 %v2194_v35, %v2190_v21  ;;  %v2199_v45 = vrot.slane %v2197_v3, 1  ;;  %v1696_v9 = vshll.u32 %v5211_v34, 16  ;;  %v2888_v13 = vsel %vm1840_vm7, %v2886_v63, %v2887_v15  ;;  %v1316_v18 = vld [vmem:[#allocation2 + $0x30] sm:$0xf]  ;;  %v5303_v63 = vld [vmem:[#allocation2 + $0x34] sm:$0xf] }
 0x154   : > { %v1603_v19 = vsel %vm1567_vm8, %v1598_v11, %v1602_v57  ;;  %v1693_v8 = vrot.slane %v1691_v14, 1  ;;  %v2377_v29 = vrot.slane %v4031_v5, 1  ;;  %v2378_v26 = vrot.slane %v5263_v59, 1 }
 0x155   : > { %1764 = vrot.lane.b32.xlu1 %v1603_v19, %s4668_s23  ;;  %v2598_v46 = vrot.slane %v2596_v20, 1  ;;  %v5284_v33 = vcombine.low %v1248_v43, %v5139_v4  ;;  %v1689_v56 = vshrl.u32 %v5254_v36, 16  ;;  %v2680_v48 = vshll.u32 %v5129_v54, 16 }
 0x156   : > { %2927 = vrot.lane.b32.xlu0 %v2888_v13, %s4672_s11  ;;  %v2594_v34 = vshrl.u32 %v5068_v7, 16  ;;  %v2601_v12 = vshll.u32 %v5134_v61, 16  ;;  %v5292_v0 = vcombine.low %v1264_v24, %v5176_v2  ;;  %v2200_v55 = vsel %vm1567_vm8, %v2195_v50, %v2199_v45 }
 0x157   : > { %v1694_v41 = vor.u32 %v1693_v8, %v1689_v56  ;;  %v1698_v20 = vrot.slane %v1696_v9, 1  ;;  %v2379_v4 = vsel %vm1840_vm7, %v2377_v29, %v2378_v26  ;;  %v2694_v5 = vrot.slane %v2692_v6, 1 }
 0x158   : > { %v2599_v35 = vor.u32 %v2598_v46, %v2594_v34  ;;  %v2697_v58 = vshll.u32 %v5166_v62, 16  ;;  %v1583_v7 = vshll.u32 %v5284_v33, 16  ;;  %v2084_v61 = vshll.u32 %v5116_v47, 16  ;;  %v5326_v46 = vld [vmem:[#allocation2 + $0x30] sm:$0xe] }
 0x159   : > { %2291 = vrot.lane.b32.xlu1 %v2200_v55, %s4673_s18  ;;  %v2603_v2 = vrot.slane %v2601_v12, 1  ;;  %v2690_v3 = vshrl.u32 %v5097_v44, 16  ;;  %v1699_v51 = vsel %vm1567_vm8, %v1694_v41, %v1698_v20  ;;  %v2682_v15 = vrot.slane %v2680_v48, 1  ;;  %v1332_v41 = vld [vmem:[#allocation2 + $0x90] sm:$0xf] }
 0x15a   : > { %2417 = vrot.lane.b32.xlu0 %v2379_v4, %s4671_s8  ;;  %v1679_v21 = vshll.u32 %v5292_v0, 16  ;;  %v2699_v57 = vrot.slane %v2697_v58, 1  ;;  %v1585_v14 = vrot.slane %v1583_v7, 1  ;;  %v2678_v6 = vshrl.u32 %v5129_v54, 16  ;;  %v5333_v20 = vld [vmem:[#allocation2 + $0x94] sm:$0xf] }
 0x15b   : > { %v2604_v62 = vsel %vm1567_vm8, %v2599_v35, %v2603_v2  ;;  %v2695_v11 = vor.u32 %v2694_v5, %v2690_v3  ;;  %v2685_v44 = vshll.u32 %v5249_v39, 16  ;;  %v5312_v50 = vcombine.low %v1316_v18, %v5303_v63  ;;  %v1377_v7 = vld [vmem:[#allocation2 + $0x24] sm:$0xf] }
 0x15c   : > { %v1581_v43 = vshrl.u32 %v5284_v33, 16  ;;  %v1588_v19 = vshll.u32 %v5160_v52, 16  ;;  %v2683_v45 = vor.u32 %v2682_v15, %v2678_v6  ;;  %v1681_v8 = vrot.slane %v1679_v21, 1 }
 0x15d   : > { %1780 = vrot.lane.b32.xlu1 %v1699_v51, %s4668_s23  ;;  %v2700_v9 = vsel %vm1567_vm8, %v2695_v11, %v2699_v57  ;;  %v2086_v13 = vrot.slane %v2084_v61, 1  ;;  %v485_v54 = vadd.f32 %v5020_v16, %v4961_v53  ;;  %v2687_v39 = vrot.slane %v2685_v44, 1  ;;  %v1379_v51 = vld [vmem:[#allocation2 + $0x30] sm:$0xf] }
 0x15e   : > { %2785 = vrot.lane.b32.xlu0 %v2604_v62, %s4674_s20  ;;  %v1586_v24 = vor.u32 %v1585_v14, %v1581_v43  ;;  %v1677_v29 = vshrl.u32 %v5292_v0, 16  ;;  %v1684_v26 = vshll.u32 %v5196_v42, 16  ;;  %v477_v52 = vadd.f32 %v4961_v53, %v5024_v22  ;;  %v5335_v42 = vld [vmem:[#allocation2 + $0x90] sm:$0xe]  ;;  %v5365_v62 = vld [vmem:[#allocation2 + $0x34] sm:$0xf] }
 0x15f   : > { %v1590_v56 = vrot.slane %v1588_v19, 1  ;;  %v2082_v48 = vshrl.u32 %v5116_v47, 16  ;;  %v2089_v34 = vshll.u32 %v5224_v60, 16  ;;  %v488_v16 = vadd.f32 %v5029_v28, %v4961_v53  ;;  %v5373_v19 = vld [vmem:[#allocation2 + $0x88] sm:$0xf] }
 0x160   : > { %v2688_v12 = vsel %vm1567_vm8, %v2683_v45, %v2687_v39  ;;  %v1682_v55 = vor.u32 %v1681_v8, %v1677_v29  ;;  %v480_v22 = vadd.f32 %v4961_v53, %v5037_v38  ;;  %v5341_v4 = vadd.f32 %v5022_v17, %v4961_v53  ;;  %v5349_v38 = vld [vmem:[#allocation2 + $0x28] sm:$0xf] }
 0x161   : > { %2007 = vrot.lane.b32.xlu1 %v5312_v50, %s4670_s9  ;;  %v2180_v47 = vshll.u32 %v5158_v40, 16  ;;  %v1591_v28 = vsel %vm1567_vm8, %v1586_v24, %v1590_v56  ;;  %v2087_v60 = vor.u32 %v2086_v13, %v2082_v48  ;;  %v581_v35 = vmax.f32 %v485_v54, 0.0  ;;  %v1169_v45 = vld [vmem:[#allocation2 + $0x48] sm:$0xf] }
 0x162   : > { %2801 = vrot.lane.b32.xlu0 %v2700_v9, %s4674_s20  ;;  %v4026_v5 = vcombine.low %v5326_v46, %v5303_v63  ;;  %v1686_v58 = vrot.slane %v1684_v26, 1  ;;  %v5353_v17 = vadd.f32 %v4961_v53, %v5026_v23  ;;  %v5357_v61 = vadd.f32 %v5031_v30, %v4961_v53  ;;  %v1393_v30 = vld [vmem:[#allocation2 + $0x84] sm:$0xf] }
 0x163   : > { %v5360_v2 = vcombine.low %v1332_v41, %v5333_v20  ;;  %v4034_v18 = vcombine.low %v5335_v42, %v5333_v20  ;;  %v2091_v3 = vrot.slane %v2089_v34, 1  ;;  %v4140_v15 = vpack.c.bf16 %v581_v35, %v581_v35  ;;  %v1297_v26 = vld [vmem:[#allocation2 + $0x24] sm:$0xe]  ;;  %v5384_v41 = vld [vmem:[#allocation2 + $0x28] sm:$0xf] }
 0x164   : > { %v1687_v21 = vsel %vm1567_vm8, %v1682_v55, %v1686_v58  ;;  %v579_v11 = vmax.f32 %v477_v52, 0.0  ;;  %v582_v23 = vmax.f32 %v488_v16, 0.0  ;;  %v580_v57 = vmax.f32 %v480_v22, 0.0  ;;  %v5380_v52 = vld [vmem:[#allocation2 + $0x38] ss:$0 sps:$4 sm:$0x11]  }
 0x165   : > { %2799 = vrot.lane.b32.xlu1 %v2688_v12, %s4674_s20  ;;  %v2092_v53 = vsel %vm1567_vm8, %v2087_v60, %v2091_v3  ;;  %v2182_v14 = vrot.slane %v2180_v47, 1  ;;  %v898_v6 = vshrl.u32 %v4140_v15, 16  ;;  %v901_v44 = vshll.u32 %v4140_v15, 16  ;;  %v1162_v22 = vld [vmem:[#allocation2 + $0x3c] sm:$0xf] }
 0x166   : > { %1762 = vrot.lane.b32.xlu0 %v1591_v28, %s4668_s23  ;;  %v5371_v43 = vcombine.low %v1377_v7, %v5349_v38  ;;  %v4138_v8 = vpack.c.bf16 %v579_v11, %v579_v11  ;;  %v4141_v9 = vpack.c.bf16 %v582_v23, %v582_v23  ;;  %v4139_v24 = vpack.c.bf16 %v580_v57, %v580_v57  ;;  %v1173_v47 = vld [vmem:[#allocation2 + $0x50] sm:$0x1]  ;;  %v1166_v7 = vld [vmem:[#allocation2 + $0x44] sm:$0x1]  ;;  %v5391_v15 = vld [vmem:[#allocation2 + $0x94] sm:$0xf] }
 0x167   : > { %v5376_v13 = vcombine.low %v1379_v51, %v5365_v62  ;;  %v2178_v54 = vshrl.u32 %v5158_v40, 16  ;;  %v2185_v39 = vshll.u32 %v5263_v59, 16  ;;  %v900_v29 = vrot.slane %v898_v6, 7  ;;  %v1395_v51 = vld [vmem:[#allocation2 + $0x90] sm:$0xf] }
 0x168   : > { %v881_v56 = vshrl.u32 %v4138_v8, 16  ;;  %v884_v48 = vshll.u32 %v4138_v8, 16  ;;  %v906_v34 = vshrl.u32 %v4141_v9, 16  ;;  %v909_v16 = vshll.u32 %v4141_v9, 16 }
 0x169   : > { %1778 = vrot.lane.b32.xlu1 %v1687_v21, %s4668_s23  ;;  %v2183_v12 = vor.u32 %v2182_v14, %v2178_v54  ;;  %v903_v55 = vor.u32 %v901_v44, %v900_v29  ;;  %v889_v40 = vshrl.u32 %v4139_v24, 16  ;;  %v892_v28 = vshll.u32 %v4139_v24, 16  ;;  %v5393_v21 = vld [vmem:[#allocation2 + $0x98] ss:$0 sps:$4 sm:$0x11]  }
 0x16a   : > { %2273 = vrot.lane.b32.xlu0 %v2092_v53, %s4673_s18  ;;  %v5389_v59 = vcombine.low %v1393_v30, %v5373_v19  ;;  %v904_v60 = vrot.slane %v900_v29, 4  ;;  %v883_v35 = vrot.slane %v881_v56, 7  ;;  %v908_v58 = vrot.slane %v906_v34, 7  ;;  %v1425_v53 = vld [vmem:[#allocation2 + $0x30] sm:$0xe] }
 0x16b   : > { %v2187_v3 = vrot.slane %v2185_v39, 1  ;;  %v1170_v11 = vsel %vm4981_vm10, %v903_v55, %v1169_v45  ;;  %v3978_v23 = vcombine.low %v1297_v26, %v5384_v41  ;;  %v891_v57 = vrot.slane %v889_v40, 7  ;;  %v5398_v30 = vld [vmem:[#allocation2 + $0x2c] ss:$0 sps:$4 sm:$0x11]  }
 0x16c   : > { %1171 = vst [vmem:[#allocation2 + $0x48] sm:$0xf] %v1170_v11  ;;  %v886_v14 = vor.u32 %v884_v48, %v883_v35  ;;  %v887_v6 = vrot.slane %v883_v35, 4  ;;  %v911_v44 = vor.u32 %v909_v16, %v908_v58  ;;  %v913_v8 = vrot.slane %v908_v58, 4  ;;  %v5406_v24 = vld [vmem:[#allocation2 + $0x90] sm:$0xe] }
 0x16d   : > { %2023 = vrot.lane.b32.xlu1 %v5360_v2, %s4670_s9  ;;  %v2188_v9 = vsel %vm1567_vm8, %v2183_v12, %v2187_v3  ;;  %v2362_v45 = vrot.slane %v4026_v5, 1  ;;  %v1314_v54 = vld [vmem:[#allocation2 + $0x24] sm:$0xf]  ;;  %v894_v39 = vor.u32 %v892_v28, %v891_v57  ;;  %v896_v29 = vrot.slane %v891_v57, 4  ;;  %v5410_v56 = vld [vmem:[#allocation2 + $0x28] sm:$0xf] }
 0x16e   : > { %2517 = vrot.lane.b32.xlu0 %v5376_v13, %s4669_s21  ;;  %v2363_v26 = vrot.slane %v5380_v52, 1  ;;  %v1330_v48 = vld [vmem:[#allocation2 + $0x84] sm:$0xf]  ;;  %v1163_v34 = vsel %vm4981_vm10, %v886_v14, %v1162_v22  ;;  %v912_v16 = vsel %vm5014_vm11, %v904_v60, %v911_v44  ;;  %v1174_v63 = vsel %vm4886_vm3, %v913_v8, %v1173_v47  ;;  %v5422_v12 = vld [vmem:[#allocation2 + $0x88] sm:$0xf] }
 0x16f   : > { %v2386_v46 = vrot.slane %v4034_v18, 1  ;;  %v2387_v5 = vrot.slane %v5393_v21, 1  ;;  %1164 = vst [vmem:[#allocation2 + $0x3c] sm:$0xf] %v1163_v34  ;;  %1172 = vst.msk [vmem:[#allocation2 + $0x4c] sm:$0xf] %vm603_vm6, %v912_v16  ;;  %v895_v55 = vsel %vm5014_vm11, %v887_v6, %v894_v39  ;;  %v1167_v22 = vsel %vm4886_vm3, %v896_v29, %v1166_v7 }
 0x170   : > { %1175 = vst [vmem:[#allocation2 + $0x50] sm:$0x1] %v1174_v63  ;;  %v1305_v40 = vld [vmem:[#allocation2 + $0x84] sm:$0xe]  ;;  %v5430_v47 = vcombine.low %v1395_v51, %v5391_v15  ;;  %v1850_v20 = vrot.slane %v3978_v23, 1  ;;  %v1851_v42 = vrot.slane %v5398_v30, 1  ;;  %v4073_v35 = vcombine.low %v1425_v53, %v5365_v62 }
 0x171   : > { %2515 = vrot.lane.b32.xlu1 %v5371_v43, %s4669_s21  ;;  %1165 = vst.msk [vmem:[#allocation2 + $0x40] sm:$0xf] %vm603_vm6, %v895_v55  ;;  %1168 = vst [vmem:[#allocation2 + $0x44] sm:$0x1] %v1167_v22  ;;  %v597_v28 = vmax.f32 %v5341_v4, 0.0  ;;  %v2120_v60 = vshll.u32 %v5312_v50, 16  ;;  %v2364_v11 = vsel %vm1840_vm7, %v2362_v45, %v2363_v26  ;;  %v5456_v62 = vcombine.low %v1314_v54, %v5410_v56 }
 0x172   : > { %2289 = vrot.lane.b32.xlu0 %v2188_v9, %s4673_s18  ;;  %v5434_v18 = vld [vmem:[#allocation2 + $0x8c] ss:$0 sps:$4 sm:$0x11]   ;;  %v5443_v7 = vld [vmem:[#allocation2 + $0x88] sm:$0xf]  ;;  %v2388_v14 = vsel %vm1840_vm7, %v2386_v46, %v2387_v5  ;;  %v5463_v6 = vcombine.low %v1330_v48, %v5422_v12  ;;  %v595_v44 = vmax.f32 %v5353_v17, 0.0  ;;  %v1852_v9 = vsel %vm1840_vm7, %v1850_v20, %v1851_v42 }
 0x173   : > { %v5448_v3 = vld [vmem:[%s6657_s2] ss:$0 sm:$0xff]  ;;  %v6701_v51 = vld [vmem:[#allocation11_spill] sm:$0xff]  ;;  %v3986_v23 = vcombine.low %v1305_v40, %v5443_v7  ;;  %v5459_v57 = vld [vmem:[#allocation2 + $0x38] ss:$0 sps:$4 sm:$0x11]   ;;  %v4156_v53 = vpack.c.bf16 %v597_v28, %v597_v28 }
 0x174   : > { %v544_v4 = vadd.f32 %v5448_v3, %v6701_v51  ;;  %v598_v8 = vmax.f32 %v5357_v61, 0.0  ;;  %v2871_v29 = vrot.slane %v4073_v35, 1  ;;  %v1254_v26 = vld [vmem:[#allocation2 + $0x30] sm:$0xf]  ;;  %v1255_v34 = vld [vmem:[#allocation2 + $0x34] sm:$0xf]  ;;  %v4154_v16 = vpack.c.bf16 %v595_v44, %v595_v44 }
 0x175   : > { %2531 = vrot.lane.b32.xlu1 %v5389_v59, %s4669_s21  ;;  %v1034_v54 = vshrl.u32 %v4156_v53, 16  ;;  %v1037_v39 = vshll.u32 %v4156_v53, 16  ;;  %v1874_v17 = vrot.slane %v3986_v23, 1  ;;  %v2872_v61 = vrot.slane %v5459_v57, 1  ;;  %v1298_v5 = vld [vmem:[#allocation2 + $0x30] sm:$0xe] }
 0x176   : > { %2533 = vrot.lane.b32.xlu0 %v5430_v47, %s4669_s21  ;;  %v4157_v63 = vpack.c.bf16 %v598_v8, %v598_v8  ;;  %v596_v46 = vmax.f32 %v544_v4, 0.0  ;;  %v2118_v48 = vshrl.u32 %v5312_v50, 16  ;;  %v2122_v22 = vrot.slane %v2120_v60, 1  ;;  %v1225_v40 = vld [vmem:[#allocation2 + $0xa8] sm:$0xf] }
 0x177   : > { %v1036_v55 = vrot.slane %v1034_v54, 7  ;;  %v1017_v20 = vshrl.u32 %v4154_v16, 16  ;;  %v1020_v42 = vshll.u32 %v4154_v16, 16  ;;  %v5474_v35 = vcombine.low %v1254_v26, %v1255_v34  ;;  %v5476_v51 = vld [vmem:[#allocation2 + $0x38] ss:$0 sps:$4 sm:$0x11]  }
 0x178   : > { %v1042_v28 = vshrl.u32 %v4157_v63, 16  ;;  %v4155_v53 = vpack.c.bf16 %v596_v46, %v596_v46  ;;  %v3979_v23 = vcombine.low %v1298_v5, %v1255_v34  ;;  %v1218_v50 = vld [vmem:[#allocation2 + $0x9c] sm:$0xf]  ;;  %v2873_v60 = vsel %vm1840_vm7, %v2871_v29, %v2872_v61  ;;  %v1229_v26 = vld [vmem:[#allocation2 + $0xb0] sm:$0x1] }
 0x179   : > { %2407 = vrot.lane.b32.xlu1 %v2364_v11, %s4671_s8  ;;  %v1039_v4 = vor.u32 %v1037_v39, %v1036_v55  ;;  %v1045_v11 = vshll.u32 %v4157_v63, 16  ;;  %v1040_v44 = vrot.slane %v1036_v55, 4  ;;  %v1019_v8 = vrot.slane %v1017_v20, 7  ;;  %v1270_v5 = vld [vmem:[#allocation2 + $0x90] sm:$0xf] }
 0x17a   : > { %2005 = vrot.lane.b32.xlu0 %v5456_v62, %s4670_s9  ;;  %v1044_v58 = vrot.slane %v1042_v28, 7  ;;  %v1025_v16 = vshrl.u32 %v4155_v53, 16  ;;  %v1028_v39 = vshll.u32 %v4155_v53, 16  ;;  %v2125_v63 = vshll.u32 %v5380_v52, 16  ;;  %v1271_v55 = vld [vmem:[#allocation2 + $0x94] sm:$0xf] }
 0x17b   : > { %v1226_v54 = vsel %vm4981_vm10, %v1039_v4, %v1225_v40  ;;  %v1854_v20 = vrot.slane %v5476_v51, 1  ;;  %v1619_v28 = vshll.u32 %v5474_v35, 16  ;;  %v1023_v45 = vrot.slane %v1019_v8, 4  ;;  %v1222_v61 = vld [vmem:[#allocation2 + $0xa4] sm:$0x1] }
 0x17c   : > { %1227 = vst [vmem:[#allocation2 + $0xa8] sm:$0xf] %v1226_v54  ;;  %v1047_v34 = vor.u32 %v1045_v11, %v1044_v58  ;;  %v1049_v46 = vrot.slane %v1044_v58, 4  ;;  %v1027_v29 = vrot.slane %v1025_v16, 7  ;;  %v1853_v40 = vrot.slane %v3979_v23, 1  ;;  %v4510_v11 = vld [vmem:[%s6658_s3] sm:$0xff]  }
 0x17d   : > { %2423 = vrot.lane.b32.xlu1 %v2388_v14, %s4671_s8  ;;  %v1022_v14 = vor.u32 %v1020_v42, %v1019_v8  ;;  %v5488_v4 = vld [vmem:[#allocation2 + $0x98] ss:$0 sps:$4 sm:$0x11]   ;;  %v2216_v53 = vshll.u32 %v5360_v2, 16  ;;  %v1306_v8 = vld [vmem:[#allocation2 + $0x90] sm:$0xe]  ;;  %4250 = vmatprep.subr.bf16.mxu1 %v4510_v11 }
 0x17e   : > { %2021 = vrot.lane.b32.xlu0 %v5463_v6, %s4670_s9  ;;  %v1048_v58 = vsel %vm5014_vm11, %v1040_v44, %v1047_v34  ;;  %v1230_v42 = vsel %vm4886_vm3, %v1049_v46, %v1229_v26  ;;  %v1032_v23 = vrot.slane %v1027_v29, 4  ;;  %v6702_v44 = vrot.slane %v5434_v18, 1  ;;  %v1424_v34 = vld [vmem:[#allocation2 + $0x24] sm:$0xe]  ;;  %4251 = vmatpush3.bf16.msra.mxu1 %v4510_v11 }
 0x17f   : > { %v1219_v52 = vsel %vm4981_vm10, %v1022_v14, %v1218_v50  ;;  %1228 = vst.msk [vmem:[#allocation2 + $0xac] sm:$0xf] %vm603_vm6, %v1048_v58  ;;  %1231 = vst [vmem:[#allocation2 + $0xb0] sm:$0x1] %v1230_v42  ;;  %v5502_v50 = vcombine.low %v1270_v5, %v1271_v55  ;;  %v2123_v26 = vor.u32 %v2122_v22, %v2118_v48  ;;  %v2127_v16 = vrot.slane %v2125_v63, 1 }
 0x180   : > { %1220 = vst [vmem:[#allocation2 + $0x9c] sm:$0xf] %v1219_v52  ;;  %v1876_v54 = vsel %vm1840_vm7, %v1874_v17, %v6702_v44  ;;  %v1624_v14 = vshll.u32 %v5476_v51, 16  ;;  %v1621_v46 = vrot.slane %v1619_v28, 1  ;;  %v1223_v5 = vsel %vm4886_vm3, %v1032_v23, %v1222_v61 }
 0x181   : > { %1895 = vrot.lane.b32.xlu1 %v1852_v9, %s4667_s12  ;;  %v1030_v9 = vor.u32 %v1028_v39, %v1027_v29  ;;  %v1855_v17 = vsel %vm1840_vm7, %v1853_v40, %v1854_v20  ;;  %v6703_v48 = vcombine.low %v5406_v24, %v5391_v15  ;;  %v2896_v51 = vrot.slane %v5488_v4, 1  ;;  %1224 = vst [vmem:[#allocation2 + $0xa4] sm:$0x1] %v1223_v5  ;;  %v4451_v63 = vld [vmem:[#allocation2 + $0x98] ss:$0 sps:$4 sm:$0x11]  }
 0x182   : > { %2917 = vrot.lane.b32.xlu0 %v2873_v60, %s4672_s11  ;;  %v1617_v60 = vshrl.u32 %v5474_v35, 16  ;;  %v3987_v28 = vcombine.low %v1306_v8, %v1271_v55  ;;  %v1715_v29 = vshll.u32 %v5502_v50, 16  ;;  %v4511_v20 = vld [vmem:[%s6658_s3 + $0x8] sm:$0xff]   ;;  %v4072_v61 = vcombine.low %v1424_v34, %v5349_v38  ;;  %v1360_v40 = vld [vmem:[#allocation2 + $0x24] sm:$0xe] }
 0x183   : > { %v1031_v39 = vsel %vm5014_vm11, %v1023_v45, %v1030_v9  ;;  %v2895_v22 = vrot.slane %v6703_v48, 1  ;;  %v1252_v45 = vld [vmem:[#allocation2 + $0x24] sm:$0xf]  ;;  %v2128_v15 = vsel %vm1567_vm8, %v2123_v26, %v2127_v16  ;;  %v1626_v24 = vrot.slane %v1624_v14, 1  ;;  %4252 = vmatprep.subr.bf16.mxu1 %v4511_v20 }
 0x184   : > { %1221 = vst.msk [vmem:[#allocation2 + $0xa0] sm:$0xf] %vm603_vm6, %v1031_v39  ;;  %v1622_v52 = vor.u32 %v1621_v46, %v1617_v60  ;;  %v2214_v58 = vshrl.u32 %v5360_v2, 16  ;;  %v2218_v42 = vrot.slane %v2216_v53, 1  ;;  %v2221_v55 = vshll.u32 %v5393_v21, 16  ;;  %4253 = vmatpush3.bf16.msra.mxu1 %v4511_v20 }
 0x185   : > { %1911 = vrot.lane.b32.xlu1 %v1876_v54, %s4667_s12  ;;  %v5530_v11 = vcombine.low %v1252_v45, %v5384_v41  ;;  %v2897_v9 = vsel %vm1840_vm7, %v2895_v22, %v2896_v51  ;;  %v1877_v23 = vrot.slane %v3987_v28, 1  ;;  %v1878_v38 = vrot.slane %v4451_v63, 1  ;;  %v4453_v8 = vld [vmem:[#allocation2 + $0x2c] ss:$0 sps:$4 sm:$0x11]  }
 0x186   : > { %1897 = vrot.lane.b32.xlu0 %v1855_v17, %s4667_s12  ;;  %v2608_v44 = vshll.u32 %v5371_v43, 16  ;;  %v1713_v2 = vshrl.u32 %v5502_v50, 16  ;;  %v1717_v53 = vrot.slane %v1715_v29, 1  ;;  %v1720_v21 = vshll.u32 %v4451_v63, 16  ;;  %v1432_v26 = vld [vmem:[#allocation2 + $0x84] sm:$0xe] }
 0x187   : > { %6704 = vst [vmem:[#allocation11_spill] sm:$0xff] %v5530_v11  ;;  %v4025_v54 = vcombine.low %v1360_v40, %v5410_v56  ;;  %v5538_v41 = vld [vmem:[#allocation2 + $0x2c] ss:$0 sps:$4 sm:$0x11]   ;;  %v1627_v16 = vsel %vm1567_vm8, %v1622_v52, %v1626_v24  ;;  %v2219_v14 = vor.u32 %v2218_v42, %v2214_v58  ;;  %v2223_v34 = vrot.slane %v2221_v55, 1 }
 0x188   : > { %v2868_v60 = vrot.slane %v4072_v61, 1  ;;  %v1368_v46 = vld [vmem:[#allocation2 + $0x84] sm:$0xe]  ;;  %v1879_v39 = vsel %vm1840_vm7, %v1877_v23, %v1878_v38  ;;  %v2869_v5 = vrot.slane %v4453_v8, 1  ;;  %v2606_v17 = vshrl.u32 %v5371_v43, 16 }
 0x189   : > { %2279 = vrot.lane.b32.xlu1 %v2128_v15, %s4673_s18  ;;  %v1607_v48 = vshll.u32 %v5530_v11, 16  ;;  %v1268_v22 = vld [vmem:[#allocation2 + $0x84] sm:$0xf]  ;;  %v1718_v56 = vor.u32 %v1717_v53, %v1713_v2  ;;  %v1722_v51 = vrot.slane %v1720_v21, 1  ;;  %v2610_v63 = vrot.slane %v2608_v44, 1 }
 0x18a   : > { %2933 = vrot.lane.b32.xlu0 %v2897_v9, %s4672_s11  ;;  %v2613_v28 = vshll.u32 %v4453_v8, 16  ;;  %v4080_v45 = vcombine.low %v1432_v26, %v5373_v19  ;;  %v2359_v29 = vrot.slane %v4025_v54, 1  ;;  %v2360_v20 = vrot.slane %v5538_v41, 1  ;;  %v4455_v15 = vld [vmem:[#allocation2 + $0x8c] ss:$0 sps:$4 sm:$0x11]  }
 0x18b   : > { %v1612_v61 = vshll.u32 %v5398_v30, 16  ;;  %v2620_v24 = vshll.u32 %v5376_v13, 16  ;;  %v4033_v43 = vcombine.low %v1368_v46, %v5422_v12  ;;  %v2224_v40 = vsel %vm1567_vm8, %v2219_v14, %v2223_v34  ;;  %v5552_v52 = vld [vmem:[#allocation2 + $0x8c] ss:$0 sps:$4 sm:$0x11]  }
 0x18c   : > { %v2704_v58 = vshll.u32 %v5389_v59, 16  ;;  %v2870_v19 = vsel %vm1840_vm7, %v2868_v60, %v2869_v5  ;;  %v1605_v42 = vshrl.u32 %v5530_v11, 16  ;;  %v1609_v55 = vrot.slane %v1607_v48, 1  ;;  %v1320_v53 = vld [vmem:[#allocation2 + $0x48] sm:$0xf] }
 0x18d   : > { %1768 = vrot.lane.b32.xlu1 %v1627_v16, %s4668_s23  ;;  %v5559_v30 = vcombine.low %v1268_v22, %v5443_v7  ;;  %v1723_v9 = vsel %vm1567_vm8, %v1718_v56, %v1722_v51  ;;  %v2611_v12 = vor.u32 %v2610_v63, %v2606_v17  ;;  %v2615_v23 = vrot.slane %v2613_v28, 1  ;;  %v5564_v21 = vld [vmem:[#allocation2 + $0x4c] sm:$0xf]  ;;  %v5767_v36 = vld [vmem:[#allocation2 + $0xa4] ss:$0 sps:$4 sm:$0x11]  }
 0x18e   : > { %1913 = vrot.lane.b32.xlu0 %v1879_v39, %s4667_s12  ;;  %v2361_v38 = vsel %vm1840_vm7, %v2359_v29, %v2360_v20  ;;  %v1614_v8 = vrot.slane %v1612_v61, 1  ;;  %v2892_v44 = vrot.slane %v4080_v45, 1  ;;  %v2893_v2 = vrot.slane %v4455_v15, 1  ;;  %v634_v20 = vld [vmem:[#allocation2 + $0x54] sm:$0x1] }
 0x18f   : > { %6705 = vst [vmem:[#allocation18_spill] sm:$0xff] %v5559_v30  ;;  %v2383_v54 = vrot.slane %v4033_v43, 1  ;;  %v2618_v26 = vshrl.u32 %v5376_v13, 16  ;;  %v2622_v16 = vrot.slane %v2620_v24, 1  ;;  %v2625_v7 = vshll.u32 %v5459_v57, 16  ;;  %v6706_v24 = vld [vmem:[#allocation12_spill] sm:$0xff] }
 0x190   : > { %v1610_v14 = vor.u32 %v1609_v55, %v1605_v42  ;;  %v2384_v34 = vrot.slane %v5552_v52, 1  ;;  %v2702_v60 = vshrl.u32 %v5389_v59, 16  ;;  %v2706_v46 = vrot.slane %v2704_v58, 1  ;;  %v637_v57 = vld [vmem:[#allocation2 + $0x60] sm:$0x1] }
 0x191   : > { %2295 = vrot.lane.b32.xlu1 %v2224_v40, %s4673_s18  ;;  %v2709_v39 = vshll.u32 %v4455_v15, 16  ;;  %v2716_v5 = vshll.u32 %v5430_v47, 16  ;;  %v2108_v17 = vshll.u32 %v5456_v62, 16  ;;  %v2204_v13 = vshll.u32 %v5463_v6, 16  ;;  %v687_v58 = vld [vmem:[#allocation2 + $0x68] sm:$0x1] }
 0x192   : > { %2915 = vrot.lane.b32.xlu0 %v2870_v19, %s4672_s11  ;;  %v1703_v48 = vshll.u32 %v5559_v30, 16  ;;  %v2616_v22 = vsel %vm1567_vm8, %v2611_v12, %v2615_v23  ;;  %v5578_v56 = vcombine.low %v1320_v53, %v5564_v21  ;;  %v2623_v51 = vor.u32 %v2622_v16, %v2618_v26  ;;  %v6707_v53 = vld [vmem:[#allocation14_spill] sm:$0xff]  ;;  %v5603_v16 = vpop.permute.xlu1 %1889  ;;  %v4483_v37 = vld [vmem:[#allocation2 + $0x50] ss:$0 sps:$4 sm:$0x11]  }
 0x193   : > { %v2627_v59 = vrot.slane %v2625_v7, 1  ;;  %v1615_v63 = vsel %vm1567_vm8, %v1610_v14, %v1614_v8  ;;  %v2894_v28 = vsel %vm1840_vm7, %v2892_v44, %v2893_v2  ;;  %v2385_v45 = vsel %vm1840_vm7, %v2383_v54, %v2384_v34  ;;  %v684_v44 = vld [vmem:[#allocation2 + $0x5c] sm:$0x1] }
 0x194   : > { %v2707_v29 = vor.u32 %v2706_v46, %v2702_v60  ;;  %v2711_v61 = vrot.slane %v2709_v39, 1  ;;  %v1701_v15 = vshrl.u32 %v5559_v30, 16  ;;  %v501_v43 = vadd.f32 %v5448_v3, %v6706_v24  ;;  %v6710_v60 = vld [vmem:[#allocation16_spill] sm:$0xff]  ;;  %v1300_v30 = vld [vmem:[#allocation2 + $0x48] sm:$0xe] }
 0x195   : > { %1784 = vrot.lane.b32.xlu1 %v1723_v9, %s4668_s23  ;;  %v638_v40 = vsel %vm4886_vm3, 0, %v637_v57  ;;  %v1705_v19 = vrot.slane %v1703_v48, 1  ;;  %v1708_v42 = vshll.u32 %v5434_v18, 16  ;;  %v2714_v55 = vshrl.u32 %v5430_v47, 16  ;;  %v6708_v47 = vld [vmem:[#allocation15_spill] sm:$0xff] }
 0x196   : > { %2405 = vrot.lane.b32.xlu0 %v2361_v38, %s4671_s8  ;;  %v2718_v9 = vrot.slane %v2716_v5, 1  ;;  %639 = vst [vmem:[#allocation2 + $0x60] sm:$0x1] %v638_v40  ;;  %v2628_v12 = vsel %vm1567_vm8, %v2623_v51, %v2627_v59  ;;  %v2721_v23 = vshll.u32 %v5488_v4, 16  ;;  %v2106_v38 = vshrl.u32 %v5456_v62, 16  ;;  %v5605_v4 = vpop.permute.xlu0 %1760 }
 0x197   : > { %v585_v8 = vmax.f32 %v501_v43, 0.0  ;;  %v2110_v2 = vrot.slane %v2108_v17, 1  ;;  %v493_v54 = vadd.f32 %v5448_v3, %v6707_v53  ;;  %v635_v18 = vsel %vm4886_vm3, 0, %v634_v20 }
 0x198   : > { %v504_v26 = vadd.f32 %v5448_v3, %v6708_v47  ;;  %v2113_v62 = vshll.u32 %v5538_v41, 16  ;;  %636 = vst [vmem:[#allocation2 + $0x54] sm:$0x1] %v635_v18  ;;  %v688_v34 = vsel %vm4896_vm5, 0, %v687_v58  ;;  %v496_v46 = vadd.f32 %v5448_v3, %v6710_v60  ;;  %v1336_v60 = vld [vmem:[#allocation2 + $0xa8] sm:$0xf] }
 0x199   : > { %2787 = vrot.lane.b32.xlu1 %v2616_v22, %s4674_s20  ;;  %v4144_v7 = vpack.c.bf16 %v585_v8, %v585_v8  ;;  %v1710_v39 = vrot.slane %v1708_v42, 1  ;;  %v583_v5 = vmax.f32 %v493_v54, 0.0  ;;  %689 = vst [vmem:[#allocation2 + $0x68] sm:$0x1] %v688_v34  ;;  %v685_v48 = vsel %vm4896_vm5, 0, %v684_v44 }
 0x19a   : > { %2931 = vrot.lane.b32.xlu0 %v2894_v28, %s4672_s11  ;;  %v586_v17 = vmax.f32 %v504_v26, 0.0  ;;  %v1706_v57 = vor.u32 %v1705_v19, %v1701_v15  ;;  %v584_v59 = vmax.f32 %v496_v46, 0.0  ;;  %686 = vst [vmem:[#allocation2 + $0x5c] sm:$0x1] %v685_v48  ;;  %v2719_v41 = vor.u32 %v2718_v9, %v2714_v55  ;;  %v5629_v34 = vld [vmem:[#allocation2 + $0x48] sm:$0xe] }
 0x19b   : > { %v932_v22 = vshrl.u32 %v4144_v7, 16  ;;  %v935_v51 = vshll.u32 %v4144_v7, 16  ;;  %v4142_v28 = vpack.c.bf16 %v583_v5, %v583_v5  ;;  %v2111_v20 = vor.u32 %v2110_v2, %v2106_v38 }
 0x19c   : > { %v2115_v24 = vrot.slane %v2113_v62, 1  ;;  %v4143_v40 = vpack.c.bf16 %v584_v59, %v584_v59  ;;  %v2712_v44 = vsel %vm1567_vm8, %v2707_v29, %v2711_v61  ;;  %v1711_v47 = vsel %vm1567_vm8, %v1706_v57, %v1710_v39 }
 0x19d   : > { %1766 = vrot.lane.b32.xlu1 %v1615_v63, %s4668_s23  ;;  %v2723_v63 = vrot.slane %v2721_v23, 1  ;;  %v934_v43 = vrot.slane %v932_v22, 7  ;;  %v1183_v58 = vld [vmem:[#allocation2 + $0x60] sm:$0xf]  ;;  %v915_v42 = vshrl.u32 %v4142_v28, 16  ;;  %v918_v15 = vshll.u32 %v4142_v28, 16 }
 0x19e   : > { %2421 = vrot.lane.b32.xlu0 %v2385_v45, %s4671_s8  ;;  %v4145_v45 = vpack.c.bf16 %v586_v17, %v586_v17  ;;  %v923_v9 = vshrl.u32 %v4143_v40, 16  ;;  %v926_v23 = vshll.u32 %v4143_v40, 16  ;;  %v2116_v29 = vsel %vm1567_vm8, %v2111_v20, %v2115_v24  ;;  %v5641_v20 = vld [vmem:[#allocation2 + $0x4c] sm:$0xf] }
 0x19f   : > { %v937_v55 = vor.u32 %v935_v51, %v934_v43  ;;  %v938_v38 = vrot.slane %v934_v43, 4  ;;  %v917_v2 = vrot.slane %v915_v42, 7  ;;  %v1176_v26 = vld [vmem:[#allocation2 + $0x54] sm:$0xf]  ;;  %v5635_v51 = vld [vmem:[#allocation2 + $0xac] sm:$0xf] }
 0x1a0   : > { %v940_v19 = vshrl.u32 %v4145_v45, 16  ;;  %v943_v8 = vshll.u32 %v4145_v45, 16  ;;  %v1187_v62 = vld [vmem:[#allocation2 + $0x68] sm:$0x1]  ;;  %v925_v7 = vrot.slane %v923_v9, 7  ;;  %v2202_v59 = vshrl.u32 %v5463_v6, 16 }
 0x1a1   : > { %2011 = vrot.lane.b32.xlu1 %v5578_v56, %s4670_s9  ;;  %v1184_v61 = vsel %vm4981_vm10, %v937_v55, %v1183_v58  ;;  %v920_v46 = vor.u32 %v918_v15, %v917_v2  ;;  %v921_v5 = vrot.slane %v917_v2, 4  ;;  %v1180_v22 = vld [vmem:[#allocation2 + $0x5c] sm:$0x1]  ;;  %v1383_v45 = vld [vmem:[#allocation2 + $0x48] sm:$0xf]  ;;  %v2209_v24 = vshll.u32 %v5552_v52, 16 }
 0x1a2   : > { %2789 = vrot.lane.b32.xlu0 %v2628_v12, %s4674_s20  ;;  %v2724_v12 = vsel %vm1567_vm8, %v2719_v41, %v2723_v63  ;;  %v942_v18 = vrot.slane %v940_v19, 7  ;;  %1185 = vst [vmem:[#allocation2 + $0x60] sm:$0xf] %v1184_v61  ;;  %v2206_v41 = vrot.slane %v2204_v13, 1  ;;  %v928_v63 = vor.u32 %v926_v23, %v925_v7  ;;  %v661_v13 = vld [vmem:[#allocation2 + $0xc0] sm:$0x1] }
 0x1a3   : > { %v5618_v53 = vpop.permute.xlu0 %2513  ;;  %v930_v28 = vrot.slane %v925_v7, 4  ;;  %v1177_v43 = vsel %vm4981_vm10, %v920_v46, %v1176_v26  ;;  %v5657_v42 = vcombine.low %v1336_v60, %v5635_v51  ;;  %v1381_v15 = vld [vmem:[#allocation2 + $0x3c] sm:$0xf]  ;;  %v5659_v19 = vld [vmem:[#allocation2 + $0x40] sm:$0xf]  ;;  %v565_v2 = vadd.f32 %v5448_v3, %v5231_v27 }
 0x1a4   : > { %v5620_v54 = vpop.permute.xlu1 %2003  ;;  %v945_v17 = vor.u32 %v943_v8, %v942_v18  ;;  %v947_v48 = vrot.slane %v942_v18, 4  ;;  %1178 = vst [vmem:[#allocation2 + $0x54] sm:$0xf] %v1177_v43  ;;  %v929_v6 = vsel %vm5014_vm11, %v921_v5, %v928_v63  ;;  %v658_v8 = vld [vmem:[#allocation2 + $0xb4] sm:$0x1]  ;;  %v662_v61 = vsel %vm4886_vm3, 0, %v661_v13 }
 0x1a5   : > { %2803 = vrot.lane.b32.xlu1 %v2712_v44, %s4674_s20  ;;  %v1181_v52 = vsel %vm4886_vm3, %v930_v28, %v1180_v22  ;;  %1179 = vst.msk [vmem:[#allocation2 + $0x58] sm:$0xf] %vm603_vm6, %v929_v6  ;;  %v4028_v44 = vcombine.low %v5629_v34, %v5564_v21  ;;  %v1371_v55 = vld [vmem:[#allocation2 + $0xa8] sm:$0xe]  ;;  %v1397_v18 = vld [vmem:[#allocation2 + $0x9c] sm:$0xf]  ;;  %v2207_v21 = vor.u32 %v2206_v41, %v2202_v59 }
 0x1a6   : > { %2805 = vrot.lane.b32.xlu0 %v2724_v12, %s4674_s20  ;;  %v946_v40 = vsel %vm5014_vm11, %v938_v38, %v945_v17  ;;  %v1188_v58 = vsel %vm4886_vm3, %v947_v48, %v1187_v62  ;;  %1182 = vst [vmem:[#allocation2 + $0x5c] sm:$0x1] %v1181_v52  ;;  %v5669_v12 = vcombine.low %v1383_v45, %v5641_v20  ;;  %v5671_v38 = vld [vmem:[#allocation2 + $0x50] ss:$0 sps:$4 sm:$0x11]   ;;  %v601_v7 = vmax.f32 %v565_v2, 0.0 }
 0x1a7   : > { %v5631_v39 = vpop.permute.xlu0 %2529  ;;  %1186 = vst.msk [vmem:[#allocation2 + $0x64] sm:$0xf] %vm603_vm6, %v946_v40  ;;  %1189 = vst [vmem:[#allocation2 + $0x68] sm:$0x1] %v1188_v58  ;;  %v1399_v26 = vld [vmem:[#allocation2 + $0xa8] sm:$0xf]  ;;  %v557_v27 = vadd.f32 %v5448_v3, %v5251_v25  ;;  %v4036_v60 = vcombine.low %v1371_v55, %v5635_v51  ;;  %v5691_v46 = vcombine.low %v1381_v15, %v5659_v19 }
 0x1a8   : > { %6711 = vst [vmem:[#allocation12_spill] sm:$0xff] %v5631_v39  ;;  %v5633_v57 = vpop.permute.xlu1 %2019  ;;  %v5683_v62 = vld [vmem:[#allocation2 + $0xac] sm:$0xf]  ;;  %663 = vst [vmem:[#allocation2 + $0xc0] sm:$0x1] %v662_v61  ;;  %v659_v34 = vsel %vm4886_vm3, 0, %v658_v8  ;;  %v4160_v41 = vpack.c.bf16 %v601_v7, %v601_v7  ;;  %v568_v43 = vadd.f32 %v5448_v3, %v5268_v31  ;;  %v560_v31 = vadd.f32 %v5448_v3, %v5273_v1 }
 0x1a9   : > { %6712 = vst [vmem:[#allocation14_spill] sm:$0xff] %v5633_v57  ;;  %1782 = vrot.lane.b32.xlu1 %v1711_v47, %s4668_s23  ;;  %v5677_v47 = vld [vmem:[#allocation2 + $0xa0] sm:$0xf]  ;;  %v5693_v5 = vld [vmem:[#allocation2 + $0xb0] ss:$0 sps:$4 sm:$0x11]  }
 0x1aa   : > { %2277 = vrot.lane.b32.xlu0 %v2116_v29, %s4673_s18  ;;  %v2211_v29 = vrot.slane %v2209_v24, 1  ;;  %660 = vst [vmem:[#allocation2 + $0xb4] sm:$0x1] %v659_v34  ;;  %v711_v17 = vld [vmem:[#allocation2 + $0xc8] sm:$0x1]  ;;  %v5700_v59 = vcombine.low %v1397_v18, %v5677_v47  ;;  %v2368_v25 = vrot.slane %v4028_v44, 1  ;;  %v5709_v24 = vcombine.low %v1399_v26, %v5683_v62 }
 0x1ab   : > { %v5666_v23 = vpop.permute.xlu0 %2001  ;;  %v599_v63 = vmax.f32 %v557_v27, 0.0  ;;  %v5704_v51 = vld [vmem:[#allocation2 + $0x48] sm:$0xe]  ;;  %v2369_v45 = vrot.slane %v5671_v38, 1  ;;  %v708_v40 = vld [vmem:[#allocation2 + $0xbc] sm:$0x1] }
 0x1ac   : > { %v5664_v9 = vpop.permute.xlu1 %2527  ;;  %v2212_v28 = vsel %vm1567_vm8, %v2207_v21, %v2211_v29  ;;  %v1318_v58 = vld [vmem:[#allocation2 + $0x3c] sm:$0xf]  ;;  %v5714_v6 = vld [vmem:[#allocation2 + $0x40] sm:$0xf]  ;;  %v1068_v13 = vshrl.u32 %v4160_v41, 16  ;;  %v1071_v15 = vshll.u32 %v4160_v41, 16  ;;  %v4075_v41 = vcombine.low %v5704_v51, %v5641_v20 }
 0x1ad   : > { %6713 = vst [vmem:[#allocation15_spill] sm:$0xff] %v5664_v9  ;;  %2027 = vrot.lane.b32.xlu1 %v5657_v42, %s4670_s9  ;;  %v1299_v52 = vld [vmem:[#allocation2 + $0x3c] sm:$0xe]  ;;  %v4158_v8 = vpack.c.bf16 %v599_v63, %v599_v63  ;;  %v712_v44 = vsel %vm4896_vm5, 0, %v711_v17  ;;  %v2392_v55 = vrot.slane %v4036_v60, 1  ;;  %v2393_v2 = vrot.slane %v5693_v5, 1 }
 0x1ae   : > { %2521 = vrot.lane.b32.xlu0 %v5669_v12, %s4669_s21  ;;  %v5719_v18 = vld [vmem:[#allocation2 + $0x44] ss:$0 sps:$4 sm:$0x11]   ;;  %v602_v21 = vmax.f32 %v568_v43, 0.0  ;;  %713 = vst [vmem:[#allocation2 + $0xc8] sm:$0x1] %v712_v44 }
 0x1af   : > { %v5697_v22 = vpop.permute.xlu0 %2017  ;;  %v5727_v26 = vld [vmem:[#allocation2 + $0x40] sm:$0xf]  ;;  %v5729_v7 = vrot.slane %v1068_v13, 7  ;;  %v1051_v27 = vshrl.u32 %v4158_v8, 16  ;;  %v1054_v34 = vshll.u32 %v4158_v8, 16  ;;  %v709_v60 = vsel %vm4896_vm5, 0, %v708_v40 }
 0x1b0   : > { %v5695_v48 = vpop.permute.xlu1 %2403  ;;  %6714 = vst [vmem:[#allocation9_spill] sm:$0xff] %v5697_v22  ;;  %v1239_v1 = vld [vmem:[#allocation2 + $0xc0] sm:$0xf]  ;;  %v4161_v3 = vpack.c.bf16 %v602_v21, %v602_v21  ;;  %v600_v63 = vmax.f32 %v560_v31, 0.0  ;;  %710 = vst [vmem:[#allocation2 + $0xbc] sm:$0x1] %v709_v60  ;;  %v3980_v14 = vcombine.low %v1299_v52, %v5727_v26  ;;  %v5748_v8 = vcombine.low %v1318_v58, %v5714_v6 }
 0x1b1   : > { %2519 = vrot.lane.b32.xlu1 %v5691_v46, %s4669_s21  ;;  %v1334_v43 = vld [vmem:[#allocation2 + $0x9c] sm:$0xf]  ;;  %v5742_v40 = vld [vmem:[#allocation2 + $0xa0] sm:$0xf]  ;;  %v1073_v20 = vor.u32 %v1071_v15, %v5729_v7  ;;  %v1053_v51 = vrot.slane %v1051_v27, 7  ;;  %v2394_v9 = vsel %vm1840_vm7, %v2392_v55, %v2393_v2  ;;  %v1857_v39 = vrot.slane %v5719_v18, 1 }
 0x1b2   : > { %2293 = vrot.lane.b32.xlu0 %v2212_v28, %s4673_s18  ;;  %v2370_v28 = vsel %vm1840_vm7, %v2368_v25, %v2369_v45  ;;  %v5744_v13 = vld [vmem:[#allocation2 + $0x50] ss:$0 sps:$4 sm:$0x11]   ;;  %v1307_v44 = vld [vmem:[#allocation2 + $0x9c] sm:$0xe]  ;;  %v1076_v25 = vshrl.u32 %v4161_v3, 16  ;;  %v4159_v60 = vpack.c.bf16 %v600_v63, %v600_v63  ;;  %v5765_v2 = vcombine.low %v1334_v43, %v5742_v40 }
 0x1b3   : > { %v5725_v61 = vpop.permute.xlu0 %2913  ;;  %v1258_v21 = vld [vmem:[#allocation2 + $0x48] sm:$0xf]  ;;  %v1232_v31 = vld [vmem:[#allocation2 + $0xb4] sm:$0xf]  ;;  %v1079_v45 = vshll.u32 %v4161_v3, 16  ;;  %v1240_v58 = vsel %vm4981_vm10, %v1073_v20, %v1239_v1  ;;  %v1056_v27 = vor.u32 %v1054_v34, %v1053_v51  ;;  %v1074_v3 = vrot.slane %v5729_v7, 4 }
 0x1b4   : > { %v5723_v29 = vpop.permute.xlu1 %2419  ;;  %v5756_v22 = vld [vmem:[#allocation2 + $0xa0] sm:$0xf]  ;;  %v1259_v15 = vld [vmem:[#allocation2 + $0x4c] sm:$0xf]  ;;  %1241 = vst [vmem:[#allocation2 + $0xc0] sm:$0xf] %v1240_v58 }
 0x1b5   : > { %6715 = vst [vmem:[#allocation16_spill] sm:$0xff] %v5723_v29  ;;  %2535 = vrot.lane.b32.xlu1 %v5700_v59, %s4669_s21  ;;  %v1078_v63 = vrot.slane %v1076_v25, 7  ;;  %v1062_v29 = vshll.u32 %v4159_v60, 16  ;;  %v1856_v55 = vrot.slane %v3980_v14, 1  ;;  %v3988_v34 = vcombine.low %v1307_v44, %v5756_v22 }
 0x1b6   : > { %2537 = vrot.lane.b32.xlu0 %v5709_v24, %s4669_s21  ;;  %v1233_v1 = vsel %vm4981_vm10, %v1056_v27, %v1232_v31  ;;  %v1057_v7 = vrot.slane %v1053_v51, 4  ;;  %v2877_v14 = vrot.slane %v4075_v41, 1  ;;  %v2878_v43 = vrot.slane %v5744_v13, 1  ;;  %v1426_v27 = vld [vmem:[#allocation2 + $0x3c] sm:$0xe] }
 0x1b7   : > { %v5750_v17 = vpop.permute.xlu0 %1893  ;;  %1234 = vst [vmem:[#allocation2 + $0xb4] sm:$0xf] %v1233_v1  ;;  %v1081_v20 = vor.u32 %v1079_v45, %v1078_v63  ;;  %v1083_v25 = vrot.slane %v1078_v63, 4  ;;  %v5777_v11 = vcombine.low %v1258_v21, %v1259_v15  ;;  %v3981_v57 = vcombine.low %v1300_v30, %v1259_v15  ;;  %v1236_v44 = vld [vmem:[#allocation2 + $0xbc] sm:$0x1] }
 0x1b8   : > { %6716 = vst [vmem:[#allocation19_spill] sm:$0xff] %v5750_v17  ;;  %v5752_v52 = vpop.permute.xlu1 %1891  ;;  %v1059_v17 = vshrl.u32 %v4159_v60, 16  ;;  %v1880_v41 = vrot.slane %v3988_v34, 1  ;;  %v1881_v21 = vrot.slane %v5767_v36, 1  ;;  %v2142_v30 = vshrl.u32 %v5578_v56, 16 }
 0x1b9   : > { %2411 = vrot.lane.b32.xlu1 %v2370_v28, %s4671_s8  ;;  %v1243_v28 = vld [vmem:[#allocation2 + $0xc8] sm:$0x1]  ;;  %6718 = vst [vmem:[#allocation21_spill] sm:$0xff] %v5777_v11  ;;  %v1082_v51 = vsel %vm5014_vm11, %v1074_v3, %v1081_v20  ;;  %v1858_v63 = vsel %vm1840_vm7, %v1856_v55, %v1857_v39  ;;  %v2149_v34 = vshll.u32 %v5671_v38, 16  ;;  %v2879_v49 = vsel %vm1840_vm7, %v2877_v14, %v2878_v43  ;;  %v1362_v38 = vld [vmem:[#allocation2 + $0x3c] sm:$0xe] }
 0x1ba   : > { %2009 = vrot.lane.b32.xlu0 %v5748_v8, %s4670_s9  ;;  %v1061_v60 = vrot.slane %v1059_v17, 7  ;;  %v1244_v17 = vsel %vm4886_vm3, %v1083_v25, %v1243_v28  ;;  %1242 = vst.msk [vmem:[#allocation2 + $0xc4] sm:$0xf] %vm603_vm6, %v1082_v51  ;;  %v1643_v28 = vshll.u32 %v5777_v11, 16  ;;  %v1859_v39 = vrot.slane %v3981_v57, 1 }
 0x1bb   : > { %v5772_v58 = vpop.permute.xlu0 %2929  ;;  %1245 = vst [vmem:[#allocation2 + $0xc8] sm:$0x1] %v1244_v17  ;;  %v5800_v20 = vld [vmem:[#allocation2 + $0x44] ss:$0 sps:$4 sm:$0x11]   ;;  %v1860_v55 = vrot.slane %v4483_v37, 1  ;;  %v4027_v57 = vcombine.low %v1362_v38, %v5714_v6 }
 0x1bc   : > { %6717 = vst [vmem:[#allocation20_spill] sm:$0xff] %v5772_v58  ;;  %v5774_v32 = vpop.permute.xlu1 %1907  ;;  %v1064_v31 = vor.u32 %v1062_v29, %v1061_v60  ;;  %v1066_v45 = vrot.slane %v1061_v60, 4  ;;  %v1256_v25 = vld [vmem:[#allocation2 + $0x3c] sm:$0xf]  ;;  %v1882_v60 = vsel %vm1840_vm7, %v1880_v41, %v1881_v21  ;;  %v2632_v41 = vshll.u32 %v5691_v46, 16 }
 0x1bd   : > { %2427 = vrot.lane.b32.xlu1 %v2394_v9, %s4671_s8  ;;  %v6719_v9 = vshll.u32 %v5578_v56, 16  ;;  %v4074_v56 = vcombine.low %v1426_v27, %v5659_v19  ;;  %v1434_v51 = vld [vmem:[#allocation2 + $0x9c] sm:$0xe]  ;;  %v2151_v19 = vrot.slane %v2149_v34, 1  ;;  %v1648_v27 = vshll.u32 %v4483_v37, 16 }
 0x1be   : > { %2025 = vrot.lane.b32.xlu0 %v5765_v2, %s4670_s9  ;;  %v1065_v3 = vsel %vm5014_vm11, %v1057_v7, %v1064_v31  ;;  %v1237_v29 = vsel %vm4886_vm3, %v1066_v45, %v1236_v44  ;;  %v2240_v7 = vshll.u32 %v5657_v42, 16  ;;  %v1641_v31 = vshrl.u32 %v5777_v11, 16 }
 0x1bf   : > { %v2146_v15 = vrot.slane %v6719_v9, 1  ;;  %1235 = vst.msk [vmem:[#allocation2 + $0xb8] sm:$0xf] %vm603_vm6, %v1065_v3  ;;  %1238 = vst [vmem:[#allocation2 + $0xbc] sm:$0x1] %v1237_v29  ;;  %v1645_v45 = vrot.slane %v1643_v28, 1  ;;  %v1861_v14 = vsel %vm1840_vm7, %v1859_v39, %v1860_v55  ;;  %v5825_v6 = vcombine.low %v1256_v25, %v5727_v26 }
 0x1c0   : > { %v5796_v1 = vpop.permute.xlu0 %1909  ;;  %v2874_v43 = vrot.slane %v4074_v56, 1  ;;  %v2875_v9 = vrot.slane %v5800_v20, 1  ;;  %v5818_v3 = vld [vmem:[#allocation2 + $0x44] ss:$0 sps:$4 sm:$0x11]   ;;  %v2238_v21 = vshrl.u32 %v5657_v42, 16 }
 0x1c1   : > { %1899 = vrot.lane.b32.xlu1 %v1858_v63, %s4667_s12  ;;  %v5805_v10 = vpop.permute.xlu1 %2275  ;;  %v2147_v44 = vor.u32 %v2146_v15, %v2142_v30  ;;  %v2242_v30 = vrot.slane %v2240_v7, 1  ;;  %v2245_v37 = vshll.u32 %v5693_v5, 16  ;;  %6720 = vst [vmem:[#allocation22_spill] sm:$0xff] %v5825_v6  ;;  %v1646_v34 = vor.u32 %v1645_v45, %v1641_v31  ;;  %v5832_v56 = vld [vmem:[#allocation2 + $0xa4] ss:$0 sps:$4 sm:$0x11]  }
 0x1c2   : > { %2921 = vrot.lane.b32.xlu0 %v2879_v49, %s4672_s11  ;;  %v1650_v28 = vrot.slane %v1648_v27, 1  ;;  %v4082_v49 = vcombine.low %v1434_v51, %v5677_v47  ;;  %v1370_v39 = vld [vmem:[#allocation2 + $0x9c] sm:$0xe]  ;;  %v2876_v42 = vsel %vm1840_vm7, %v2874_v43, %v2875_v9  ;;  %v2365_v5 = vrot.slane %v4027_v57, 1 }
 0x1c3   : > { %v2152_v29 = vsel %vm1567_vm8, %v2147_v44, %v2151_v19  ;;  %v2366_v26 = vrot.slane %v5818_v3, 1  ;;  %v2243_v55 = vor.u32 %v2242_v30, %v2238_v21  ;;  %v2247_v7 = vrot.slane %v2245_v37, 1  ;;  %v5849_v27 = vld [vmem:[#allocation2 + $0xa4] ss:$0 sps:$4 sm:$0x11]  }
 0x1c4   : > { %v5811_v17 = vpop.permute.xlu0 %2401  ;;  %v2630_v38 = vshrl.u32 %v5691_v46, 16  ;;  %v2634_v25 = vrot.slane %v2632_v41, 1  ;;  %v2637_v44 = vshll.u32 %v5800_v20, 16  ;;  %v1631_v47 = vshll.u32 %v5825_v6, 16 }
 0x1c5   : > { %1915 = vrot.lane.b32.xlu1 %v1882_v60, %s4667_s12  ;;  %v2644_v51 = vshll.u32 %v5669_v12, 16  ;;  %v4035_v19 = vcombine.low %v1370_v39, %v5742_v40  ;;  %v1651_v31 = vsel %vm1567_vm8, %v1646_v34, %v1650_v28  ;;  %v2367_v46 = vsel %vm1840_vm7, %v2365_v5, %v2366_v26 }
 0x1c6   : > { %1901 = vrot.lane.b32.xlu0 %v1861_v14, %s4667_s12  ;;  %v2898_v57 = vrot.slane %v4082_v49, 1  ;;  %v2899_v14 = vrot.slane %v5832_v56, 1  ;;  %v2740_v20 = vshll.u32 %v5709_v24, 16  ;;  %v2248_v43 = vsel %vm1567_vm8, %v2243_v55, %v2247_v7  ;;  %v5868_v55 = vld [vmem:[#allocation2 + $0xb0] ss:$0 sps:$4 sm:$0x11]  }
 0x1c7   : > { %v5827_v15 = vpop.permute.xlu1 %1764  ;;  %v2635_v40 = vor.u32 %v2634_v25, %v2630_v38  ;;  %v2639_v41 = vrot.slane %v2637_v44, 1  ;;  %v1629_v21 = vshrl.u32 %v5825_v6, 16  ;;  %v1633_v30 = vrot.slane %v1631_v47, 1  ;;  %v6021_v6 = vld [vmem:[#allocation2 + $0xac] sm:$0xf] }
 0x1c8   : > { %v5830_v63 = vpop.permute.xlu0 %2927  ;;  %v1636_v37 = vshll.u32 %v5719_v18, 16  ;;  %v2389_v28 = vrot.slane %v4035_v19, 1  ;;  %v2390_v49 = vrot.slane %v5849_v27, 1  ;;  %v2642_v39 = vshrl.u32 %v5669_v12, 16 }
 0x1c9   : > { %6721 = vst [vmem:[#allocation23_spill] sm:$0xff] %v5830_v63  ;;  %2283 = vrot.lane.b32.xlu1 %v2152_v29, %s4673_s18  ;;  %v1272_v29 = vld [vmem:[#allocation2 + $0x9c] sm:$0xf]  ;;  %v2900_v5 = vsel %vm1840_vm7, %v2898_v57, %v2899_v14  ;;  %v2649_v26 = vshll.u32 %v5744_v13, 16  ;;  %v2728_v18 = vshll.u32 %v5700_v59, 16  ;;  %v2132_v7 = vshll.u32 %v5748_v8, 16 }
 0x1ca   : > { %2919 = vrot.lane.b32.xlu0 %v2876_v42, %s4672_s11  ;;  %v2646_v42 = vrot.slane %v2644_v51, 1  ;;  %v1634_v25 = vor.u32 %v1633_v30, %v1629_v21  ;;  %v1638_v12 = vrot.slane %v1636_v37, 1  ;;  %v5876_v44 = vcombine.low %v1272_v29, %v5756_v22 }
 0x1cb   : > { %v5840_v60 = vpop.permute.xlu1 %2291  ;;  %v2640_v47 = vsel %vm1567_vm8, %v2635_v40, %v2639_v41  ;;  %v2391_v13 = vsel %vm1840_vm7, %v2389_v28, %v2390_v49  ;;  %v2742_v57 = vrot.slane %v2740_v20, 1  ;;  %v2745_v14 = vshll.u32 %v5868_v55, 16  ;;  %v1324_v40 = vld [vmem:[#allocation2 + $0x60] sm:$0xf]  ;;  %v5889_v41 = vld [vmem:[#allocation2 + $0x64] sm:$0xf] }
 0x1cc   : > { %v5847_v45 = vpop.permute.xlu0 %2417  ;;  %6723 = vst [vmem:[#allocation25_spill] sm:$0xff] %v5876_v44  ;;  %v2647_v19 = vor.u32 %v2646_v42, %v2642_v39  ;;  %v1639_v30 = vsel %vm1567_vm8, %v1634_v25, %v1638_v12  ;;  %v2730_v20 = vrot.slane %v2728_v18, 1  ;;  %v2733_v37 = vshll.u32 %v5832_v56, 16 }
 0x1cd   : > { %6722 = vst [vmem:[#allocation24_spill] sm:$0xff] %v5847_v45  ;;  %1772 = vrot.lane.b32.xlu1 %v1651_v31, %s4668_s23  ;;  %v2651_v31 = vrot.slane %v2649_v26, 1  ;;  %v2130_v28 = vshrl.u32 %v5748_v8, 16  ;;  %v2134_v49 = vrot.slane %v2132_v7, 1  ;;  %v2137_v39 = vshll.u32 %v5818_v3, 16 }
 0x1ce   : > { %2409 = vrot.lane.b32.xlu0 %v2367_v46, %s4671_s8  ;;  %v2738_v46 = vshrl.u32 %v5709_v24, 16  ;;  %v2726_v24 = vshrl.u32 %v5700_v59, 16  ;;  %v2747_v26 = vrot.slane %v2745_v14, 1  ;;  %v5908_v18 = vcombine.low %v1324_v40, %v5889_v41  ;;  %v4508_v45 = vld [vmem:[#allocation2 + $0x5c] ss:$0 sps:$4 sm:$0x11]  }
 0x1cf   : > { %v5857_v9 = vpop.permute.xlu1 %1780  ;;  %v1725_v7 = vshrl.u32 %v5876_v44, 16  ;;  %vm3175_vm3 = vcmask 261120   ;;  %vm3268_vm5 = vcmask 1041408  }
 0x1d0   : > { %v5861_v34 = vpop.permute.xlu0 %2785  ;;  %v2743_v59 = vor.u32 %v2742_v57, %v2738_v46  ;;  %v2731_v3 = vor.u32 %v2730_v20, %v2726_v24  ;;  %v1387_v20 = vld [vmem:[#allocation2 + $0x60] sm:$0xf] }
 0x1d1   : > { %2299 = vrot.lane.b32.xlu1 %v2248_v43, %s4673_s18  ;;  %v6725_v43 = vld [vmem:[#allocation10_spill] sm:$0xff] }
 0x1d2   : > { %2935 = vrot.lane.b32.xlu0 %v2900_v5, %s4672_s11  ;;  %v2947_v22 = vsel %vm2945_vm12, %v6725_v43, %v5605_v4  ;;  %v1727_v4 = vshll.u32 %v5876_v44, 16  ;;  %v2652_v5 = vsel %vm1567_vm8, %v2647_v19, %v2651_v31  ;;  %v2139_v19 = vrot.slane %v2137_v39, 1 }
 0x1d3   : > { %v5873_v38 = vpop.permute.xlu1 %2007  ;;  %v2980_v42 = vsel %vm2978_vm13, %v2947_v22, %v5603_v16  ;;  %v2735_v16 = vrot.slane %v2733_v37, 1  ;;  %v2748_v46 = vsel %vm1567_vm8, %v2743_v59, %v2747_v26  ;;  %v1385_v59 = vld [vmem:[#allocation2 + $0x54] sm:$0xf] }
 0x1d4   : > { %v5879_v51 = vpop.permute.xlu0 %2801  ;;  %v3013_v56 = vsel %vm3011_vm14, %v2980_v42, %v5666_v23  ;;  %v1729_v12 = vrot.slane %v1727_v4, 1  ;;  %v2228_v23 = vshll.u32 %v5765_v2, 16  ;;  %v1388_v4 = vld [vmem:[#allocation2 + $0x64] sm:$0xf]  ;;  %v1365_v42 = vld [vmem:[#allocation2 + $0x60] sm:$0xe] }
 0x1d5   : > { %6724 = vst [vmem:[#allocation26_spill] sm:$0xff] %v5879_v51  ;;  %2791 = vrot.lane.b32.xlu1 %v2640_v47, %s4674_s20  ;;  %v1732_v47 = vshll.u32 %v5767_v36, 16  ;;  %v2736_v43 = vsel %vm1567_vm8, %v2731_v3, %v2735_v16  ;;  %v5950_v26 = vcombine.low %v1387_v20, %v1388_v4  ;;  %v1429_v3 = vld [vmem:[#allocation2 + $0x60] sm:$0xe] }
 0x1d6   : > { %2425 = vrot.lane.b32.xlu0 %v2391_v13, %s4671_s8  ;;  %v2135_v13 = vor.u32 %v2134_v49, %v2130_v28  ;;  %v1730_v40 = vor.u32 %v1729_v12, %v1725_v7  ;;  %v2230_v28 = vrot.slane %v2228_v23, 1  ;;  %v2233_v49 = vshll.u32 %v5849_v27, 16  ;;  %v5955_v16 = vld [vmem:[#allocation2 + $0x68] ss:$0 sps:$4 sm:$0x11]  }
 0x1d7   : > { %v5891_v21 = vpop.permute.xlu1 %2799  ;;  %v1301_v23 = vld [vmem:[#allocation2 + $0x54] sm:$0xe] }
 0x1d8   : > { %6726 = vst [vmem:[#allocation10_spill] sm:$0xff] %v5891_v21  ;;  %v5896_v29 = vpop.permute.xlu0 %1762  ;;  %v2140_v24 = vsel %vm1567_vm8, %v2135_v13, %v2139_v19  ;;  %v1322_v13 = vld [vmem:[#allocation2 + $0x54] sm:$0xf]  ;;  %v5965_v19 = vld [vmem:[#allocation2 + $0x58] sm:$0xf]  ;;  %v2173_v21 = vshll.u32 %v5955_v16, 16 }
 0x1d9   : > { %1770 = vrot.lane.b32.xlu1 %v1639_v30, %s4668_s23  ;;  %v1734_v30 = vrot.slane %v1732_v47, 1 }
 0x1da   : > { %2793 = vrot.lane.b32.xlu0 %v2652_v5, %s4674_s20 }
 0x1db   : > { %v5911_v8 = vpop.permute.xlu1 %1778  ;;  %v1735_v5 = vsel %vm1567_vm8, %v1730_v40, %v1734_v30  ;;  %v5974_v40 = vld [vmem:[#allocation2 + $0x68] ss:$0 sps:$4 sm:$0x11]   ;;  %v1263_v30 = vld [vmem:[#allocation2 + $0x64] sm:$0xf] }
 0x1dc   : > { %v2274_v25 = vpop.permute.xlu0 %2273 }
 0x1dd   : > { %2015 = vrot.lane.b32.xlu1 %v5908_v18, %s4670_s9  ;;  %v3045_v31 = vsel %vm361_vm0, %v3013_v56, %v2274_v25  ;;  %v2235_v56 = vrot.slane %v2233_v49, 1  ;;  %v4030_v25 = vcombine.low %v1365_v42, %v5889_v41  ;;  %v4077_v41 = vcombine.low %v1429_v3, %v1388_v4  ;;  %v1261_v49 = vld [vmem:[#allocation2 + $0x58] sm:$0xf]  ;;  %v5989_v42 = vld [vmem:[#allocation2 + $0x5c] ss:$0 sps:$4 sm:$0x11]  }
 0x1de   : > { %v3078_v57 = vsel %vm3076_vm15, %v3045_v31, %v5811_v17  ;;  %2809 = vrot.lane.b32.xlu0 %v2748_v46, %s4674_s20  ;;  %v1401_v46 = vld [vmem:[#allocation2 + $0xb4] sm:$0xf]  ;;  %v4506_v3 = vld [vmem:[#allocation2 + $0x68] ss:$0 sps:$4 sm:$0x11]   ;;  %v1863_v63 = vrot.slane %v5989_v42, 1 }
 0x1df   : > { %v5923_v14 = vpop.permute.xlu1 %2023  ;;  %v3111_v36 = vsel %vm3109_vm1, %v3078_v57, %v5618_v53  ;;  %v2226_v53 = vshrl.u32 %v5765_v2, 16  ;;  %v5948_v2 = vld [vmem:[#allocation2 + $0x58] sm:$0xf]  ;;  %v1866_v51 = vrot.slane %v4506_v3, 1 }
 0x1e0   : > { %v5928_v22 = vpop.permute.xlu0 %2517  ;;  %v3144_v17 = vsel %vm3142_vm2, %v3111_v36, %v5861_v34  ;;  %v4514_v34 = vld [vmem:[%s6658_s3 + $0x10] ss:$0 sps:$4 sm:$0x33]   ;;  %v5963_v47 = vcombine.low %v1385_v59, %v5948_v2  ;;  %v5969_v57 = vld [vmem:[#allocation2 + $0xb8] sm:$0xf] }
 0x1e1   : > { %2807 = vrot.lane.b32.xlu1 %v2736_v43, %s4674_s20  ;;  %v3177_v37 = vsel %vm3175_vm3, %v3144_v17, %v5725_v61  ;;  %v2231_v27 = vor.u32 %v2230_v28, %v2226_v53  ;;  %4324 = vmatprep.subr.msk.bf16.mxu1 %vm3268_vm5, %v4514_v34  ;;  %v3270_v7 = vsel %vm3268_vm5, %v4514_v34, 0  ;;  %v1262_v36 = vld [vmem:[#allocation2 + $0x60] sm:$0xf]  ;;  %v2168_v17 = vshll.u32 %v5908_v18, 16 }
 0x1e2   : > { %2281 = vrot.lane.b32.xlu0 %v2140_v24, %s4673_s18  ;;  %4256 = vmatprep.mubr.msk.bf16.mxu1 %vm3235_vm4, %v3177_v37  ;;  %v1302_v24 = vld [vmem:[#allocation2 + $0x60] sm:$0xe]  ;;  %v5981_v37 = vcombine.low %v1401_v46, %v5969_v57  ;;  %v2374_v53 = vrot.slane %v4030_v25, 1  ;;  %v2375_v28 = vrot.slane %v5955_v16, 1  ;;  %v5987_v34 = vcombine.low %v1322_v13, %v5965_v19  ;;  %v1428_v25 = vld [vmem:[#allocation2 + $0x54] sm:$0xe] }
 0x1e3   : > { %v5943_v39 = vpop.permute.xlu1 %2515  ;;  %4255 = vmatpush3.bf16.msra.mxu1 %v3270_v7  ;;  %v2236_v43 = vsel %vm1567_vm8, %v2231_v27, %v2235_v56  ;;  %v5991_v59 = vcombine.low %v1262_v36, %v1263_v30  ;;  %v2883_v27 = vrot.slane %v4077_v41, 1  ;;  %v2884_v56 = vrot.slane %v5974_v40, 1  ;;  %v1260_v41 = vld [vmem:[#allocation2 + $0x54] sm:$0xf] }
 0x1e4   : > { %v5946_v61 = vpop.permute.xlu0 %2289  ;;  %v3983_v7 = vcombine.low %v1302_v24, %v1263_v30  ;;  %v2166_v13 = vshrl.u32 %v5908_v18, 16  ;;  %v2170_v46 = vrot.slane %v2168_v17, 1  ;;  %v4076_v24 = vcombine.low %v1428_v25, %v5948_v2  ;;  %v1274_v25 = vld [vmem:[#allocation2 + $0xa8] sm:$0xf] }
 0x1e5   : > { %6727 = vst [vmem:[#allocation27_spill] sm:$0xff] %v5946_v61  ;;  %1786 = vrot.lane.b32.xlu1 %v1735_v5, %s4668_s23  ;;  %v3982_v5 = vcombine.low %v1301_v23, %v1261_v49  ;;  %6729 = vst [vmem:[#allocation29_spill] sm:$0xff] %v5991_v59  ;;  %v2376_v23 = vsel %vm1840_vm7, %v2374_v53, %v2375_v28  ;;  %v1667_v30 = vshll.u32 %v5991_v59, 16  ;;  %v2656_v53 = vshll.u32 %v5963_v47, 16  ;;  %v1364_v28 = vld [vmem:[#allocation2 + $0x54] sm:$0xe] }
 0x1e6   : > { %2525 = vrot.lane.b32.xlu0 %v5950_v26, %s4669_s21  ;;  %v2885_v18 = vsel %vm1840_vm7, %v2883_v27, %v2884_v56  ;;  %v1865_v17 = vrot.slane %v3983_v7, 1  ;;  %v6015_v16 = vcombine.low %v1260_v41, %v1261_v49  ;;  %v2171_v11 = vor.u32 %v2170_v46, %v2166_v13 }
 0x1e7   : > { %v5960_v12 = vpop.permute.xlu1 %2531  ;;  %v1862_v58 = vrot.slane %v3982_v5, 1  ;;  %v2668_v5 = vshll.u32 %v5950_v26, 16  ;;  %v1672_v2 = vshll.u32 %v4506_v3, 16  ;;  %v2175_v56 = vrot.slane %v2173_v21, 1 }
 0x1e8   : > { %v5967_v31 = vpop.permute.xlu0 %2533  ;;  %v1665_v7 = vshrl.u32 %v5991_v59, 16  ;;  %v1669_v44 = vrot.slane %v1667_v30, 1  ;;  %v1867_v49 = vsel %vm1840_vm7, %v1865_v17, %v1866_v51  ;;  %v2881_v13 = vrot.slane %v4508_v45, 1  ;;  %v4509_v3 = vld [vmem:[#allocation2 + $0x5c] ss:$0 sps:$4 sm:$0x11]  }
 0x1e9   : > { %6728 = vst [vmem:[#allocation28_spill] sm:$0xff] %v5967_v31  ;;  %2523 = vrot.lane.b32.xlu1 %v5963_v47, %s4669_s21  ;;  %v4029_v31 = vcombine.low %v1364_v28, %v5965_v19  ;;  %v2654_v46 = vshrl.u32 %v5963_v47, 16  ;;  %v2658_v21 = vrot.slane %v2656_v53, 1  ;;  %v2670_v41 = vrot.slane %v2668_v5, 1  ;;  %v1435_v59 = vld [vmem:[#allocation2 + $0xa8] sm:$0xe] }
 0x1ea   : > { %2297 = vrot.lane.b32.xlu0 %v2236_v43, %s4673_s18  ;;  %v2661_v19 = vshll.u32 %v4508_v45, 16  ;;  %v2176_v28 = vsel %vm1567_vm8, %v2171_v11, %v2175_v56  ;;  %v1670_v51 = vor.u32 %v1669_v44, %v1665_v7  ;;  %v1655_v17 = vshll.u32 %v6015_v16, 16  ;;  %v6048_v7 = vld [vmem:[#allocation2 + $0xb0] ss:$0 sps:$4 sm:$0x11]  }
 0x1eb   : > { %v5978_v20 = vpop.permute.xlu1 %2407  ;;  %v6035_v47 = vcombine.low %v1274_v25, %v6021_v6  ;;  %v2372_v53 = vrot.slane %v4509_v3, 1  ;;  %v2673_v5 = vshll.u32 %v5974_v40, 16  ;;  %v2154_v45 = vshrl.u32 %v5987_v34, 16 }
 0x1ec   : > { %v5984_v4 = vpop.permute.xlu0 %2005  ;;  %v2949_v11 = vsel %vm2945_vm12, %v5284_v33, %v5896_v29  ;;  %v2663_v25 = vrot.slane %v2661_v19, 1  ;;  %v1660_v56 = vshll.u32 %v5989_v42, 16  ;;  %v4083_v42 = vcombine.low %v1435_v59, %v5683_v62  ;;  %v1309_v59 = vld [vmem:[#allocation2 + $0xb4] sm:$0xe] }
 0x1ed   : > { %2539 = vrot.lane.b32.xlu1 %v5981_v37, %s4669_s21 }
 0x1ee   : > { %2013 = vrot.lane.b32.xlu0 %v5987_v34, %s4670_s9 }
 0x1ef   : > { %v5999_v43 = vpop.permute.xlu1 %2423 }
 0x1f0   : > { %v6002_v36 = vpop.permute.xlu0 %2021 }
 0x1f1   : > { %2415 = vrot.lane.b32.xlu1 %v2376_v23, %s4671_s8  ;;  %v1864_v23 = vsel %vm1840_vm7, %v1862_v58, %v1863_v63  ;;  %v2666_v58 = vshrl.u32 %v5950_v26, 16  ;;  %v2156_v63 = vshll.u32 %v5987_v34, 16  ;;  %v2371_v26 = vrot.slane %v4029_v31, 1 }
 0x1f2   : > { %2925 = vrot.lane.b32.xlu0 %v2885_v18, %s4672_s11  ;;  %v2880_v18 = vrot.slane %v4076_v24, 1  ;;  %v1674_v24 = vrot.slane %v1672_v2, 1  ;;  %v2659_v31 = vor.u32 %v2658_v21, %v2654_v46  ;;  %v1653_v34 = vshrl.u32 %v6015_v16, 16 }
 0x1f3   : > { %v6013_v61 = vpop.permute.xlu1 %1895  ;;  %v2158_v2 = vrot.slane %v2156_v63, 1  ;;  %v1739_v63 = vshll.u32 %v6035_v47, 16  ;;  %v2373_v33 = vsel %vm1840_vm7, %v2371_v26, %v2372_v53  ;;  %v2671_v29 = vor.u32 %v2670_v41, %v2666_v58 }
 0x1f4   : > { %v6018_v27 = vpop.permute.xlu0 %2917  ;;  %v1675_v40 = vsel %vm1567_vm8, %v1670_v51, %v1674_v24  ;;  %v2675_v46 = vrot.slane %v2673_v5, 1  ;;  %v2161_v21 = vshll.u32 %v4509_v3, 16  ;;  %v2982_v24 = vsel %vm2978_vm13, %v2949_v11, %v5752_v52  ;;  %v1340_v11 = vld [vmem:[#allocation2 + $0xc0] sm:$0xf] }
 0x1f5   : > { %1903 = vrot.lane.b32.xlu1 %v1864_v23, %s4667_s12  ;;  %v1662_v51 = vrot.slane %v1660_v56, 1  ;;  %v1737_v3 = vshrl.u32 %v6035_v47, 16  ;;  %v1741_v62 = vrot.slane %v1739_v63, 1  ;;  %v2159_v53 = vor.u32 %v2158_v2, %v2154_v45  ;;  %v6081_v45 = vld [vmem:[#allocation2 + $0xbc] ss:$0 sps:$4 sm:$0x11]  }
 0x1f6   : > { %1905 = vrot.lane.b32.xlu0 %v1867_v49, %s4667_s12  ;;  %v2882_v49 = vsel %vm1840_vm7, %v2880_v18, %v2881_v13  ;;  %v1657_v13 = vrot.slane %v1655_v17, 1  ;;  %v1744_v17 = vshll.u32 %v6048_v7, 16  ;;  %v2676_v52 = vsel %vm1567_vm8, %v2671_v29, %v2675_v46 }
 0x1f7   : > { %v6030_v30 = vpop.permute.xlu1 %1911  ;;  %v2163_v5 = vrot.slane %v2161_v21, 1  ;;  %v2901_v46 = vrot.slane %v4083_v42, 1  ;;  %v6089_v21 = vld [vmem:[#allocation2 + $0xbc] ss:$0 sps:$4 sm:$0x11]  }
 0x1f8   : > { %v1898_v23 = vpop.permute.xlu0 %1897  ;;  %v1658_v41 = vor.u32 %v1657_v13, %v1653_v34  ;;  %v1746_v34 = vrot.slane %v1744_v17, 1  ;;  %v6079_v13 = vld [vmem:[#allocation2 + $0xb8] sm:$0xf]  ;;  %v1887_v17 = vrot.slane %v6081_v45, 1 }
 0x1f9   : > { %2287 = vrot.lane.b32.xlu1 %v2176_v28, %s4673_s18  ;;  %v2664_v28 = vsel %vm1567_vm8, %v2659_v31, %v2663_v25  ;;  %v6068_v31 = vld [vmem:[#allocation2 + $0xc4] sm:$0xf] }
 0x1fa   : > { %2923 = vrot.lane.b32.xlu0 %v2882_v49, %s4672_s11  ;;  %v1436_v49 = vld [vmem:[#allocation2 + $0xb4] sm:$0xe]  ;;  %v1663_v2 = vsel %vm1567_vm8, %v1658_v41, %v1662_v51  ;;  %v4006_v29 = vcombine.low %v1340_v11, %v6068_v31 }
 0x1fb   : > { %v6045_v44 = vpop.permute.xlu1 %2279  ;;  %v4084_v56 = vcombine.low %v1436_v49, %v5969_v57  ;;  %v2902_v57 = vrot.slane %v5868_v55, 1  ;;  %v6098_v49 = vld [vmem:[#allocation2 + $0xc8] ss:$0 sps:$4 sm:$0x11]  }
 0x1fc   : > { %v6051_v18 = vpop.permute.xlu0 %2933  ;;  %v2269_v11 = vshll.u32 %v6098_v49, 16 }
 0x1fd   : > { %1776 = vrot.lane.b32.xlu1 %v1675_v40, %s4668_s23  ;;  %v2904_v51 = vrot.slane %v4084_v56, 1  ;;  %v2262_v56 = vshrl.u32 %v4006_v29, 16 }
 0x1fe   : > { %2413 = vrot.lane.b32.xlu0 %v2373_v33, %s4671_s8  ;;  %v1742_v33 = vor.u32 %v1741_v62, %v1737_v3  ;;  %v2264_v62 = vshll.u32 %v4006_v29, 16 }
 0x1ff   : > { %v1769_v19 = vpop.permute.xlu1 %1768 }
 0x200   : > { %v2955_v26 = vsel %vm2945_vm12, %v5474_v35, %v1769_v19  ;;  %v1914_v58 = vpop.permute.xlu0 %1913  ;;  %v3015_v35 = vsel %vm3011_vm14, %v2982_v24, %v5620_v54  ;;  %v2164_v54 = vsel %vm1567_vm8, %v2159_v53, %v2163_v5  ;;  %v1308_v24 = vld [vmem:[#allocation2 + $0xa8] sm:$0xe]  ;;  %v2965_v19 = vsel %vm2945_vm12, %v5292_v0, %v5911_v8 }
 0x201   : > { %2795 = vrot.lane.b32.xlu1 %v2664_v28, %s4674_s20  ;;  %v6071_v25 = vsel %vm2978_vm13, %v2955_v26, %v1898_v23  ;;  %v3990_v23 = vcombine.low %v1309_v59, %v6079_v13  ;;  %v3047_v28 = vsel %vm361_vm0, %v3015_v35, %v5805_v10  ;;  %v1747_v26 = vsel %vm1567_vm8, %v1742_v33, %v1746_v34 }
 0x202   : > { %2797 = vrot.lane.b32.xlu0 %v2676_v52, %s4674_s20  ;;  %v2903_v0 = vsel %vm1840_vm7, %v2901_v46, %v2902_v57  ;;  %v2905_v10 = vrot.slane %v6089_v21, 1  ;;  %v3989_v8 = vcombine.low %v1308_v24, %v6021_v6  ;;  %v2998_v52 = vsel %vm2978_vm13, %v2965_v19, %v5774_v32  ;;  %v1403_v46 = vld [vmem:[#allocation2 + $0xc0] sm:$0xf]  ;;  %v1276_v19 = vld [vmem:[#allocation2 + $0xb4] sm:$0xf] }
 0x203   : > { %v6077_v40 = vpop.permute.xlu1 %2295  ;;  %v1886_v3 = vrot.slane %v3990_v23, 1  ;;  %v2266_v34 = vrot.slane %v2264_v62, 1  ;;  %v1372_v23 = vld [vmem:[#allocation2 + $0xb4] sm:$0xe]  ;;  %v6730_v57 = vld [vmem:[#allocation14_spill] sm:$0xff] }
 0x204   : > { %v2916_v63 = vpop.permute.xlu0 %2915  ;;  %v2906_v32 = vsel %vm1840_vm7, %v2904_v51, %v2905_v10  ;;  %v1883_v33 = vrot.slane %v3989_v8, 1  ;;  %v3031_v24 = vsel %vm3011_vm14, %v2998_v52, %v6730_v57  ;;  %v6731_v51 = vld [vmem:[#allocation11_spill] sm:$0xff]  ;;  %v6139_v62 = vld [vmem:[#allocation2 + $0xbc] ss:$0 sps:$4 sm:$0x11]  }
 0x205   : > { %1774 = vrot.lane.b32.xlu1 %v1663_v2, %s4668_s23  ;;  %v1888_v6 = vsel %vm1840_vm7, %v1886_v3, %v1887_v17  ;;  %v1338_v3 = vld [vmem:[#allocation2 + $0xb4] sm:$0xf]  ;;  %v6732_v10 = vld [vmem:[#allocation13_spill] sm:$0xff] }
 0x206   : > { %2285 = vrot.lane.b32.xlu0 %v2164_v54, %s4673_s18  ;;  %v6130_v54 = vld [vmem:[#allocation2 + $0xc4] sm:$0xf]  ;;  %v2951_v8 = vsel %vm2945_vm12, %v6732_v10, %v5827_v15 }
 0x207   : > { %v1785_v42 = vpop.permute.xlu1 %1784  ;;  %v6149_v52 = vcombine.low %v1403_v46, %v6130_v54  ;;  %v6734_v46 = vld [vmem:[#allocation16_spill] sm:$0xff] }
 0x208   : > { %v2971_v55 = vsel %vm2945_vm12, %v5502_v50, %v1785_v42  ;;  %v6103_v41 = vpop.permute.xlu0 %2405  ;;  %v3080_v50 = vsel %vm3076_vm15, %v3047_v28, %v5695_v48  ;;  %v1373_v48 = vld [vmem:[#allocation2 + $0xc0] sm:$0xe]  ;;  %v1339_v42 = vld [vmem:[#allocation2 + $0xb8] sm:$0xf] }
 0x209   : > { %1788 = vrot.lane.b32.xlu1 %v1747_v26, %s4668_s23  ;;  %v6110_v59 = vsel %vm2978_vm13, %v2971_v55, %v1914_v58  ;;  %v3113_v53 = vsel %vm3109_vm1, %v3080_v50, %v5943_v39  ;;  %v1884_v39 = vrot.slane %v6048_v7, 1  ;;  %v4038_v28 = vcombine.low %v1373_v48, %v6068_v31 }
 0x20a   : > { %2937 = vrot.lane.b32.xlu0 %v2903_v0, %s4672_s11  ;;  %v2267_v55 = vor.u32 %v2266_v34, %v2262_v56  ;;  %v2271_v26 = vrot.slane %v2269_v11, 1  ;;  %v4037_v0 = vcombine.low %v1372_v23, %v1339_v42  ;;  %v6155_v11 = vcombine.low %v1276_v19, %v6079_v13  ;;  %v1405_v56 = vld [vmem:[#allocation2 + $0xcc] sm:$0xf]  ;;  %v6165_v34 = vld [vmem:[#allocation2 + $0xd0] sm:$0xf] }
 0x20b   : > { %v2788_v5 = vpop.permute.xlu1 %2787  ;;  %v1885_v31 = vsel %vm1840_vm7, %v1883_v33, %v1884_v39  ;;  %v2750_v33 = vshrl.u32 %v5981_v37, 16  ;;  %v2764_v39 = vshll.u32 %v6149_v52, 16  ;;  %v6735_v19 = vld [vmem:[#allocation19_spill] sm:$0xff] }
 0x20c   : > { %v3146_v35 = vsel %vm3142_vm2, %v3113_v53, %v2788_v5  ;;  %v6122_v58 = vpop.permute.xlu0 %2931  ;;  %v3063_v53 = vsel %vm361_vm0, %v3031_v24, %v5840_v60  ;;  %v2752_v5 = vshll.u32 %v5981_v37, 16  ;;  %v2272_v13 = vsel %vm1567_vm8, %v2267_v55, %v2271_v26 }
 0x20d   : > { %v3179_v2 = vsel %vm3175_vm3, %v3146_v35, %v2916_v63  ;;  %1919 = vrot.lane.b32.xlu1 %v1888_v6, %s4667_s12  ;;  %v2399_v35 = vrot.slane %v6098_v49, 1  ;;  %v6163_v6 = vcombine.low %v1338_v3, %v1339_v42  ;;  %v6177_v49 = vld [vmem:[#allocation2 + $0xc8] ss:$0 sps:$4 sm:$0x11]   ;;  %v3096_v57 = vsel %vm3076_vm15, %v3063_v53, %v6734_v46 }
 0x20e   : > { %4257 = vmatmul.mubr.msk.bf16.vlgmr.msra.gmra.mrb[16].mxu1 %vm3235_vm4, %v3179_v2  ;;  %2939 = vrot.lane.b32.xlu0 %v2906_v32, %s4672_s11  ;;  %v2396_v2 = vrot.slane %v6139_v62, 1  ;;  %v2754_v24 = vrot.slane %v2752_v5, 1  ;;  %v3129_v37 = vsel %vm3109_vm1, %v3096_v57, %v5960_v12  ;;  %v2757_v42 = vshll.u32 %v6089_v21, 16  ;;  %v6215_v53 = vld [vmem:[#allocation2 + $0xd4] ss:$0 sps:$4 sm:$0x11]  }
 0x20f   : > { %v1767_v63 = vpop.permute.xlu1 %1766  ;;  %v2769_v3 = vshll.u32 %v6177_v49, 16  ;;  %v2762_v12 = vshrl.u32 %v6149_v52, 16  ;;  %v2252_v10 = vshll.u32 %v6163_v6, 16 }
 0x210   : > { %v2953_v17 = vsel %vm2945_vm12, %v6731_v51, %v1767_v63  ;;  %v6137_v7 = vpop.permute.xlu0 %2421 }
 0x211   : > { %v2986_v50 = vsel %vm2978_vm13, %v2953_v17, %v6013_v61  ;;  %2031 = vrot.lane.b32.xlu1 %v4006_v29, %s4670_s9  ;;  %v2398_v29 = vrot.slane %v4038_v28, 1  ;;  %v4054_v28 = vcombine.low %v1405_v56, %v6165_v34  ;;  %v1756_v56 = vshll.u32 %v6081_v45, 16 }
 0x212   : > { %v3019_v15 = vsel %vm3011_vm14, %v2986_v50, %v5873_v38  ;;  %1917 = vrot.lane.b32.xlu0 %v1885_v31, %s4667_s12  ;;  %v2395_v38 = vrot.slane %v4037_v0, 1  ;;  %v2766_v0 = vrot.slane %v2764_v39, 1  ;;  %v2755_v50 = vor.u32 %v2754_v24, %v2750_v33 }
 0x213   : > { %v6160_v61 = vpop.permute.xlu1 %2011  ;;  %v3051_v60 = vsel %vm361_vm0, %v3019_v15, %v6045_v44  ;;  %v6733_v44 = vld [vmem:[#allocation17_spill] sm:$0xff]  ;;  %v2400_v17 = vsel %vm1840_vm7, %v2398_v29, %v2399_v35  ;;  %v1749_v31 = vshrl.u32 %v6155_v11, 16  ;;  %v2776_v5 = vshll.u32 %v4054_v28, 16 }
 0x214   : > { %v6170_v48 = vpop.permute.xlu0 %2789  ;;  %v6175_v32 = vsel %vm3076_vm15, %v3051_v60, %v5978_v20  ;;  %v6185_v23 = vsel %vm2945_vm12, %v6733_v44, %v5857_v9  ;;  %v2984_v20 = vsel %vm2978_vm13, %v2951_v8, %v6735_v19  ;;  %v1751_v9 = vshll.u32 %v6155_v11, 16  ;;  %v1437_v19 = vld [vmem:[#allocation2 + $0xc0] sm:$0xe] }
 0x215   : > { %2303 = vrot.lane.b32.xlu1 %v2272_v13, %s4673_s18  ;;  %v2397_v26 = vsel %vm1840_vm7, %v2395_v38, %v2396_v2  ;;  %v3017_v8 = vsel %vm3011_vm14, %v2984_v20, %v5984_v4  ;;  %v2759_v29 = vrot.slane %v2757_v42, 1  ;;  %v2774_v60 = vshrl.u32 %v4054_v28, 16  ;;  %v6736_v13 = vld [vmem:[#allocation18_spill] sm:$0xff] }
 0x216   : > { %2029 = vrot.lane.b32.xlu0 %v6163_v6, %s4670_s9  ;;  %v1753_v35 = vrot.slane %v1751_v9, 1  ;;  %v2771_v2 = vrot.slane %v2769_v3, 1  ;;  %v2250_v4 = vshrl.u32 %v6163_v6, 16  ;;  %v2257_v33 = vshll.u32 %v6139_v62, 16 }
 0x217   : > { %v2804_v63 = vpop.permute.xlu1 %2803  ;;  %v2767_v46 = vor.u32 %v2766_v0, %v2762_v12  ;;  %v2254_v57 = vrot.slane %v2252_v10, 1  ;;  %v2778_v6 = vrot.slane %v2776_v5, 1  ;;  %v2781_v62 = vshll.u32 %v6215_v53, 16 }
 0x218   : > { %v3162_v51 = vsel %vm3142_vm2, %v3129_v37, %v2804_v63  ;;  %v6200_v55 = vpop.permute.xlu0 %2805  ;;  %v2760_v37 = vsel %vm1567_vm8, %v2755_v50, %v2759_v29  ;;  %v1758_v63 = vrot.slane %v1756_v56, 1  ;;  %v1754_v42 = vor.u32 %v1753_v35, %v1749_v31  ;;  %v6737_v29 = vld [vmem:[#allocation28_spill] sm:$0xff] }
 0x219   : > { %2431 = vrot.lane.b32.xlu1 %v2400_v17, %s4671_s8  ;;  %v6209_v21 = vsel %vm3175_vm3, %v3162_v51, %v6122_v58  ;;  %v2259_v51 = vrot.slane %v2257_v33, 1  ;;  %v2779_v3 = vor.u32 %v2778_v6, %v2774_v60 }
 0x21a   : > { %2429 = vrot.lane.b32.xlu0 %v2397_v26, %s4671_s8  ;;  %v2255_v26 = vor.u32 %v2254_v57, %v2250_v4 }
 0x21b   : > { %v1783_v15 = vpop.permute.xlu1 %1782 }
 0x21c   : > { %v2969_v58 = vsel %vm2945_vm12, %v6736_v13, %v1783_v15  ;;  %v2278_v38 = vpop.permute.xlu0 %2277  ;;  %v2260_v50 = vsel %vm1567_vm8, %v2255_v26, %v2259_v51 }
 0x21d   : > { %v3002_v39 = vsel %vm2978_vm13, %v2969_v58, %v6030_v30  ;;  %2543 = vrot.lane.b32.xlu1 %v4054_v28, %s4669_s21  ;;  %v3049_v44 = vsel %vm361_vm0, %v3017_v8, %v2278_v38  ;;  %v1438_v28 = vld [vmem:[#allocation2 + $0xcc] sm:$0xe] }
 0x21e   : > { %v3035_v45 = vsel %vm3011_vm14, %v3002_v39, %v5923_v14  ;;  %v3082_v24 = vsel %vm3076_vm15, %v3049_v44, %v6103_v41  ;;  %2541 = vrot.lane.b32.xlu0 %v6149_v52, %s4669_s21  ;;  %v4086_v12 = vcombine.low %v1438_v28, %v6165_v34  ;;  %v2908_v34 = vrot.slane %v6177_v49, 1  ;;  %v6738_v28 = vld [vmem:[#allocation22_spill] sm:$0xff]  ;;  %s4675_s21 = smov [#allocation6]  }
 0x21f   : > { %v6233_v30 = vpop.permute.xlu1 %2027  ;;  %v3115_v20 = vsel %vm3109_vm1, %v3082_v24, %v5928_v22  ;;  %v3067_v14 = vsel %vm361_vm0, %v3035_v45, %v6077_v40  ;;  %v2772_v22 = vsel %vm1567_vm8, %v2767_v46, %v2771_v2  ;;  %v4085_v40 = vcombine.low %v1437_v19, %v6130_v54  ;;  %s4599_s9 = sshll.u32 %s4675_s21, 4  ;;  %s4600_s9 = int_to_ptr.vmem [resolvable:$false] %s4599_s9 }
 0x220   : > { %v6240_v41 = vpop.permute.xlu0 %2521  ;;  %v3148_v52 = vsel %vm3142_vm2, %v3115_v20, %v6170_v48  ;;  %v3100_v9 = vsel %vm3076_vm15, %v3067_v14, %v5999_v43  ;;  %v2783_v48 = vrot.slane %v2781_v62, 1  ;;  %v3000_v43 = vsel %vm2978_vm13, %v6185_v23, %v5796_v1  ;;  %s4601_s8 = scalar_lea.vmem %s4600_s9, 8192 }
 0x221   : > { %2811 = vrot.lane.b32.xlu1 %v2760_v37, %s4674_s20  ;;  %v3181_v17 = vsel %vm3175_vm3, %v3148_v52, %v6018_v27  ;;  %v3033_v10 = vsel %vm3011_vm14, %v3000_v43, %v6002_v36  ;;  %v1759_v27 = vsel %vm1567_vm8, %v1754_v42, %v1758_v63  ;;  %v2907_v31 = vrot.slane %v4085_v40, 1 }
 0x222   : > { %2813 = vrot.lane.b32.xlu0 %v2772_v22, %s4674_s20  ;;  %4260 = vmatprep.mubr.msk.bf16.mxu1 %vm3235_vm4, %v3181_v17  ;;  %v2784_v1 = vsel %vm1567_vm8, %v2779_v3, %v2783_v48  ;;  %v2910_v36 = vrot.slane %v4086_v12, 1  ;;  %v2911_v23 = vrot.slane %v6215_v53, 1 }
 0x223   : > { %v2520_v0 = vpop.permute.xlu1 %2519 }
 0x224   : > { %v2294_v8 = vpop.permute.xlu0 %2293  ;;  %v2912_v53 = vsel %vm1840_vm7, %v2910_v36, %v2911_v23  ;;  %v3117_v19 = vsel %vm3109_vm1, %v6175_v32, %v2520_v0 }
 0x225   : > { %1790 = vrot.lane.b32.xlu1 %v1759_v27, %s4668_s23  ;;  %v3065_v54 = vsel %vm361_vm0, %v3033_v10, %v2294_v8  ;;  %v6739_v8 = vld [vmem:[#allocation25_spill] sm:$0xff] }
 0x226   : > { %v3098_v5 = vsel %vm3076_vm15, %v3065_v54, %v6137_v7  ;;  %2301 = vrot.lane.b32.xlu0 %v2260_v50, %s4673_s18  ;;  %v2909_v7 = vsel %vm1840_vm7, %v2907_v31, %v2908_v34 }
 0x227   : > { %v2536_v15 = vpop.permute.xlu1 %2535  ;;  %v3131_v35 = vsel %vm3109_vm1, %v3098_v5, %v6737_v29 }
 0x228   : > { %v3133_v56 = vsel %vm3109_vm1, %v3100_v9, %v2536_v15  ;;  %v2538_v60 = vpop.permute.xlu0 %2537  ;;  %v3164_v49 = vsel %vm3142_vm2, %v3131_v35, %v6200_v55 }
 0x229   : > { %2815 = vrot.lane.b32.xlu1 %v2784_v1, %s4674_s20  ;;  %v6278_v13 = vsel %vm3175_vm3, %v3164_v49, %v6051_v18  ;;  %s6481_s20 = scalar_lea.vmem [#allocation6], %s3891_s17  ;;  %s4162_s17 = sshll.u32 %s4738_s28, 12 }
 0x22a   : > { %2941 = vrot.lane.b32.xlu0 %v2909_v7, %s4672_s11  ;;  %s3811_s19 = sshll.u32 %s6481_s20, 4  ;;  %s6602_s23 = scalar_lea.hbm %s6662_s7, %s4162_s17  ;;  %s6606_s19 = int_to_ptr.vmem [resolvable:$true] %s3811_s19 }
 0x22b   : > { %v2412_v58 = vpop.permute.xlu1 %2411  ;;  %s3798_s28 = scalar_lea.sflag [#allocation5], %s4821_s16  ;;  %p4602_p8 = scmp.lt.s32.totalorder %s6606_s19, %s4600_s9 }
 0x22c   : > { %v2010_v38 = vpop.permute.xlu0 %2009 }
 0x22d   : > { %2943 = vrot.lane.b32.xlu1 %v2912_v53, %s4672_s11  ;;  %v3021_v3 = vsel %vm3011_vm14, %v6071_v25, %v2010_v38  ;;  %v3481_v38 = vld [vmem:[%s6660_s5] sm:$0x3] }
 0x22e   : > { %4325 = vmatprep.subr.msk.bf16.mxu0 %vm3268_vm5, %v3481_v38 }
 0x22f   : > { %v2428_v2 = vpop.permute.xlu1 %2427 }
 0x230   : > { %v2026_v4 = vpop.permute.xlu0 %2025 }
 0x231   : > { %v3037_v55 = vsel %vm3011_vm14, %v6110_v59, %v2026_v4 }
 0x233   : > { %v1900_v33 = vpop.permute.xlu1 %1899 }
 0x234   : > { %v2922_v39 = vpop.permute.xlu0 %2921 }
 0x237   : > { %v1916_v44 = vpop.permute.xlu1 %1915 }
 0x238   : > { %v6285_v46 = vpop.permute.xlu0 %1901 }
 0x23b   : > { %v2284_v18 = vpop.permute.xlu1 %2283 }
 0x23c   : > { %v2920_v57 = vpop.permute.xlu0 %2919 }
 0x23f   : > { %v1773_v45 = vpop.permute.xlu1 %1772 }
 0x240   : > { %v2410_v24 = vpop.permute.xlu0 %2409 }
 0x243   : > { %v2300_v6 = vpop.permute.xlu1 %2299 }
 0x244   : > { %v2936_v62 = vpop.permute.xlu0 %2935 }
 0x247   : > { %v2792_v20 = vpop.permute.xlu1 %2791 }
 0x248   : > { %v3150_v37 = vsel %vm3142_vm2, %v3117_v19, %v2792_v20  ;;  %v2426_v63 = vpop.permute.xlu0 %2425  ;;  %v6742_v19 = vld [vmem:[#allocation21_spill] sm:$0xff] }
 0x249   : > { %v3183_v59 = vsel %vm3175_vm3, %v3150_v37, %v2920_v57  ;;  %v6741_v57 = vld [vmem:[#allocation9_spill] sm:$0xff]  ;;  %v2959_v20 = vsel %vm2945_vm12, %v6742_v19, %v1773_v45  ;;  %v6743_v37 = vld [vmem:[#allocation27_spill] sm:$0xff] }
 0x24a   : > { %4261 = vmatmul.mubr.msk.bf16.gmra.mrb[20].mxu1 %vm3235_vm4, %v3183_v59 }
 0x24b   : > { %v1771_v14 = vpop.permute.xlu1 %1770 }
 0x24c   : > { %v2957_v42 = vsel %vm2945_vm12, %v6738_v28, %v1771_v14  ;;  %v2794_v52 = vpop.permute.xlu0 %2793 }
 0x24d   : > { %v2990_v9 = vsel %vm2978_vm13, %v2957_v42, %v1900_v33  ;;  %v2992_v42 = vsel %vm2978_vm13, %v2959_v20, %v6285_v46 }
 0x24e   : > { %v3023_v51 = vsel %vm3011_vm14, %v2990_v9, %v6160_v61  ;;  %v6744_v9 = vld [vmem:[#allocation24_spill] sm:$0xff] }
 0x24f   : > { %v2016_v22 = vpop.permute.xlu1 %2015  ;;  %v3055_v32 = vsel %vm361_vm0, %v3023_v51, %v2284_v18 }
 0x250   : > { %v6298_v17 = vpop.permute.xlu0 %2809  ;;  %v3088_v26 = vsel %vm3076_vm15, %v3055_v32, %v2412_v58 }
 0x253   : > { %v2808_v40 = vpop.permute.xlu1 %2807 }
 0x254   : > { %v3166_v48 = vsel %vm3142_vm2, %v3133_v56, %v2808_v40  ;;  %v2282_v12 = vpop.permute.xlu0 %2281 }
 0x255   : > { %v3053_v43 = vsel %vm361_vm0, %v3021_v3, %v2282_v12  ;;  %v6306_v0 = vsel %vm3175_vm3, %v3166_v48, %v2936_v62 }
 0x256   : > { %v3086_v61 = vsel %vm3076_vm15, %v3053_v43, %v2410_v24  ;;  %v6745_v43 = vld [vmem:[#allocation12_spill] sm:$0xff] }
 0x257   : > { %v1787_v10 = vpop.permute.xlu1 %1786  ;;  %v3119_v27 = vsel %vm3109_vm1, %v3086_v61, %v6240_v41 }
 0x258   : > { %v2973_v54 = vsel %vm2945_vm12, %v6739_v8, %v1787_v10  ;;  %v2526_v50 = vpop.permute.xlu0 %2525  ;;  %v3152_v25 = vsel %vm3142_vm2, %v3119_v27, %v2794_v52 }
 0x259   : > { %v3006_v31 = vsel %vm2978_vm13, %v2973_v54, %v1916_v44  ;;  %v3185_v34 = vsel %vm3175_vm3, %v3152_v25, %v2922_v39  ;;  %v6740_v39 = vld [vmem:[#allocation29_spill] sm:$0xff] }
 0x25a   : > { %v3039_v5 = vsel %vm3011_vm14, %v3006_v31, %v6233_v30  ;;  %4264 = vmatprep.mubr.msk.bf16.mxu1 %vm3235_vm4, %v3185_v34  ;;  %v6746_v31 = vld [vmem:[#allocation15_spill] sm:$0xff]  ;;  %v6747_v34 = vld [vmem:[#allocation26_spill] sm:$0xff] }
 0x25b   : > { %v2524_v1 = vpop.permute.xlu1 %2523  ;;  %v3071_v36 = vsel %vm361_vm0, %v3039_v5, %v2300_v6 }
 0x25c   : > { %v6321_v41 = vsel %vm3076_vm15, %v3071_v36, %v2428_v2  ;;  %v2298_v23 = vpop.permute.xlu0 %2297  ;;  %v3538_v2 = vsel %vm3268_vm5, %v3481_v38, 0  ;;  %v3121_v6 = vsel %vm3109_vm1, %v3088_v26, %v2524_v1  ;;  %v6748_v1 = vld [vmem:[#allocation10_spill] sm:$0xff] }
 0x25d   : > { %v3069_v15 = vsel %vm361_vm0, %v3037_v55, %v2298_v23  ;;  %4289 = vmatpush3.bf16.msra.mxu0 %v3538_v2 }
 0x25e   : > { %v3102_v29 = vsel %vm3076_vm15, %v3069_v15, %v2426_v63 }
 0x25f   : > { %v6325_v35 = vpop.permute.xlu1 %2539  ;;  %v3135_v56 = vsel %vm3109_vm1, %v3102_v29, %v2538_v60  ;;  %v6750_v29 = vld [vmem:[#allocation20_spill] sm:$0xff] }
 0x260   : > { %v2014_v49 = vpop.permute.xlu0 %2013 }
 0x261   : > { %v3025_v32 = vsel %vm3011_vm14, %v2992_v42, %v2014_v49 }
 0x263   : > { %v2416_v7 = vpop.permute.xlu1 %2415 }
 0x264   : > { %v2926_v30 = vpop.permute.xlu0 %2925 }
 0x267   : > { %v1904_v53 = vpop.permute.xlu1 %1903 }
 0x268   : > { %v1906_v58 = vpop.permute.xlu0 %1905 }
 0x26b   : > { %v2288_v4 = vpop.permute.xlu1 %2287 }
 0x26c   : > { %v2924_v55 = vpop.permute.xlu0 %2923 }
 0x26f   : > { %v1777_v33 = vpop.permute.xlu1 %1776 }
 0x270   : > { %v2963_v60 = vsel %vm2945_vm12, %v6740_v39, %v1777_v33  ;;  %v2414_v44 = vpop.permute.xlu0 %2413 }
 0x271   : > { %v2996_v18 = vsel %vm2978_vm13, %v2963_v60, %v1906_v58 }
 0x272   : > { %v3029_v24 = vsel %vm3011_vm14, %v2996_v18, %v6741_v57 }
 0x273   : > { %v2796_v62 = vpop.permute.xlu1 %2795  ;;  %v3061_v63 = vsel %vm361_vm0, %v3029_v24, %v6743_v37 }
 0x274   : > { %v3154_v59 = vsel %vm3142_vm2, %v3121_v6, %v2796_v62  ;;  %v2798_v14 = vpop.permute.xlu0 %2797  ;;  %v3094_v51 = vsel %vm3076_vm15, %v3061_v63, %v6744_v9 }
 0x275   : > { %v3187_v28 = vsel %vm3175_vm3, %v3154_v59, %v2924_v55  ;;  %v3127_v46 = vsel %vm3109_vm1, %v3094_v51, %v6745_v43  ;;  %v3168_v55 = vsel %vm3142_vm2, %v3135_v56, %v6298_v17 }
 0x276   : > { %4265 = vmatmul.mubr.msk.bf16.gmra.mrb[24].mxu1 %vm3235_vm4, %v3187_v28  ;;  %v3160_v5 = vsel %vm3142_vm2, %v3127_v46, %v6747_v34 }
 0x277   : > { %v1775_v52 = vpop.permute.xlu1 %1774  ;;  %v3193_v49 = vsel %vm3175_vm3, %v3160_v5, %v6750_v29 }
 0x278   : > { %v2961_v45 = vsel %vm2945_vm12, %v6015_v16, %v1775_v52  ;;  %v2286_v26 = vpop.permute.xlu0 %2285 }
 0x279   : > { %v2994_v40 = vsel %vm2978_vm13, %v2961_v45, %v1904_v53  ;;  %v3057_v3 = vsel %vm361_vm0, %v3025_v32, %v2286_v26  ;;  %v6416_v32 = vld [vmem:[%s6659_s4] ss:$0 sm:$0xff] }
 0x27a   : > { %v3027_v48 = vsel %vm3011_vm14, %v2994_v40, %v2016_v22  ;;  %v3090_v12 = vsel %vm3076_vm15, %v3057_v3, %v2414_v44 }
 0x27b   : > { %v3059_v61 = vsel %vm361_vm0, %v3027_v48, %v2288_v4  ;;  %v1789_v10 = vpop.permute.xlu1 %1788  ;;  %v3123_v27 = vsel %vm3109_vm1, %v3090_v12, %v2526_v50  ;;  %v6749_v50 = vld [vmem:[#allocation23_spill] sm:$0xff] }
 0x27c   : > { %v2938_v8 = vpop.permute.xlu0 %2937  ;;  %v3156_v16 = vsel %vm3142_vm2, %v3123_v27, %v2798_v14  ;;  %v3092_v54 = vsel %vm3076_vm15, %v3059_v61, %v2416_v7  ;;  %v2975_v17 = vsel %vm2945_vm12, %v6035_v47, %v1789_v10 }
 0x27d   : > { %v3189_v25 = vsel %vm3175_vm3, %v3156_v16, %v2926_v30  ;;  %v3125_v22 = vsel %vm3109_vm1, %v3092_v54, %v6746_v31  ;;  %v3201_v39 = vsel %vm3175_vm3, %v3168_v55, %v2938_v8 }
 0x27e   : > { %4268 = vmatprep.mubr.msk.bf16.mxu1 %vm3235_vm4, %v3189_v25  ;;  %v3158_v36 = vsel %vm3142_vm2, %v3125_v22, %v6748_v1 }
 0x27f   : > { %v1920_v23 = vpop.permute.xlu1 %1919  ;;  %v3191_v15 = vsel %vm3175_vm3, %v3158_v36, %v6749_v50 }
 0x280   : > { %4269 = vmatmul.mubr.msk.bf16.gmra.mrb[28].mxu1 %vm3235_vm4, %v3191_v15  ;;  %v2940_v7 = vpop.permute.xlu0 %2939 }
 0x281   : > { %4272 = vmatprep.mubr.msk.bf16.mxu1 %vm3235_vm4, %v3193_v49 }
 0x283   : > { %v2032_v30 = vpop.permute.xlu1 %2031 }
 0x284   : > { %v1918_v53 = vpop.permute.xlu0 %1917 }
 0x285   : > { %v3008_v56 = vsel %vm2978_vm13, %v2975_v17, %v1918_v53 }
 0x287   : > { %v2304_v58 = vpop.permute.xlu1 %2303 }
 0x288   : > { %4273 = vmatmul.mubr.msk.bf16.gmra.mrb[32].mxu1 %vm3235_vm4, %v6209_v21  ;;  %v2030_v38 = vpop.permute.xlu0 %2029  ;;  %v3137_v21 = vsel %vm3109_vm1, %v6321_v41, %v6325_v35 }
 0x289   : > { %4276 = vmatprep.mubr.msk.bf16.mxu1 %vm3235_vm4, %v6278_v13 }
 0x28b   : > { %v2432_v2 = vpop.permute.xlu1 %2431 }
 0x28c   : > { %v2430_v4 = vpop.permute.xlu0 %2429 }
 0x28f   : > { %v2544_v33 = vpop.permute.xlu1 %2543 }
 0x290   : > { %4277 = vmatmul.mubr.msk.bf16.gmra.mrb[36].mxu1 %vm3235_vm4, %v6306_v0  ;;  %v2542_v60 = vpop.permute.xlu0 %2541  ;;  %v3041_v0 = vsel %vm3011_vm14, %v3008_v56, %v2030_v38 }
 0x291   : > { %4280 = vmatprep.mubr.msk.bf16.mxu1 %vm3235_vm4, %v3201_v39 }
 0x293   : > { %v2812_v44 = vpop.permute.xlu1 %2811 }
 0x294   : > { %v3170_v13 = vsel %vm3142_vm2, %v3137_v21, %v2812_v44  ;;  %v2814_v18 = vpop.permute.xlu0 %2813 }
 0x295   : > { %v3203_v24 = vsel %vm3175_vm3, %v3170_v13, %v2940_v7 }
 0x297   : > { %v1791_v57 = vpop.permute.xlu1 %1790 }
 0x298   : > { %v2977_v6 = vsel %vm2945_vm12, %v6155_v11, %v1791_v57  ;;  %4281 = vmatmul.mubr.msk.bf16.gmra.mrb[40].mxu1 %vm3235_vm4, %v3203_v24  ;;  %v2302_v41 = vpop.permute.xlu0 %2301 }
 0x299   : > { %v3010_v35 = vsel %vm2978_vm13, %v2977_v6, %v1920_v23  ;;  %v3073_v62 = vsel %vm361_vm0, %v3041_v0, %v2302_v41 }
 0x29a   : > { %v3043_v19 = vsel %vm3011_vm14, %v3010_v35, %v2032_v30  ;;  %v3106_v47 = vsel %vm3076_vm15, %v3073_v62, %v2430_v4 }
 0x29b   : > { %v3075_v20 = vsel %vm361_vm0, %v3043_v19, %v2304_v58  ;;  %v2816_v37 = vpop.permute.xlu1 %2815  ;;  %v3139_v63 = vsel %vm3109_vm1, %v3106_v47, %v2542_v60 }
 0x29c   : > { %v3108_v59 = vsel %vm3076_vm15, %v3075_v20, %v2432_v2  ;;  %v3172_v11 = vsel %vm3142_vm2, %v3139_v63, %v2814_v18  ;;  %v2942_v14 = vpop.permute.xlu0 %2941 }
 0x29d   : > { %v3141_v28 = vsel %vm3109_vm1, %v3108_v59, %v2544_v33  ;;  %v3205_v42 = vsel %vm3175_vm3, %v3172_v11, %v2942_v14 }
 0x29e   : > { %v3174_v52 = vsel %vm3142_vm2, %v3141_v28, %v2816_v37  ;;  %4284 = vmatprep.mubr.msk.bf16.mxu1 %vm3235_vm4, %v3205_v42 }
 0x29f   : > { %v2944_v9 = vpop.permute.xlu1 %2943 }
 0x2a0   : > { %v3207_v51 = vsel %vm3175_vm3, %v3174_v52, %v2944_v9 }
 0x2a1   : > { %4285 = vmatmul.mubr.msk.bf16.gmra.mrb[44].mxu1 %vm3235_vm4, %v3207_v51 }
 0x2e1   : > { %v4258_v45 = vpop.f32.mrb[16].mxu1 }
 0x2e2   : > { %v3315_v26 = vadd.f32 %v4258_v45, %v6416_v32  ;;  %v3306_v40 = vpop.f32.mrb[17].mxu1 }
 0x2e3   : > { %v3307_v3 = vadd.f32 %v6416_v32, %v3306_v40  ;;  %v4259_v48 = vpop.f32.mrb[18].mxu1 }
 0x2e4   : > { %v3318_v12 = vadd.f32 %v4259_v48, %v6416_v32  ;;  %v3309_v43 = vpop.f32.mrb[19].mxu1  ;;  %v3435_v61 = vmax.f32 %v3315_v26, 0.0 }
 0x2e5   : > { %v3310_v46 = vadd.f32 %v6416_v32, %v3309_v43  ;;  %v3433_v27 = vmax.f32 %v3307_v3, 0.0 }
 0x2e6   : > { %v3436_v10 = vmax.f32 %v3318_v12, 0.0 }
 0x2e7   : > { %v3434_v8 = vmax.f32 %v3310_v46, 0.0 }
 0x2e8   : > { %v3466_v16 = vpack.c.bf16 %v3436_v10, %v3435_v61 }
 0x2e9   : > { %v3465_v54 = vpack.c.bf16 %v3434_v8, %v3433_v27 }
 0x2eb   : > { %4290 = vmatprep.mubr.msk.bf16.mxu0 %vm2945_vm12, %v3465_v54 }
 0x2ec   : > { %4291 = vmatmul.mubr.msk.bf16.vlgmr.msra.gmra.mrb[16].mxu0 %vm2945_vm12, %v3466_v16 }
 0x31d   : > { %v4262_v25 = vpop.f32.mrb[20].mxu1 }
 0x31e   : > { %v3331_v31 = vadd.f32 %v4262_v25, %v6416_v32  ;;  %v3322_v22 = vpop.f32.mrb[21].mxu1 }
 0x31f   : > { %v3323_v34 = vadd.f32 %v6416_v32, %v3322_v22  ;;  %v4263_v5 = vpop.f32.mrb[22].mxu1 }
 0x320   : > { %v3334_v1 = vadd.f32 %v4263_v5, %v6416_v32  ;;  %v3325_v36 = vpop.f32.mrb[23].mxu1  ;;  %v3439_v50 = vmax.f32 %v3331_v31, 0.0 }
 0x321   : > { %v3326_v23 = vadd.f32 %v6416_v32, %v3325_v36  ;;  %v3437_v29 = vmax.f32 %v3323_v34, 0.0 }
 0x322   : > { %v3440_v15 = vmax.f32 %v3334_v1, 0.0 }
 0x323   : > { %v3438_v49 = vmax.f32 %v3326_v23, 0.0 }
 0x324   : > { %v3468_v7 = vpack.c.bf16 %v3440_v15, %v3439_v50 }
 0x325   : > { %v3467_v30 = vpack.c.bf16 %v3438_v49, %v3437_v29 }
 0x327   : > { %4294 = vmatprep.mubr.msk.bf16.mxu0 %vm2945_vm12, %v3467_v30 }
 0x328   : > { %4295 = vmatmul.mubr.msk.bf16.gmra.mrb[20].mxu0 %vm2945_vm12, %v3468_v7 }
 0x349   : > { %v4266_v53 = vpop.f32.mrb[24].mxu1 }
 0x34a   : > { %v3347_v58 = vadd.f32 %v4266_v53, %v6416_v32  ;;  %v3338_v38 = vpop.f32.mrb[25].mxu1 }
 0x34b   : > { %v3339_v2 = vadd.f32 %v6416_v32, %v3338_v38  ;;  %v4267_v4 = vpop.f32.mrb[26].mxu1 }
 0x34c   : > { %v3350_v55 = vadd.f32 %v4267_v4, %v6416_v32  ;;  %v3341_v33 = vpop.f32.mrb[27].mxu1  ;;  %v3443_v60 = vmax.f32 %v3347_v58, 0.0 }
 0x34d   : > { %v3342_v39 = vadd.f32 %v6416_v32, %v3341_v33  ;;  %v3441_v44 = vmax.f32 %v3339_v2, 0.0 }
 0x34e   : > { %v3444_v21 = vmax.f32 %v3350_v55, 0.0 }
 0x34f   : > { %v3442_v13 = vmax.f32 %v3342_v39, 0.0 }
 0x350   : > { %v3470_v18 = vpack.c.bf16 %v3444_v21, %v3443_v60 }
 0x351   : > { %v3469_v17 = vpack.c.bf16 %v3442_v13, %v3441_v44 }
 0x353   : > { %4298 = vmatprep.mubr.msk.bf16.mxu0 %vm2945_vm12, %v3469_v17  ;;  %v4270_v56 = vpop.f32.mrb[28].mxu1 }
 0x354   : > { %4299 = vmatmul.mubr.msk.bf16.gmra.mrb[24].mxu0 %vm2945_vm12, %v3470_v18  ;;  %v3363_v57 = vadd.f32 %v4270_v56, %v6416_v32  ;;  %v3354_v24 = vpop.f32.mrb[29].mxu1 }
 0x355   : > { %v3355_v0 = vadd.f32 %v6416_v32, %v3354_v24  ;;  %v4271_v6 = vpop.f32.mrb[30].mxu1 }
 0x356   : > { %v3366_v41 = vadd.f32 %v4271_v6, %v6416_v32  ;;  %v3357_v35 = vpop.f32.mrb[31].mxu1  ;;  %v3447_v19 = vmax.f32 %v3363_v57, 0.0 }
 0x357   : > { %v3358_v62 = vadd.f32 %v6416_v32, %v3357_v35  ;;  %v3445_v20 = vmax.f32 %v3355_v0, 0.0 }
 0x358   : > { %v3448_v47 = vmax.f32 %v3366_v41, 0.0 }
 0x359   : > { %v3446_v37 = vmax.f32 %v3358_v62, 0.0  ;;  %v6469_v62 = vld [vmem:[%s6661_s6] ss:$0 sm:$0xff] }
 0x35a   : > { %v3472_v63 = vpack.c.bf16 %v3448_v47, %v3447_v19 }
 0x35b   : > { %v3471_v59 = vpack.c.bf16 %v3446_v37, %v3445_v20  ;;  %v4274_v11 = vpop.f32.mrb[32].mxu1 }
 0x35c   : > { %v3379_v14 = vadd.f32 %v4274_v11, %v6416_v32  ;;  %v3370_v28 = vpop.f32.mrb[33].mxu1 }
 0x35d   : > { %v3371_v42 = vadd.f32 %v6416_v32, %v3370_v28  ;;  %v4275_v52 = vpop.f32.mrb[34].mxu1  ;;  %4302 = vmatprep.mubr.msk.bf16.mxu0 %vm2945_vm12, %v3471_v59  ;;  %v4534_v28 = vld [vmem:[%s4827_s15] sm:$0xff] }
 0x35e   : > { %v3382_v9 = vadd.f32 %v4275_v52, %v6416_v32  ;;  %v3373_v51 = vpop.f32.mrb[35].mxu1  ;;  %4303 = vmatmul.mubr.msk.bf16.gmra.mrb[28].mxu0 %vm2945_vm12, %v3472_v63  ;;  %v3451_v26 = vmax.f32 %v3379_v14, 0.0  ;;  %v4533_v63 = vld [vmem:[%s4827_s15 + $0x10] sm:$0xff] }
 0x35f   : > { %v3374_v45 = vadd.f32 %v6416_v32, %v3373_v51  ;;  %v3449_v3 = vmax.f32 %v3371_v42, 0.0  ;;  %v4535_v51 = vld [vmem:[%s4827_s15 + $0x18] sm:$0xff] }
 0x360   : > { %v3452_v40 = vmax.f32 %v3382_v9, 0.0 }
 0x361   : > { %v3450_v48 = vmax.f32 %v3374_v45, 0.0 }
 0x362   : > { %v3474_v12 = vpack.c.bf16 %v3452_v40, %v3451_v26  ;;  %v4536_v40 = vld [vmem:[%s4827_s15 + $0x8] sm:$0xff] }
 0x363   : > { %v3473_v43 = vpack.c.bf16 %v3450_v48, %v3449_v3  ;;  %v4278_v46 = vpop.f32.mrb[36].mxu1 }
 0x364   : > { %v3395_v61 = vadd.f32 %v4278_v46, %v6416_v32  ;;  %v3386_v10 = vpop.f32.mrb[37].mxu1 }
 0x365   : > { %v3387_v27 = vadd.f32 %v6416_v32, %v3386_v10  ;;  %v4279_v8 = vpop.f32.mrb[38].mxu1  ;;  %4306 = vmatprep.mubr.msk.bf16.mxu0 %vm2945_vm12, %v3473_v43 }
 0x366   : > { %v3398_v16 = vadd.f32 %v4279_v8, %v6416_v32  ;;  %v3389_v54 = vpop.f32.mrb[39].mxu1  ;;  %4307 = vmatmul.mubr.msk.bf16.gmra.mrb[32].mxu0 %vm2945_vm12, %v3474_v12  ;;  %v3455_v31 = vmax.f32 %v3395_v61, 0.0  ;;  %v4537_v8 = vld [vmem:[%s4827_s15 + $0x30] sm:$0xff] }
 0x367   : > { %v3390_v25 = vadd.f32 %v6416_v32, %v3389_v54  ;;  %v3453_v34 = vmax.f32 %v3387_v27, 0.0 }
 0x368   : > { %v3456_v22 = vmax.f32 %v3398_v16, 0.0 }
 0x369   : > { %v3454_v5 = vmax.f32 %v3390_v25, 0.0 }
 0x36a   : > { %v3476_v1 = vpack.c.bf16 %v3456_v22, %v3455_v31  ;;  %v4538_v31 = vld [vmem:[%s4827_s15 + $0x20] sm:$0xff] }
 0x36b   : > { %v3475_v36 = vpack.c.bf16 %v3454_v5, %v3453_v34  ;;  %v4282_v23 = vpop.f32.mrb[40].mxu1 }
 0x36c   : > { %v3411_v50 = vadd.f32 %v4282_v23, %v6416_v32  ;;  %v3402_v15 = vpop.f32.mrb[41].mxu1 }
 0x36d   : > { %v3403_v29 = vadd.f32 %v6416_v32, %v3402_v15  ;;  %v4283_v49 = vpop.f32.mrb[42].mxu1  ;;  %4310 = vmatprep.mubr.msk.bf16.mxu0 %vm2945_vm12, %v3475_v36 }
 0x36e   : > { %v3414_v7 = vadd.f32 %v4283_v49, %v6416_v32  ;;  %v3405_v30 = vpop.f32.mrb[43].mxu1  ;;  %4311 = vmatmul.mubr.msk.bf16.gmra.mrb[36].mxu0 %vm2945_vm12, %v3476_v1  ;;  %v3459_v58 = vmax.f32 %v3411_v50, 0.0  ;;  %v4539_v1 = vld [vmem:[%s4827_s15 + $0x38] sm:$0xff]  ;;  %v4540_v50 = vld [vmem:[%s4827_s15 + $0x28] sm:$0xff] }
 0x36f   : > { %v3406_v53 = vadd.f32 %v6416_v32, %v3405_v30  ;;  %v3457_v2 = vmax.f32 %v3403_v29, 0.0 }
 0x370   : > { %v3460_v38 = vmax.f32 %v3414_v7, 0.0 }
 0x371   : > { %v3458_v4 = vmax.f32 %v3406_v53, 0.0 }
 0x372   : > { %v3478_v55 = vpack.c.bf16 %v3460_v38, %v3459_v58 }
 0x373   : > { %v3477_v33 = vpack.c.bf16 %v3458_v4, %v3457_v2  ;;  %v4541_v2 = vld [vmem:[%s4827_s15 + $0x50] sm:$0xff] }
 0x374   : > { %v4286_v39 = vpop.f32.mrb[44].mxu1 }
 0x375   : > { %v3427_v60 = vadd.f32 %v4286_v39, %v6416_v32  ;;  %v3418_v21 = vpop.f32.mrb[45].mxu1  ;;  %4314 = vmatprep.mubr.msk.bf16.mxu0 %vm2945_vm12, %v3477_v33  ;;  %v4542_v39 = vld [vmem:[%s4827_s15 + $0x40] sm:$0xff] }
 0x376   : > { %v3419_v44 = vadd.f32 %v6416_v32, %v3418_v21  ;;  %v4287_v13 = vpop.f32.mrb[46].mxu1  ;;  %4315 = vmatmul.mubr.msk.bf16.gmra.mrb[40].mxu0 %vm2945_vm12, %v3478_v55 }
 0x377   : > { %v3430_v18 = vadd.f32 %v4287_v13, %v6416_v32  ;;  %v3421_v17 = vpop.f32.mrb[47].mxu1  ;;  %v3463_v57 = vmax.f32 %v3427_v60, 0.0  ;;  %v4543_v13 = vld [vmem:[%s4827_s15 + $0x58] sm:$0xff] }
 0x378   : > { %v3422_v56 = vadd.f32 %v6416_v32, %v3421_v17  ;;  %v3461_v0 = vmax.f32 %v3419_v44, 0.0 }
 0x379   : > { %v3464_v24 = vmax.f32 %v3430_v18, 0.0 }
 0x37a   : > { %v3462_v6 = vmax.f32 %v3422_v56, 0.0  ;;  %v4544_v56 = vld [vmem:[%s4827_s15 + $0x48] sm:$0xff] }
 0x37b   : > { %v3480_v41 = vpack.c.bf16 %v3464_v24, %v3463_v57 }
 0x37c   : > { %v3479_v35 = vpack.c.bf16 %v3462_v6, %v3461_v0 }
 0x37e   : > { %4318 = vmatprep.mubr.msk.bf16.mxu0 %vm2945_vm12, %v3479_v35 }
 0x37f   : > { %4319 = vmatmul.mubr.msk.bf16.gmra.mrb[44].mxu0 %vm2945_vm12, %v3480_v41 }
 0x3bf   : > { %v4292_v19 = vpop.f32.mrb[16].mxu0 }
 0x3c0   : > { %v3583_v32 = vadd.f32 %v4292_v19, %v6469_v62  ;;  %v3574_v47 = vpop.f32.mrb[17].mxu0 }
 0x3c1   : > { %v3575_v20 = vadd.f32 %v6469_v62, %v3574_v47  ;;  %v4293_v37 = vpop.f32.mrb[18].mxu0  ;;  %v4545_v47 = vld [vmem:[%s4827_s15 + $0x70] sm:$0xff] }
 0x3c2   : > { %v3703_v59 = vadd.f32 %v4533_v63, %v3583_v32  ;;  %v3586_v11 = vadd.f32 %v4293_v37, %v6469_v62  ;;  %v3577_v14 = vpop.f32.mrb[19].mxu0 }
 0x3c3   : > { %v3701_v42 = vadd.f32 %v4534_v28, %v3575_v20  ;;  %v3578_v52 = vadd.f32 %v6469_v62, %v3577_v14 }
 0x3c4   : > { %v3735_v9 = vmax.f32 %v3703_v59, 0.0  ;;  %v3704_v45 = vadd.f32 %v4535_v51, %v3586_v11  ;;  %v4546_v59 = vld [vmem:[%s4827_s15 + $0x60] sm:$0xff]  ;;  %v4548_v51 = vld [vmem:[%s4827_s15 + $0x68] sm:$0xff] }
 0x3c5   : > { %v3733_v26 = vmax.f32 %v3701_v42, 0.0  ;;  %v3702_v3 = vadd.f32 %v4536_v40, %v3578_v52  ;;  %v4547_v42 = vld [vmem:[%s4827_s15 + $0x78] sm:$0xff] }
 0x3c6   : > { %3767 = vst.msk [vmem:[%s6481_s20 + $0x10] sm:$0xff] %vm361_vm0, %v3735_v9  ;;  %v3736_v48 = vmax.f32 %v3704_v45, 0.0 }
 0x3c7   : > { %3765 = vst.msk [vmem:[%s6481_s20] sm:$0xff] %vm361_vm0, %v3733_v26  ;;  %v3734_v12 = vmax.f32 %v3702_v3, 0.0 }
 0x3c8   : > { %3768 = vst.msk [vmem:[%s6481_s20 + $0x18] sm:$0xff] %vm361_vm0, %v3736_v48 }
 0x3c9   : > { %3766 = vst.msk [vmem:[%s6481_s20 + $0x8] sm:$0xff] %vm361_vm0, %v3734_v12 }
 0x3fb   : > { %v4296_v43 = vpop.f32.mrb[20].mxu0 }
 0x3fc   : > { %v3599_v46 = vadd.f32 %v4296_v43, %v6469_v62  ;;  %v3590_v61 = vpop.f32.mrb[21].mxu0 }
 0x3fd   : > { %v3591_v10 = vadd.f32 %v6469_v62, %v3590_v61  ;;  %v4297_v27 = vpop.f32.mrb[22].mxu0  ;;  %v4549_v61 = vld [vmem:[%s4827_s15 + $0x90] sm:$0xff] }
 0x3fe   : > { %v3707_v16 = vadd.f32 %v4537_v8, %v3599_v46  ;;  %v3602_v54 = vadd.f32 %v4297_v27, %v6469_v62  ;;  %v3593_v25 = vpop.f32.mrb[23].mxu0 }
 0x3ff   : > { %v3705_v22 = vadd.f32 %v4538_v31, %v3591_v10  ;;  %v3594_v34 = vadd.f32 %v6469_v62, %v3593_v25 }
 0x400   : > { %v3739_v5 = vmax.f32 %v3707_v16, 0.0  ;;  %v3708_v36 = vadd.f32 %v4539_v1, %v3602_v54  ;;  %v4550_v16 = vld [vmem:[%s4827_s15 + $0x80] sm:$0xff]  ;;  %v4552_v1 = vld [vmem:[%s4827_s15 + $0x88] sm:$0xff] }
 0x401   : > { %v3737_v23 = vmax.f32 %v3705_v22, 0.0  ;;  %v3706_v15 = vadd.f32 %v4540_v50, %v3594_v34  ;;  %v4551_v22 = vld [vmem:[%s4827_s15 + $0x98] sm:$0xff] }
 0x402   : > { %3771 = vst.msk [vmem:[%s6481_s20 + $0x30] sm:$0xff] %vm361_vm0, %v3739_v5  ;;  %v3740_v29 = vmax.f32 %v3708_v36, 0.0 }
 0x403   : > { %3769 = vst.msk [vmem:[%s6481_s20 + $0x20] sm:$0xff] %vm361_vm0, %v3737_v23  ;;  %v3738_v49 = vmax.f32 %v3706_v15, 0.0 }
 0x404   : > { %3772 = vst.msk [vmem:[%s6481_s20 + $0x38] sm:$0xff] %vm361_vm0, %v3740_v29 }
 0x405   : > { %3770 = vst.msk [vmem:[%s6481_s20 + $0x28] sm:$0xff] %vm361_vm0, %v3738_v49 }
 0x427   : > { %v4300_v7 = vpop.f32.mrb[24].mxu0 }
 0x428   : > { %v3615_v30 = vadd.f32 %v4300_v7, %v6469_v62  ;;  %v3606_v53 = vpop.f32.mrb[25].mxu0 }
 0x429   : > { %v3607_v58 = vadd.f32 %v6469_v62, %v3606_v53  ;;  %v4301_v38 = vpop.f32.mrb[26].mxu0  ;;  %v4553_v53 = vld [vmem:[%s4827_s15 + $0xb0] sm:$0xff] }
 0x42a   : > { %v3711_v4 = vadd.f32 %v4541_v2, %v3615_v30  ;;  %v3618_v55 = vadd.f32 %v4301_v38, %v6469_v62  ;;  %v3609_v33 = vpop.f32.mrb[27].mxu0 }
 0x42b   : > { %v3709_v60 = vadd.f32 %v4542_v39, %v3607_v58  ;;  %v3610_v21 = vadd.f32 %v6469_v62, %v3609_v33 }
 0x42c   : > { %v3743_v44 = vmax.f32 %v3711_v4, 0.0  ;;  %v3712_v18 = vadd.f32 %v4543_v13, %v3618_v55  ;;  %v4554_v4 = vld [vmem:[%s4827_s15 + $0xa0] sm:$0xff]  ;;  %v4556_v13 = vld [vmem:[%s4827_s15 + $0xa8] sm:$0xff] }
 0x42d   : > { %v3741_v17 = vmax.f32 %v3709_v60, 0.0  ;;  %v3710_v57 = vadd.f32 %v4544_v56, %v3610_v21  ;;  %v4555_v60 = vld [vmem:[%s4827_s15 + $0xb8] sm:$0xff] }
 0x42e   : > { %3775 = vst.msk [vmem:[%s6481_s20 + $0x50] sm:$0xff] %vm361_vm0, %v3743_v44  ;;  %v3744_v24 = vmax.f32 %v3712_v18, 0.0 }
 0x42f   : > { %3773 = vst.msk [vmem:[%s6481_s20 + $0x40] sm:$0xff] %vm361_vm0, %v3741_v17  ;;  %v3742_v0 = vmax.f32 %v3710_v57, 0.0 }
 0x430   : > { %3776 = vst.msk [vmem:[%s6481_s20 + $0x58] sm:$0xff] %vm361_vm0, %v3744_v24 }
 0x431   : > { %3774 = vst.msk [vmem:[%s6481_s20 + $0x48] sm:$0xff] %vm361_vm0, %v3742_v0  ;;  %v4304_v6 = vpop.f32.mrb[28].mxu0 }
 0x432   : > { %v3631_v41 = vadd.f32 %v4304_v6, %v6469_v62  ;;  %v3622_v35 = vpop.f32.mrb[29].mxu0 }
 0x433   : > { %v3623_v19 = vadd.f32 %v6469_v62, %v3622_v35  ;;  %v4305_v32 = vpop.f32.mrb[30].mxu0  ;;  %v4557_v35 = vld [vmem:[%s4827_s15 + $0xd0] sm:$0xff] }
 0x434   : > { %v3715_v20 = vadd.f32 %v4545_v47, %v3631_v41  ;;  %v3634_v37 = vadd.f32 %v4305_v32, %v6469_v62  ;;  %v3625_v63 = vpop.f32.mrb[31].mxu0 }
 0x435   : > { %v3713_v11 = vadd.f32 %v4546_v59, %v3623_v19  ;;  %v3626_v14 = vadd.f32 %v6469_v62, %v3625_v63 }
 0x436   : > { %v3747_v28 = vmax.f32 %v3715_v20, 0.0  ;;  %v3716_v52 = vadd.f32 %v4547_v42, %v3634_v37  ;;  %v4558_v20 = vld [vmem:[%s4827_s15 + $0xc0] sm:$0xff]  ;;  %v4560_v42 = vld [vmem:[%s4827_s15 + $0xc8] sm:$0xff] }
 0x437   : > { %v3745_v9 = vmax.f32 %v3713_v11, 0.0  ;;  %v3714_v45 = vadd.f32 %v4548_v51, %v3626_v14  ;;  %v4559_v11 = vld [vmem:[%s4827_s15 + $0xd8] sm:$0xff] }
 0x438   : > { %3779 = vst.msk [vmem:[%s6481_s20 + $0x70] sm:$0xff] %vm361_vm0, %v3747_v28  ;;  %v3748_v26 = vmax.f32 %v3716_v52, 0.0 }
 0x439   : > { %3777 = vst.msk [vmem:[%s6481_s20 + $0x60] sm:$0xff] %vm361_vm0, %v3745_v9  ;;  %v3746_v40 = vmax.f32 %v3714_v45, 0.0  ;;  %v4308_v3 = vpop.f32.mrb[32].mxu0 }
 0x43a   : > { %3780 = vst.msk [vmem:[%s6481_s20 + $0x78] sm:$0xff] %vm361_vm0, %v3748_v26  ;;  %v3647_v48 = vadd.f32 %v4308_v3, %v6469_v62  ;;  %v3638_v12 = vpop.f32.mrb[33].mxu0 }
 0x43b   : > { %3778 = vst.msk [vmem:[%s6481_s20 + $0x68] sm:$0xff] %vm361_vm0, %v3746_v40  ;;  %v3639_v43 = vadd.f32 %v6469_v62, %v3638_v12  ;;  %v4309_v46 = vpop.f32.mrb[34].mxu0  ;;  %v4561_v12 = vld [vmem:[%s4827_s15 + $0xf0] sm:$0xff] }
 0x43c   : > { %v3719_v10 = vadd.f32 %v4549_v61, %v3647_v48  ;;  %v3650_v27 = vadd.f32 %v4309_v46, %v6469_v62  ;;  %v3641_v8 = vpop.f32.mrb[35].mxu0 }
 0x43d   : > { %v3717_v54 = vadd.f32 %v4550_v16, %v3639_v43  ;;  %v3642_v25 = vadd.f32 %v6469_v62, %v3641_v8 }
 0x43e   : > { %v3751_v31 = vmax.f32 %v3719_v10, 0.0  ;;  %v3720_v34 = vadd.f32 %v4551_v22, %v3650_v27  ;;  %v4562_v10 = vld [vmem:[%s4827_s15 + $0xe0] sm:$0xff]  ;;  %v4564_v22 = vld [vmem:[%s4827_s15 + $0xe8] sm:$0xff] }
 0x43f   : > { %v3749_v5 = vmax.f32 %v3717_v54, 0.0  ;;  %v3718_v36 = vadd.f32 %v4552_v1, %v3642_v25  ;;  %v4563_v54 = vld [vmem:[%s4827_s15 + $0xf8] sm:$0xff]  ;;  %s4595_s15 = scalar_lea.vmem %s6606_s19, 4096 }
 0x440   : > { %3783 = vst.msk [vmem:[%s6481_s20 + $0x90] sm:$0xff] %vm361_vm0, %v3751_v31  ;;  %v3752_v23 = vmax.f32 %v3720_v34, 0.0  ;;  %p4596_p6 = scmp.ne.s32.totalorder %s6606_s19, %s4595_s15  ;;  %p4603_p10 = scmp.lt.s32.totalorder %s4601_s8, %s4595_s15 }
 0x441   : > { %3781 = vst.msk [vmem:[%s6481_s20 + $0x80] sm:$0xff] %vm361_vm0, %v3749_v5  ;;  %v3750_v50 = vmax.f32 %v3718_v36, 0.0  ;;  %v4312_v15 = vpop.f32.mrb[36].mxu0 }
 0x442   : > { %3784 = vst.msk [vmem:[%s6481_s20 + $0x98] sm:$0xff] %vm361_vm0, %v3752_v23  ;;  %v3663_v29 = vadd.f32 %v4312_v15, %v6469_v62  ;;  %v3654_v49 = vpop.f32.mrb[37].mxu0  ;;  %p4597_p12 = pnand %p4596_p6, %p6751_p11  ;;  %p4604_p0 = por %p4603_p10, %p4602_p8 }
 0x443   : > { %3782 = vst.msk [vmem:[%s6481_s20 + $0x88] sm:$0xff] %vm361_vm0, %v3750_v50  ;;  %v3655_v7 = vadd.f32 %v6469_v62, %v3654_v49  ;;  %v4313_v30 = vpop.f32.mrb[38].mxu0 }
 0x444   : > { %v3723_v58 = vadd.f32 %v4553_v53, %v3663_v29  ;;  %v3666_v38 = vadd.f32 %v4313_v30, %v6469_v62  ;;  %v3657_v2 = vpop.f32.mrb[39].mxu0  ;;  %p4598_p13 = pneg %p4597_p12 }
 0x445   : > { %v3721_v55 = vadd.f32 %v4554_v4, %v3655_v7  ;;  %v3658_v33 = vadd.f32 %v6469_v62, %v3657_v2 }
 0x446   : > { %v3755_v39 = vmax.f32 %v3723_v58, 0.0  ;;  %v3724_v21 = vadd.f32 %v4555_v60, %v3666_v38  ;;  %p4605_p2 = pnand %p4604_p0, %p4598_p13 }
 0x447   : > { %v3753_v44 = vmax.f32 %v3721_v55, 0.0  ;;  %v3722_v18 = vadd.f32 %v4556_v13, %v3658_v33 }
 0x448   : > { %3787 = vst.msk [vmem:[%s6481_s20 + $0xb0] sm:$0xff] %vm361_vm0, %v3755_v39  ;;  %v3756_v17 = vmax.f32 %v3724_v21, 0.0 }
 0x449   : > { %3785 = vst.msk [vmem:[%s6481_s20 + $0xa0] sm:$0xff] %vm361_vm0, %v3753_v44  ;;  %v3754_v56 = vmax.f32 %v3722_v18, 0.0  ;;  %v4316_v57 = vpop.f32.mrb[40].mxu0 }
 0x44a   : > { %3788 = vst.msk [vmem:[%s6481_s20 + $0xb8] sm:$0xff] %vm361_vm0, %v3756_v17  ;;  %v3679_v24 = vadd.f32 %v4316_v57, %v6469_v62  ;;  %v3670_v0 = vpop.f32.mrb[41].mxu0 }
 0x44b   : > { %3786 = vst.msk [vmem:[%s6481_s20 + $0xa8] sm:$0xff] %vm361_vm0, %v3754_v56  ;;  %v3671_v6 = vadd.f32 %v6469_v62, %v3670_v0  ;;  %v4317_v41 = vpop.f32.mrb[42].mxu0 }
 0x44c   : > { %v3727_v19 = vadd.f32 %v4557_v35, %v3679_v24  ;;  %v3682_v32 = vadd.f32 %v4317_v41, %v6469_v62  ;;  %v3673_v47 = vpop.f32.mrb[43].mxu0 }
 0x44d   : > { %v3725_v37 = vadd.f32 %v4558_v20, %v3671_v6  ;;  %v3674_v63 = vadd.f32 %v6469_v62, %v3673_v47 }
 0x44e   : > { %v3759_v59 = vmax.f32 %v3727_v19, 0.0  ;;  %v3728_v14 = vadd.f32 %v4559_v11, %v3682_v32 }
 0x44f   : > { %v3757_v28 = vmax.f32 %v3725_v37, 0.0  ;;  %v3726_v52 = vadd.f32 %v4560_v42, %v3674_v63 }
 0x450   : > { %3791 = vst.msk [vmem:[%s6481_s20 + $0xd0] sm:$0xff] %vm361_vm0, %v3759_v59  ;;  %v3760_v9 = vmax.f32 %v3728_v14, 0.0 }
 0x451   : > { %3789 = vst.msk [vmem:[%s6481_s20 + $0xc0] sm:$0xff] %vm361_vm0, %v3757_v28  ;;  %v3758_v51 = vmax.f32 %v3726_v52, 0.0 }
 0x452   : > { %3792 = vst.msk [vmem:[%s6481_s20 + $0xd8] sm:$0xff] %vm361_vm0, %v3760_v9  ;;  %v4320_v45 = vpop.f32.mrb[44].mxu0 }
 0x453   : > { %3790 = vst.msk [vmem:[%s6481_s20 + $0xc8] sm:$0xff] %vm361_vm0, %v3758_v51  ;;  %v3695_v26 = vadd.f32 %v4320_v45, %v6469_v62  ;;  %v3686_v40 = vpop.f32.mrb[45].mxu0 }
 0x454   : > { %v3687_v3 = vadd.f32 %v6469_v62, %v3686_v40  ;;  %v4321_v48 = vpop.f32.mrb[46].mxu0 }
 0x455   : > { %v3731_v43 = vadd.f32 %v4561_v12, %v3695_v26  ;;  %v3698_v46 = vadd.f32 %v4321_v48, %v6469_v62  ;;  %v3689_v61 = vpop.f32.mrb[47].mxu0 }
 0x456   : > { %v3729_v27 = vadd.f32 %v4562_v10, %v3687_v3  ;;  %v3690_v8 = vadd.f32 %v6469_v62, %v3689_v61 }
 0x457   : > { %v3763_v16 = vmax.f32 %v3731_v43, 0.0  ;;  %v3732_v25 = vadd.f32 %v4563_v54, %v3698_v46 }
 0x458   : > { %v3761_v31 = vmax.f32 %v3729_v27, 0.0  ;;  %v3730_v34 = vadd.f32 %v4564_v22, %v3690_v8 }
 0x459   : > { %3795 = vst.msk [vmem:[%s6481_s20 + $0xf0] sm:$0xff] %vm361_vm0, %v3763_v16  ;;  %v3764_v5 = vmax.f32 %v3732_v25, 0.0 }
 0x45a   : > { %3793 = vst.msk [vmem:[%s6481_s20 + $0xe0] sm:$0xff] %vm361_vm0, %v3761_v31  ;;  %v3762_v62 = vmax.f32 %v3730_v34, 0.0 }
 0x45b   : > { %3796 = vst.msk [vmem:[%s6481_s20 + $0xf8] sm:$0xff] %vm361_vm0, %v3764_v5 }
 0x45c   : > { %3794 = vst.msk [vmem:[%s6481_s20 + $0xe8] sm:$0xff] %vm361_vm0, %v3762_v62 }
 0x45d   : > { %4608 = shalt.err (!%p4605_p2)
}
 0x45e   : > { %s4609_s11 = scalar_lea.hbm %s6602_s23, 4096  ;;  %s4613_s17 = scalar_lea.hbm %s6662_s7, 8192 }
 0x45f   : > { %p4610_p4 = scmp.ne.s32.totalorder %s6602_s23, %s4609_s11  ;;  %p4614_p9 = scmp.lt.u32.totalorder %s6602_s23, %s6662_s7 }
 0x460   : > { %p4615_p1 = scmp.lt.u32.totalorder %s4613_s17, %s4609_s11  ;;  %p4617_p6 = scmp.lt.u32.totalorder %s4609_s11, %s6602_s23 }
 0x461   : > { %p4611_p5 = pnand %p4610_p4, %p6751_p11 }
 0x462   : > { %p4616_p3 = por %p4615_p1, %p4614_p9 }
 0x463   : > { %p4612_p7 = pneg %p4611_p5 }
 0x464   : > { %p4618_p12 = por %p4617_p6, %p4616_p3 }
 0x466   : > { %p4619_p13 = pnand %p4618_p12, %p4612_p7 }
 0x468   : > { %4622 = shalt.err (!%p4619_p13)
}
 0x469   : > { %s4676_s15 = smov 128  }
 0x46a   : > { %4328 = dma.vmem_to_hbm [thread:$0]  (%p6751_p11), %s6606_s19, 4096, %s6602_s23, %s3798_s28, %s4676_s15, %s4676_s15, %s4667_s12  }
 0x46b PF: > { %s3826_s21 = sand.u32 1, %s4649_s24   ;;  %p6752_p8 = scmp.ne.s32.totalorder %s6678_s14, 0 }
 0x46c   : > { %p6753_p10 = scmp.ge.s32.totalorder %s4661_s27, 2  ;;  %s3827_s9 = scalar_lea.sflag [#allocation5], %s3826_s21 }
 0x46e   : > { %p4335_p0 = pnand %p6753_p10, %p6752_p8 }
 0x470   : > { %4644 = dma.done.wait (!%p4335_p0), %s3827_s9, 4096  }
 0x471   : > { %4646 = vsyncadd (!%p4335_p0), %s3827_s9, 4294963200  ;;  %p20_p2 = scmp.ge.s32.totalorder %s4742_s30, 4   ;;  %s6754_s24 = smov %s4653_s25 }
 0x472   : > { %s6755_s25 = smov %s4657_s26  ;;  %s6756_s26 = smov %s4754_s10 }
 0x473   : > { %s6757_s27 = smov %s4742_s30  ;;  %22 = sbr.rel (!%p20_p2) target bundleno = 5 (0x5), region = 96 }
 0x47a   :  { %3832 = vsyncpa [#allocation4], 1 }
 0x47b   :  { %3834 = vsyncpa [#allocation4 + $0x1], 1 }
 0x47c   :  { %3835 = vsyncpa [#allocation5], 1 }
 0x47d   :  { %3837 = vsyncpa [#allocation5 + $0x1], 1 }

</bundles_post_ra>
